<compile_context>
chip_gen: v7x
topology: tpu7x:2x2x1
jax: 0.10.0
libtpu: 0.0.40
codegen_flags: <defaults>
</compile_context>

<pallas_src>
import jax
import jax.numpy as jnp
from jax.experimental import pallas as pl
from jax.experimental.pallas import tpu as pltpu

# Model hyperparameters (small, consistent with the annotated-transformer Encoder).
D_MODEL = 32
N_HEADS = 4
D_FF = 64
N_LAYERS = 2
EPS = 1e-6  # LayerNorm eps (added to std, matching the reference LayerNorm)


# ---------------------------------------------------------------------------
# In-kernel helpers
# ---------------------------------------------------------------------------
def _layer_norm(x, a, b, d):
    """Annotated-transformer LayerNorm: a*(x-mean)/(std+eps)+b with unbiased std.

    Exact division (no approx reciprocal) for parity with the PyTorch reference.
    """
    mean = jnp.mean(x, axis=-1, keepdims=True)
    xc = x - mean
    var = jnp.sum(xc * xc, axis=-1, keepdims=True) * (1.0 / (d - 1))
    return a * xc / (jnp.sqrt(var) + EPS) + b


# ---------------------------------------------------------------------------
# Fused Pallas kernel: whole encoder stack + final LayerNorm, full batch per step
# ---------------------------------------------------------------------------
def encoder_stack_kernel(x_ref, bias_ref, wqkv_ref, bqkv_ref, ln_ref, wo_ref,
                         biasd_ref, w1_ref, b1_ref, w2_ref, fn_ref, o_ref):
    f32 = jnp.float32
    bb, S, d_model = x_ref.shape                        # batch rows in this block, seq, d_model
    n_layers = wqkv_ref.shape[0]
    n_heads = wqkv_ref.shape[2]
    d_k = wqkv_ref.shape[4]
    scale = float(d_k) ** -0.5

    # Fold batch into the sublane (row) dim: all LN / projection / FFN math on [R, D], R = bb*S.
    x = jnp.concatenate([x_ref[b] for b in range(bb)], axis=0).astype(f32)    # [R, D]

    # Hoisted additive mask bias, broadcast over heads ONCE (outside the layer/head loops).
    bias_h = [jnp.broadcast_to(bias_ref[b], (n_heads, S, S)) for b in range(bb)]

    for l in range(n_layers):                           # static unroll; weights stay VMEM-resident
        # ---- sublayer 1: x + SelfAttn(LayerNorm(x)) ----
        xn = _layer_norm(x, ln_ref[l, 0], ln_ref[l, 1], d_model)

        # Head-major projections: only leading-dim weight indexing, no lane-offset activation slices.
        qh, kh, vh = [], [], []
        for h in range(n_heads):
            qh.append(jnp.dot(xn, wqkv_ref[l, 0, h], preferred_element_type=f32) + bqkv_ref[l, 0, h])
            kh.append(jnp.dot(xn, wqkv_ref[l, 1, h], preferred_element_type=f32) + bqkv_ref[l, 1, h])
            vh.append(jnp.dot(xn, wqkv_ref[l, 2, h], preferred_element_type=f32) + bqkv_ref[l, 2, h])
        q = jnp.stack(qh, axis=0)                       # [H, R, d_k]  (leading-axis stack)
        k = jnp.stack(kh, axis=0)
        v = jnp.stack(vh, axis=0)

        o_rows = []
        for b in range(bb):                             # static; per-batch attention block
            rows = slice(b * S, (b + 1) * S)            # sublane-aligned slice (multiple of 8)
            qb, kb, vb = q[:, rows, :], k[:, rows, :], v[:, rows, :]          # [H, S, d_k]
            # Batched-over-heads scores; contraction on the last dim of both (no kb.T transpose).
            s = jnp.einsum('hqe,hke->hqk', qb, kb,
                           preferred_element_type=f32) * scale + bias_h[b]    # [H, S, S]
            m = jnp.max(s, axis=-1, keepdims=True)
            ex = jnp.exp(s - m)
            p = ex * pl.reciprocal(jnp.sum(ex, axis=-1, keepdims=True), approx=True)
            ob = jnp.einsum('hqk,hke->hqe', p, vb, preferred_element_type=f32)  # [H, S, d_k]
            # One assembly step: heads contiguous -> a single [S, D] tile.
            o_rows.append(jnp.concatenate([ob[h] for h in range(n_heads)], axis=-1))
        o_all = o_rows[0] if bb == 1 else jnp.concatenate(o_rows, axis=0)     # [R, D]

        # Single output projection (one K=D matmul instead of per-head K=d_k accumulations).
        x = x + jnp.dot(o_all, wo_ref[l], preferred_element_type=f32) + biasd_ref[l, 0]

        # ---- sublayer 2: x + FFN(LayerNorm(x)) ----
        xn2 = _layer_norm(x, ln_ref[l, 2], ln_ref[l, 3], d_model)
        h1 = jnp.maximum(
            jnp.dot(xn2, w1_ref[l], preferred_element_type=f32) + b1_ref[l], 0.0)
        x = x + jnp.dot(h1, w2_ref[l], preferred_element_type=f32) + biasd_ref[l, 1]

    # ---- final LayerNorm (fused into the same kernel) ----
    y = _layer_norm(x, fn_ref[0], fn_ref[1], d_model)
    for b in range(bb):
        o_ref[b] = y[b * S:(b + 1) * S].astype(o_ref.dtype)


# ---------------------------------------------------------------------------
# Wrapper: single pallas_call, single grid step (batch folded into the block)
# ---------------------------------------------------------------------------
def _const_spec(shape):
    nd = len(shape)

    def idx(i):
        return (0,) * nd

    return pl.BlockSpec(shape, idx)


def encoder_forward(x, mask, params):
    B, S, D = x.shape
    # Additive attention bias, fully broadcast over query rows ONCE in the wrapper.
    bias = jnp.broadcast_to(
        jnp.where(mask > 0, 0.0, -1e9).astype(jnp.float32), (B, S, S))

    ordered = (params["wqkv"], params["bqkv"], params["ln"], params["wo"],
               params["bias_d"], params["w1"], params["b1"], params["w2"],
               params["fnorm"])

    in_specs = [_const_spec((B, S, D)),               # x  (whole batch in one block)
                _const_spec((B, S, S))]               # additive mask bias
    in_specs += [_const_spec(p.shape) for p in ordered]

    return pl.pallas_call(
        encoder_stack_kernel,
        out_shape=jax.ShapeDtypeStruct((B, S, D), x.dtype),
        grid=(1,),                                    # batch folded; one fixed-overhead step
        in_specs=in_specs,
        out_specs=_const_spec((B, S, D)),
        compiler_params=pltpu.CompilerParams(dimension_semantics=("arbitrary",)),
    )(x, bias, *ordered)


# ---------------------------------------------------------------------------
# Deterministic synthetic parameters (no checkpoint), consolidated layouts
# ---------------------------------------------------------------------------
def init_params(key, n_layers, d_model, n_heads, d_ff):
    d_k = d_model // n_heads
    f32 = jnp.float32
    std = 0.05
    ks = jax.random.split(key, 4)
    wqkv = jax.random.normal(ks[0], (n_layers, 3, n_heads, d_model, d_k), f32) * std
    wo = jax.random.normal(ks[1], (n_layers, d_model, d_model), f32) * std
    w1 = jax.random.normal(ks[2], (n_layers, d_model, d_ff), f32) * std
    w2 = jax.random.normal(ks[3], (n_layers, d_ff, d_model), f32) * std

    ones_d = jnp.ones((n_layers, 1, d_model), f32)
    zeros_d = jnp.zeros((n_layers, 1, d_model), f32)
    ln = jnp.stack([ones_d, zeros_d, ones_d, zeros_d], axis=1)        # [L,4,1,D] (ln1a,ln1b,ln2a,ln2b)
    bias_d = jnp.zeros((n_layers, 2, 1, d_model), f32)                # [L,2,1,D] (bo, b2)
    bqkv = jnp.zeros((n_layers, 3, n_heads, 1, d_k), f32)             # [L,3,H,1,d_k]
    b1 = jnp.zeros((n_layers, 1, d_ff), f32)
    fnorm = jnp.stack([jnp.ones((1, d_model), f32),
                       jnp.zeros((1, d_model), f32)], axis=0)         # [2,1,D] (final a, b)

    return {"wqkv": wqkv, "bqkv": bqkv, "ln": ln, "wo": wo, "bias_d": bias_d,
            "w1": w1, "b1": b1, "w2": w2, "fnorm": fnorm}


if __name__ == "__main__":
    B, S = 2, 8
    key = jax.random.PRNGKey(0)
    k_x, k_p = jax.random.split(key)

    x = jax.random.normal(k_x, (B, S, D_MODEL), jnp.float32)

    # Source mask: batch 0 attends to all 8 positions, batch 1 only to the first 6.
    lengths = jnp.array([8, 6], dtype=jnp.int32)
    pos = jnp.arange(S, dtype=jnp.int32)
    mask = (pos[None, None, :] < lengths[:, None, None]).astype(jnp.float32)  # [B, 1, S]

    params = init_params(k_p, N_LAYERS, D_MODEL, N_HEADS, D_FF)

    out = encoder_forward(x, mask, params)
    out = jax.block_until_ready(out)
    assert out.shape == (B, S, D_MODEL)
    print("KERNEL_OK")
</pallas_src>

<mosaic_0001>
module attributes {stable_mosaic.version = 11 : i64} {
  func.func @encoder_stack_kernel(%arg0: i32, %arg1: memref<2x8x32xf32, #tpu.memory_space<vmem>>, %arg2: memref<2x8x8xf32, #tpu.memory_space<vmem>>, %arg3: memref<2x3x4x32x8xf32, #tpu.memory_space<vmem>>, %arg4: memref<2x3x4x1x8xf32, #tpu.memory_space<vmem>>, %arg5: memref<2x4x1x32xf32, #tpu.memory_space<vmem>>, %arg6: memref<2x32x32xf32, #tpu.memory_space<vmem>>, %arg7: memref<2x2x1x32xf32, #tpu.memory_space<vmem>>, %arg8: memref<2x32x64xf32, #tpu.memory_space<vmem>>, %arg9: memref<2x1x64xf32, #tpu.memory_space<vmem>>, %arg10: memref<2x64x32xf32, #tpu.memory_space<vmem>>, %arg11: memref<2x1x32xf32, #tpu.memory_space<vmem>>, %arg12: memref<2x8x32xf32, #tpu.memory_space<vmem>>) attributes {dimension_semantics = [#tpu.dimension_semantics<arbitrary>], iteration_bounds = array<i64: 1>, scalar_prefetch = 0 : i64, scratch_operands = 0 : i64, tpu.core_type = #tpu.core_type<tc>, window_params = [{pipeline_mode = #tpu.pipeline_mode<synchronous>, transform_indices = @transform_0, window_bounds = array<i64: 2, 8, 32>}, {pipeline_mode = #tpu.pipeline_mode<synchronous>, transform_indices = @transform_1, window_bounds = array<i64: 2, 8, 8>}, {pipeline_mode = #tpu.pipeline_mode<synchronous>, transform_indices = @transform_2, window_bounds = array<i64: 2, 3, 4, 32, 8>}, {pipeline_mode = #tpu.pipeline_mode<synchronous>, transform_indices = @transform_3, window_bounds = array<i64: 2, 3, 4, 1, 8>}, {pipeline_mode = #tpu.pipeline_mode<synchronous>, transform_indices = @transform_4, window_bounds = array<i64: 2, 4, 1, 32>}, {pipeline_mode = #tpu.pipeline_mode<synchronous>, transform_indices = @transform_5, window_bounds = array<i64: 2, 32, 32>}, {pipeline_mode = #tpu.pipeline_mode<synchronous>, transform_indices = @transform_6, window_bounds = array<i64: 2, 2, 1, 32>}, {pipeline_mode = #tpu.pipeline_mode<synchronous>, transform_indices = @transform_7, window_bounds = array<i64: 2, 32, 64>}, {pipeline_mode = #tpu.pipeline_mode<synchronous>, transform_indices = @transform_8, window_bounds = array<i64: 2, 1, 64>}, {pipeline_mode = #tpu.pipeline_mode<synchronous>, transform_indices = @transform_9, window_bounds = array<i64: 2, 64, 32>}, {pipeline_mode = #tpu.pipeline_mode<synchronous>, transform_indices = @transform_10, window_bounds = array<i64: 2, 1, 32>}, {pipeline_mode = #tpu.pipeline_mode<synchronous>, transform_indices = @transform_11, window_bounds = array<i64: 2, 8, 32>}]} {
    %c0 = arith.constant 0 : index
    %c0_0 = arith.constant 0 : index
    %c0_1 = arith.constant 0 : index
    %0 = vector.load %arg1[%c0, %c0_0, %c0_1] : memref<2x8x32xf32, #tpu.memory_space<vmem>>, vector<1x8x32xf32>
    %1 = vector.shape_cast %0 : vector<1x8x32xf32> to vector<8x32xf32>
    %c1 = arith.constant 1 : index
    %c0_2 = arith.constant 0 : index
    %c0_3 = arith.constant 0 : index
    %2 = vector.load %arg1[%c1, %c0_2, %c0_3] : memref<2x8x32xf32, #tpu.memory_space<vmem>>, vector<1x8x32xf32>
    %3 = vector.shape_cast %2 : vector<1x8x32xf32> to vector<8x32xf32>
    %4 = tpu.concatenate %1, %3 in 0 : vector<8x32xf32>, vector<8x32xf32> -> vector<16x32xf32>
    %c0_4 = arith.constant 0 : index
    %c0_5 = arith.constant 0 : index
    %c0_6 = arith.constant 0 : index
    %5 = vector.load %arg2[%c0_4, %c0_5, %c0_6] : memref<2x8x8xf32, #tpu.memory_space<vmem>>, vector<1x8x8xf32>
    %6 = vector.shape_cast %5 : vector<1x8x8xf32> to vector<8x8xf32>
    %7 = vector.shape_cast %6 : vector<8x8xf32> to vector<1x8x8xf32>
    %8 = vector.broadcast %7 : vector<1x8x8xf32> to vector<4x8x8xf32>
    %c1_7 = arith.constant 1 : index
    %c0_8 = arith.constant 0 : index
    %c0_9 = arith.constant 0 : index
    %9 = vector.load %arg2[%c1_7, %c0_8, %c0_9] : memref<2x8x8xf32, #tpu.memory_space<vmem>>, vector<1x8x8xf32>
    %10 = vector.shape_cast %9 : vector<1x8x8xf32> to vector<8x8xf32>
    %11 = vector.shape_cast %10 : vector<8x8xf32> to vector<1x8x8xf32>
    %12 = vector.broadcast %11 : vector<1x8x8xf32> to vector<4x8x8xf32>
    %c0_10 = arith.constant 0 : index
    %c0_11 = arith.constant 0 : index
    %c0_12 = arith.constant 0 : index
    %c0_13 = arith.constant 0 : index
    %13 = vector.load %arg5[%c0_10, %c0_11, %c0_12, %c0_13] : memref<2x4x1x32xf32, #tpu.memory_space<vmem>>, vector<1x1x1x32xf32>
    %14 = vector.shape_cast %13 : vector<1x1x1x32xf32> to vector<1x32xf32>
    %c0_14 = arith.constant 0 : index
    %c1_15 = arith.constant 1 : index
    %c0_16 = arith.constant 0 : index
    %c0_17 = arith.constant 0 : index
    %15 = vector.load %arg5[%c0_14, %c1_15, %c0_16, %c0_17] : memref<2x4x1x32xf32, #tpu.memory_space<vmem>>, vector<1x1x1x32xf32>
    %16 = vector.shape_cast %15 : vector<1x1x1x32xf32> to vector<1x32xf32>
    %cst = arith.constant dense<0.000000e+00> : vector<16xf32>
    %17 = vector.multi_reduction <add>, %4, %cst [1] : vector<16x32xf32> to vector<16xf32>
    %18 = vector.shape_cast %17 : vector<16xf32> to vector<16x1xf32>
    %cst_18 = arith.constant 3.200000e+01 : f32
    %19 = vector.broadcast %cst_18 : f32 to vector<16x1xf32>
    %20 = arith.divf %18, %19 : vector<16x1xf32>
    %21 = vector.broadcast %20 : vector<16x1xf32> to vector<16x32xf32>
    %22 = arith.subf %4, %21 : vector<16x32xf32>
    %23 = arith.mulf %22, %22 : vector<16x32xf32>
    %cst_19 = arith.constant dense<0.000000e+00> : vector<16xf32>
    %24 = vector.multi_reduction <add>, %23, %cst_19 [1] : vector<16x32xf32> to vector<16xf32>
    %25 = vector.shape_cast %24 : vector<16xf32> to vector<16x1xf32>
    %cst_20 = arith.constant 0.0322580636 : f32
    %26 = vector.broadcast %cst_20 : f32 to vector<16x1xf32>
    %27 = arith.mulf %25, %26 : vector<16x1xf32>
    %28 = vector.broadcast %14 : vector<1x32xf32> to vector<16x32xf32>
    %29 = arith.mulf %28, %22 : vector<16x32xf32>
    %30 = math.sqrt %27 : vector<16x1xf32>
    %cst_21 = arith.constant 9.99999997E-7 : f32
    %31 = vector.broadcast %cst_21 : f32 to vector<16x1xf32>
    %32 = arith.addf %30, %31 : vector<16x1xf32>
    %33 = vector.broadcast %32 : vector<16x1xf32> to vector<16x32xf32>
    %34 = arith.divf %29, %33 : vector<16x32xf32>
    %35 = vector.broadcast %16 : vector<1x32xf32> to vector<16x32xf32>
    %36 = arith.addf %34, %35 : vector<16x32xf32>
    %c0_22 = arith.constant 0 : index
    %c0_23 = arith.constant 0 : index
    %c0_24 = arith.constant 0 : index
    %c0_25 = arith.constant 0 : index
    %c0_26 = arith.constant 0 : index
    %37 = vector.load %arg3[%c0_22, %c0_23, %c0_24, %c0_25, %c0_26] : memref<2x3x4x32x8xf32, #tpu.memory_space<vmem>>, vector<1x1x1x32x8xf32>
    %38 = vector.shape_cast %37 : vector<1x1x1x32x8xf32> to vector<32x8xf32>
    %cst_27 = arith.constant dense<0.000000e+00> : vector<16x8xf32>
    %39 = tpu.matmul %36, %38, %cst_27 {dimension_numbers = #tpu.dot_dimension_numbers<[1], [0], [0], [1], [0, 0, 1, 1], [], []>} : vector<16x32xf32>, vector<32x8xf32>, vector<16x8xf32> -> vector<16x8xf32>
    %c0_28 = arith.constant 0 : index
    %c0_29 = arith.constant 0 : index
    %c0_30 = arith.constant 0 : index
    %c0_31 = arith.constant 0 : index
    %c0_32 = arith.constant 0 : index
    %40 = vector.load %arg4[%c0_28, %c0_29, %c0_30, %c0_31, %c0_32] : memref<2x3x4x1x8xf32, #tpu.memory_space<vmem>>, vector<1x1x1x1x8xf32>
    %41 = vector.shape_cast %40 : vector<1x1x1x1x8xf32> to vector<1x8xf32>
    %42 = vector.broadcast %41 : vector<1x8xf32> to vector<16x8xf32>
    %43 = arith.addf %39, %42 : vector<16x8xf32>
    %c0_33 = arith.constant 0 : index
    %c1_34 = arith.constant 1 : index
    %c0_35 = arith.constant 0 : index
    %c0_36 = arith.constant 0 : index
    %c0_37 = arith.constant 0 : index
    %44 = vector.load %arg3[%c0_33, %c1_34, %c0_35, %c0_36, %c0_37] : memref<2x3x4x32x8xf32, #tpu.memory_space<vmem>>, vector<1x1x1x32x8xf32>
    %45 = vector.shape_cast %44 : vector<1x1x1x32x8xf32> to vector<32x8xf32>
    %cst_38 = arith.constant dense<0.000000e+00> : vector<16x8xf32>
    %46 = tpu.matmul %36, %45, %cst_38 {dimension_numbers = #tpu.dot_dimension_numbers<[1], [0], [0], [1], [0, 0, 1, 1], [], []>} : vector<16x32xf32>, vector<32x8xf32>, vector<16x8xf32> -> vector<16x8xf32>
    %c0_39 = arith.constant 0 : index
    %c1_40 = arith.constant 1 : index
    %c0_41 = arith.constant 0 : index
    %c0_42 = arith.constant 0 : index
    %c0_43 = arith.constant 0 : index
    %47 = vector.load %arg4[%c0_39, %c1_40, %c0_41, %c0_42, %c0_43] : memref<2x3x4x1x8xf32, #tpu.memory_space<vmem>>, vector<1x1x1x1x8xf32>
    %48 = vector.shape_cast %47 : vector<1x1x1x1x8xf32> to vector<1x8xf32>
    %49 = vector.broadcast %48 : vector<1x8xf32> to vector<16x8xf32>
    %50 = arith.addf %46, %49 : vector<16x8xf32>
    %c0_44 = arith.constant 0 : index
    %c2 = arith.constant 2 : index
    %c0_45 = arith.constant 0 : index
    %c0_46 = arith.constant 0 : index
    %c0_47 = arith.constant 0 : index
    %51 = vector.load %arg3[%c0_44, %c2, %c0_45, %c0_46, %c0_47] : memref<2x3x4x32x8xf32, #tpu.memory_space<vmem>>, vector<1x1x1x32x8xf32>
    %52 = vector.shape_cast %51 : vector<1x1x1x32x8xf32> to vector<32x8xf32>
    %cst_48 = arith.constant dense<0.000000e+00> : vector<16x8xf32>
    %53 = tpu.matmul %36, %52, %cst_48 {dimension_numbers = #tpu.dot_dimension_numbers<[1], [0], [0], [1], [0, 0, 1, 1], [], []>} : vector<16x32xf32>, vector<32x8xf32>, vector<16x8xf32> -> vector<16x8xf32>
    %c0_49 = arith.constant 0 : index
    %c2_50 = arith.constant 2 : index
    %c0_51 = arith.constant 0 : index
    %c0_52 = arith.constant 0 : index
    %c0_53 = arith.constant 0 : index
    %54 = vector.load %arg4[%c0_49, %c2_50, %c0_51, %c0_52, %c0_53] : memref<2x3x4x1x8xf32, #tpu.memory_space<vmem>>, vector<1x1x1x1x8xf32>
    %55 = vector.shape_cast %54 : vector<1x1x1x1x8xf32> to vector<1x8xf32>
    %56 = vector.broadcast %55 : vector<1x8xf32> to vector<16x8xf32>
    %57 = arith.addf %53, %56 : vector<16x8xf32>
    %c0_54 = arith.constant 0 : index
    %c0_55 = arith.constant 0 : index
    %c1_56 = arith.constant 1 : index
    %c0_57 = arith.constant 0 : index
    %c0_58 = arith.constant 0 : index
    %58 = vector.load %arg3[%c0_54, %c0_55, %c1_56, %c0_57, %c0_58] : memref<2x3x4x32x8xf32, #tpu.memory_space<vmem>>, vector<1x1x1x32x8xf32>
    %59 = vector.shape_cast %58 : vector<1x1x1x32x8xf32> to vector<32x8xf32>
    %cst_59 = arith.constant dense<0.000000e+00> : vector<16x8xf32>
    %60 = tpu.matmul %36, %59, %cst_59 {dimension_numbers = #tpu.dot_dimension_numbers<[1], [0], [0], [1], [0, 0, 1, 1], [], []>} : vector<16x32xf32>, vector<32x8xf32>, vector<16x8xf32> -> vector<16x8xf32>
    %c0_60 = arith.constant 0 : index
    %c0_61 = arith.constant 0 : index
    %c1_62 = arith.constant 1 : index
    %c0_63 = arith.constant 0 : index
    %c0_64 = arith.constant 0 : index
    %61 = vector.load %arg4[%c0_60, %c0_61, %c1_62, %c0_63, %c0_64] : memref<2x3x4x1x8xf32, #tpu.memory_space<vmem>>, vector<1x1x1x1x8xf32>
    %62 = vector.shape_cast %61 : vector<1x1x1x1x8xf32> to vector<1x8xf32>
    %63 = vector.broadcast %62 : vector<1x8xf32> to vector<16x8xf32>
    %64 = arith.addf %60, %63 : vector<16x8xf32>
    %c0_65 = arith.constant 0 : index
    %c1_66 = arith.constant 1 : index
    %c1_67 = arith.constant 1 : index
    %c0_68 = arith.constant 0 : index
    %c0_69 = arith.constant 0 : index
    %65 = vector.load %arg3[%c0_65, %c1_66, %c1_67, %c0_68, %c0_69] : memref<2x3x4x32x8xf32, #tpu.memory_space<vmem>>, vector<1x1x1x32x8xf32>
    %66 = vector.shape_cast %65 : vector<1x1x1x32x8xf32> to vector<32x8xf32>
    %cst_70 = arith.constant dense<0.000000e+00> : vector<16x8xf32>
    %67 = tpu.matmul %36, %66, %cst_70 {dimension_numbers = #tpu.dot_dimension_numbers<[1], [0], [0], [1], [0, 0, 1, 1], [], []>} : vector<16x32xf32>, vector<32x8xf32>, vector<16x8xf32> -> vector<16x8xf32>
    %c0_71 = arith.constant 0 : index
    %c1_72 = arith.constant 1 : index
    %c1_73 = arith.constant 1 : index
    %c0_74 = arith.constant 0 : index
    %c0_75 = arith.constant 0 : index
    %68 = vector.load %arg4[%c0_71, %c1_72, %c1_73, %c0_74, %c0_75] : memref<2x3x4x1x8xf32, #tpu.memory_space<vmem>>, vector<1x1x1x1x8xf32>
    %69 = vector.shape_cast %68 : vector<1x1x1x1x8xf32> to vector<1x8xf32>
    %70 = vector.broadcast %69 : vector<1x8xf32> to vector<16x8xf32>
    %71 = arith.addf %67, %70 : vector<16x8xf32>
    %c0_76 = arith.constant 0 : index
    %c2_77 = arith.constant 2 : index
    %c1_78 = arith.constant 1 : index
    %c0_79 = arith.constant 0 : index
    %c0_80 = arith.constant 0 : index
    %72 = vector.load %arg3[%c0_76, %c2_77, %c1_78, %c0_79, %c0_80] : memref<2x3x4x32x8xf32, #tpu.memory_space<vmem>>, vector<1x1x1x32x8xf32>
    %73 = vector.shape_cast %72 : vector<1x1x1x32x8xf32> to vector<32x8xf32>
    %cst_81 = arith.constant dense<0.000000e+00> : vector<16x8xf32>
    %74 = tpu.matmul %36, %73, %cst_81 {dimension_numbers = #tpu.dot_dimension_numbers<[1], [0], [0], [1], [0, 0, 1, 1], [], []>} : vector<16x32xf32>, vector<32x8xf32>, vector<16x8xf32> -> vector<16x8xf32>
    %c0_82 = arith.constant 0 : index
    %c2_83 = arith.constant 2 : index
    %c1_84 = arith.constant 1 : index
    %c0_85 = arith.constant 0 : index
    %c0_86 = arith.constant 0 : index
    %75 = vector.load %arg4[%c0_82, %c2_83, %c1_84, %c0_85, %c0_86] : memref<2x3x4x1x8xf32, #tpu.memory_space<vmem>>, vector<1x1x1x1x8xf32>
    %76 = vector.shape_cast %75 : vector<1x1x1x1x8xf32> to vector<1x8xf32>
    %77 = vector.broadcast %76 : vector<1x8xf32> to vector<16x8xf32>
    %78 = arith.addf %74, %77 : vector<16x8xf32>
    %c0_87 = arith.constant 0 : index
    %c0_88 = arith.constant 0 : index
    %c2_89 = arith.constant 2 : index
    %c0_90 = arith.constant 0 : index
    %c0_91 = arith.constant 0 : index
    %79 = vector.load %arg3[%c0_87, %c0_88, %c2_89, %c0_90, %c0_91] : memref<2x3x4x32x8xf32, #tpu.memory_space<vmem>>, vector<1x1x1x32x8xf32>
    %80 = vector.shape_cast %79 : vector<1x1x1x32x8xf32> to vector<32x8xf32>
    %cst_92 = arith.constant dense<0.000000e+00> : vector<16x8xf32>
    %81 = tpu.matmul %36, %80, %cst_92 {dimension_numbers = #tpu.dot_dimension_numbers<[1], [0], [0], [1], [0, 0, 1, 1], [], []>} : vector<16x32xf32>, vector<32x8xf32>, vector<16x8xf32> -> vector<16x8xf32>
    %c0_93 = arith.constant 0 : index
    %c0_94 = arith.constant 0 : index
    %c2_95 = arith.constant 2 : index
    %c0_96 = arith.constant 0 : index
    %c0_97 = arith.constant 0 : index
    %82 = vector.load %arg4[%c0_93, %c0_94, %c2_95, %c0_96, %c0_97] : memref<2x3x4x1x8xf32, #tpu.memory_space<vmem>>, vector<1x1x1x1x8xf32>
    %83 = vector.shape_cast %82 : vector<1x1x1x1x8xf32> to vector<1x8xf32>
    %84 = vector.broadcast %83 : vector<1x8xf32> to vector<16x8xf32>
    %85 = arith.addf %81, %84 : vector<16x8xf32>
    %c0_98 = arith.constant 0 : index
    %c1_99 = arith.constant 1 : index
    %c2_100 = arith.constant 2 : index
    %c0_101 = arith.constant 0 : index
    %c0_102 = arith.constant 0 : index
    %86 = vector.load %arg3[%c0_98, %c1_99, %c2_100, %c0_101, %c0_102] : memref<2x3x4x32x8xf32, #tpu.memory_space<vmem>>, vector<1x1x1x32x8xf32>
    %87 = vector.shape_cast %86 : vector<1x1x1x32x8xf32> to vector<32x8xf32>
    %cst_103 = arith.constant dense<0.000000e+00> : vector<16x8xf32>
    %88 = tpu.matmul %36, %87, %cst_103 {dimension_numbers = #tpu.dot_dimension_numbers<[1], [0], [0], [1], [0, 0, 1, 1], [], []>} : vector<16x32xf32>, vector<32x8xf32>, vector<16x8xf32> -> vector<16x8xf32>
    %c0_104 = arith.constant 0 : index
    %c1_105 = arith.constant 1 : index
    %c2_106 = arith.constant 2 : index
    %c0_107 = arith.constant 0 : index
    %c0_108 = arith.constant 0 : index
    %89 = vector.load %arg4[%c0_104, %c1_105, %c2_106, %c0_107, %c0_108] : memref<2x3x4x1x8xf32, #tpu.memory_space<vmem>>, vector<1x1x1x1x8xf32>
    %90 = vector.shape_cast %89 : vector<1x1x1x1x8xf32> to vector<1x8xf32>
    %91 = vector.broadcast %90 : vector<1x8xf32> to vector<16x8xf32>
    %92 = arith.addf %88, %91 : vector<16x8xf32>
    %c0_109 = arith.constant 0 : index
    %c2_110 = arith.constant 2 : index
    %c2_111 = arith.constant 2 : index
    %c0_112 = arith.constant 0 : index
    %c0_113 = arith.constant 0 : index
    %93 = vector.load %arg3[%c0_109, %c2_110, %c2_111, %c0_112, %c0_113] : memref<2x3x4x32x8xf32, #tpu.memory_space<vmem>>, vector<1x1x1x32x8xf32>
    %94 = vector.shape_cast %93 : vector<1x1x1x32x8xf32> to vector<32x8xf32>
    %cst_114 = arith.constant dense<0.000000e+00> : vector<16x8xf32>
    %95 = tpu.matmul %36, %94, %cst_114 {dimension_numbers = #tpu.dot_dimension_numbers<[1], [0], [0], [1], [0, 0, 1, 1], [], []>} : vector<16x32xf32>, vector<32x8xf32>, vector<16x8xf32> -> vector<16x8xf32>
    %c0_115 = arith.constant 0 : index
    %c2_116 = arith.constant 2 : index
    %c2_117 = arith.constant 2 : index
    %c0_118 = arith.constant 0 : index
    %c0_119 = arith.constant 0 : index
    %96 = vector.load %arg4[%c0_115, %c2_116, %c2_117, %c0_118, %c0_119] : memref<2x3x4x1x8xf32, #tpu.memory_space<vmem>>, vector<1x1x1x1x8xf32>
    %97 = vector.shape_cast %96 : vector<1x1x1x1x8xf32> to vector<1x8xf32>
    %98 = vector.broadcast %97 : vector<1x8xf32> to vector<16x8xf32>
    %99 = arith.addf %95, %98 : vector<16x8xf32>
    %c0_120 = arith.constant 0 : index
    %c0_121 = arith.constant 0 : index
    %c3 = arith.constant 3 : index
    %c0_122 = arith.constant 0 : index
    %c0_123 = arith.constant 0 : index
    %100 = vector.load %arg3[%c0_120, %c0_121, %c3, %c0_122, %c0_123] : memref<2x3x4x32x8xf32, #tpu.memory_space<vmem>>, vector<1x1x1x32x8xf32>
    %101 = vector.shape_cast %100 : vector<1x1x1x32x8xf32> to vector<32x8xf32>
    %cst_124 = arith.constant dense<0.000000e+00> : vector<16x8xf32>
    %102 = tpu.matmul %36, %101, %cst_124 {dimension_numbers = #tpu.dot_dimension_numbers<[1], [0], [0], [1], [0, 0, 1, 1], [], []>} : vector<16x32xf32>, vector<32x8xf32>, vector<16x8xf32> -> vector<16x8xf32>
    %c0_125 = arith.constant 0 : index
    %c0_126 = arith.constant 0 : index
    %c3_127 = arith.constant 3 : index
    %c0_128 = arith.constant 0 : index
    %c0_129 = arith.constant 0 : index
    %103 = vector.load %arg4[%c0_125, %c0_126, %c3_127, %c0_128, %c0_129] : memref<2x3x4x1x8xf32, #tpu.memory_space<vmem>>, vector<1x1x1x1x8xf32>
    %104 = vector.shape_cast %103 : vector<1x1x1x1x8xf32> to vector<1x8xf32>
    %105 = vector.broadcast %104 : vector<1x8xf32> to vector<16x8xf32>
    %106 = arith.addf %102, %105 : vector<16x8xf32>
    %c0_130 = arith.constant 0 : index
    %c1_131 = arith.constant 1 : index
    %c3_132 = arith.constant 3 : index
    %c0_133 = arith.constant 0 : index
    %c0_134 = arith.constant 0 : index
    %107 = vector.load %arg3[%c0_130, %c1_131, %c3_132, %c0_133, %c0_134] : memref<2x3x4x32x8xf32, #tpu.memory_space<vmem>>, vector<1x1x1x32x8xf32>
    %108 = vector.shape_cast %107 : vector<1x1x1x32x8xf32> to vector<32x8xf32>
    %cst_135 = arith.constant dense<0.000000e+00> : vector<16x8xf32>
    %109 = tpu.matmul %36, %108, %cst_135 {dimension_numbers = #tpu.dot_dimension_numbers<[1], [0], [0], [1], [0, 0, 1, 1], [], []>} : vector<16x32xf32>, vector<32x8xf32>, vector<16x8xf32> -> vector<16x8xf32>
    %c0_136 = arith.constant 0 : index
    %c1_137 = arith.constant 1 : index
    %c3_138 = arith.constant 3 : index
    %c0_139 = arith.constant 0 : index
    %c0_140 = arith.constant 0 : index
    %110 = vector.load %arg4[%c0_136, %c1_137, %c3_138, %c0_139, %c0_140] : memref<2x3x4x1x8xf32, #tpu.memory_space<vmem>>, vector<1x1x1x1x8xf32>
    %111 = vector.shape_cast %110 : vector<1x1x1x1x8xf32> to vector<1x8xf32>
    %112 = vector.broadcast %111 : vector<1x8xf32> to vector<16x8xf32>
    %113 = arith.addf %109, %112 : vector<16x8xf32>
    %c0_141 = arith.constant 0 : index
    %c2_142 = arith.constant 2 : index
    %c3_143 = arith.constant 3 : index
    %c0_144 = arith.constant 0 : index
    %c0_145 = arith.constant 0 : index
    %114 = vector.load %arg3[%c0_141, %c2_142, %c3_143, %c0_144, %c0_145] : memref<2x3x4x32x8xf32, #tpu.memory_space<vmem>>, vector<1x1x1x32x8xf32>
    %115 = vector.shape_cast %114 : vector<1x1x1x32x8xf32> to vector<32x8xf32>
    %cst_146 = arith.constant dense<0.000000e+00> : vector<16x8xf32>
    %116 = tpu.matmul %36, %115, %cst_146 {dimension_numbers = #tpu.dot_dimension_numbers<[1], [0], [0], [1], [0, 0, 1, 1], [], []>} : vector<16x32xf32>, vector<32x8xf32>, vector<16x8xf32> -> vector<16x8xf32>
    %c0_147 = arith.constant 0 : index
    %c2_148 = arith.constant 2 : index
    %c3_149 = arith.constant 3 : index
    %c0_150 = arith.constant 0 : index
    %c0_151 = arith.constant 0 : index
    %117 = vector.load %arg4[%c0_147, %c2_148, %c3_149, %c0_150, %c0_151] : memref<2x3x4x1x8xf32, #tpu.memory_space<vmem>>, vector<1x1x1x1x8xf32>
    %118 = vector.shape_cast %117 : vector<1x1x1x1x8xf32> to vector<1x8xf32>
    %119 = vector.broadcast %118 : vector<1x8xf32> to vector<16x8xf32>
    %120 = arith.addf %116, %119 : vector<16x8xf32>
    %121 = vector.shape_cast %43 : vector<16x8xf32> to vector<1x16x8xf32>
    %122 = vector.shape_cast %64 : vector<16x8xf32> to vector<1x16x8xf32>
    %123 = vector.shape_cast %85 : vector<16x8xf32> to vector<1x16x8xf32>
    %124 = vector.shape_cast %106 : vector<16x8xf32> to vector<1x16x8xf32>
    %125 = tpu.concatenate %121, %122, %123, %124 in 0 : vector<1x16x8xf32>, vector<1x16x8xf32>, vector<1x16x8xf32>, vector<1x16x8xf32> -> vector<4x16x8xf32>
    %126 = vector.shape_cast %50 : vector<16x8xf32> to vector<1x16x8xf32>
    %127 = vector.shape_cast %71 : vector<16x8xf32> to vector<1x16x8xf32>
    %128 = vector.shape_cast %92 : vector<16x8xf32> to vector<1x16x8xf32>
    %129 = vector.shape_cast %113 : vector<16x8xf32> to vector<1x16x8xf32>
    %130 = tpu.concatenate %126, %127, %128, %129 in 0 : vector<1x16x8xf32>, vector<1x16x8xf32>, vector<1x16x8xf32>, vector<1x16x8xf32> -> vector<4x16x8xf32>
    %131 = vector.shape_cast %57 : vector<16x8xf32> to vector<1x16x8xf32>
    %132 = vector.shape_cast %78 : vector<16x8xf32> to vector<1x16x8xf32>
    %133 = vector.shape_cast %99 : vector<16x8xf32> to vector<1x16x8xf32>
    %134 = vector.shape_cast %120 : vector<16x8xf32> to vector<1x16x8xf32>
    %135 = tpu.concatenate %131, %132, %133, %134 in 0 : vector<1x16x8xf32>, vector<1x16x8xf32>, vector<1x16x8xf32>, vector<1x16x8xf32> -> vector<4x16x8xf32>
    %136 = vector.extract_strided_slice %125 {offsets = [0, 0, 0], sizes = [4, 8, 8], strides = [1, 1, 1]} : vector<4x16x8xf32> to vector<4x8x8xf32>
    %137 = vector.extract_strided_slice %130 {offsets = [0, 0, 0], sizes = [4, 8, 8], strides = [1, 1, 1]} : vector<4x16x8xf32> to vector<4x8x8xf32>
    %138 = vector.extract_strided_slice %135 {offsets = [0, 0, 0], sizes = [4, 8, 8], strides = [1, 1, 1]} : vector<4x16x8xf32> to vector<4x8x8xf32>
    "tpu.trace_start"() <{level = 10 : i32, message = "hqe,hke->hqk"}> : () -> ()
    %cst_152 = arith.constant dense<0.000000e+00> : vector<4x8x8xf32>
    %139 = tpu.matmul %136, %137, %cst_152 {dimension_numbers = #tpu.dot_dimension_numbers<[2], [2], [1], [1], [0, 0, 0, 1, 1, 1], [0], [0]>} : vector<4x8x8xf32>, vector<4x8x8xf32>, vector<4x8x8xf32> -> vector<4x8x8xf32>
    "tpu.trace_stop"() : () -> ()
    %cst_153 = arith.constant 0.353553385 : f32
    %140 = vector.broadcast %cst_153 : f32 to vector<4x8x8xf32>
    %141 = arith.mulf %139, %140 : vector<4x8x8xf32>
    %142 = arith.addf %141, %8 : vector<4x8x8xf32>
    %cst_154 = arith.constant dense<0xFF800000> : vector<4x8xf32>
    %143 = vector.multi_reduction <maximumf>, %142, %cst_154 [2] : vector<4x8x8xf32> to vector<4x8xf32>
    %144 = vector.shape_cast %143 : vector<4x8xf32> to vector<4x8x1xf32>
    %145 = vector.broadcast %144 : vector<4x8x1xf32> to vector<4x8x8xf32>
    %146 = arith.subf %142, %145 : vector<4x8x8xf32>
    %147 = math.exp %146 : vector<4x8x8xf32>
    %cst_155 = arith.constant dense<0.000000e+00> : vector<4x8xf32>
    %148 = vector.multi_reduction <add>, %147, %cst_155 [2] : vector<4x8x8xf32> to vector<4x8xf32>
    %149 = vector.shape_cast %148 : vector<4x8xf32> to vector<4x8x1xf32>
    %150 = tpu.reciprocal %149 {approx = true} : vector<4x8x1xf32> -> vector<4x8x1xf32>
    %151 = vector.broadcast %150 : vector<4x8x1xf32> to vector<4x8x8xf32>
    %152 = arith.mulf %147, %151 : vector<4x8x8xf32>
    "tpu.trace_start"() <{level = 10 : i32, message = "hqk,hke->hqe"}> : () -> ()
    %cst_156 = arith.constant dense<0.000000e+00> : vector<4x8x8xf32>
    %153 = tpu.matmul %152, %138, %cst_156 {dimension_numbers = #tpu.dot_dimension_numbers<[2], [1], [1], [2], [0, 0, 0, 1, 1, 2], [0], [0]>} : vector<4x8x8xf32>, vector<4x8x8xf32>, vector<4x8x8xf32> -> vector<4x8x8xf32>
    "tpu.trace_stop"() : () -> ()
    %154 = vector.extract_strided_slice %153 {offsets = [0, 0, 0], sizes = [1, 8, 8], strides = [1, 1, 1]} : vector<4x8x8xf32> to vector<1x8x8xf32>
    %155 = vector.shape_cast %154 : vector<1x8x8xf32> to vector<8x8xf32>
    %156 = vector.extract_strided_slice %153 {offsets = [1, 0, 0], sizes = [1, 8, 8], strides = [1, 1, 1]} : vector<4x8x8xf32> to vector<1x8x8xf32>
    %157 = vector.shape_cast %156 : vector<1x8x8xf32> to vector<8x8xf32>
    %158 = vector.extract_strided_slice %153 {offsets = [2, 0, 0], sizes = [1, 8, 8], strides = [1, 1, 1]} : vector<4x8x8xf32> to vector<1x8x8xf32>
    %159 = vector.shape_cast %158 : vector<1x8x8xf32> to vector<8x8xf32>
    %160 = vector.extract_strided_slice %153 {offsets = [3, 0, 0], sizes = [1, 8, 8], strides = [1, 1, 1]} : vector<4x8x8xf32> to vector<1x8x8xf32>
    %161 = vector.shape_cast %160 : vector<1x8x8xf32> to vector<8x8xf32>
    %162 = tpu.concatenate %155, %157, %159, %161 in 1 : vector<8x8xf32>, vector<8x8xf32>, vector<8x8xf32>, vector<8x8xf32> -> vector<8x32xf32>
    %163 = vector.extract_strided_slice %125 {offsets = [0, 8, 0], sizes = [4, 8, 8], strides = [1, 1, 1]} : vector<4x16x8xf32> to vector<4x8x8xf32>
    %164 = vector.extract_strided_slice %130 {offsets = [0, 8, 0], sizes = [4, 8, 8], strides = [1, 1, 1]} : vector<4x16x8xf32> to vector<4x8x8xf32>
    %165 = vector.extract_strided_slice %135 {offsets = [0, 8, 0], sizes = [4, 8, 8], strides = [1, 1, 1]} : vector<4x16x8xf32> to vector<4x8x8xf32>
    "tpu.trace_start"() <{level = 10 : i32, message = "hqe,hke->hqk"}> : () -> ()
    %cst_157 = arith.constant dense<0.000000e+00> : vector<4x8x8xf32>
    %166 = tpu.matmul %163, %164, %cst_157 {dimension_numbers = #tpu.dot_dimension_numbers<[2], [2], [1], [1], [0, 0, 0, 1, 1, 1], [0], [0]>} : vector<4x8x8xf32>, vector<4x8x8xf32>, vector<4x8x8xf32> -> vector<4x8x8xf32>
    "tpu.trace_stop"() : () -> ()
    %cst_158 = arith.constant 0.353553385 : f32
    %167 = vector.broadcast %cst_158 : f32 to vector<4x8x8xf32>
    %168 = arith.mulf %166, %167 : vector<4x8x8xf32>
    %169 = arith.addf %168, %12 : vector<4x8x8xf32>
    %cst_159 = arith.constant dense<0xFF800000> : vector<4x8xf32>
    %170 = vector.multi_reduction <maximumf>, %169, %cst_159 [2] : vector<4x8x8xf32> to vector<4x8xf32>
    %171 = vector.shape_cast %170 : vector<4x8xf32> to vector<4x8x1xf32>
    %172 = vector.broadcast %171 : vector<4x8x1xf32> to vector<4x8x8xf32>
    %173 = arith.subf %169, %172 : vector<4x8x8xf32>
    %174 = math.exp %173 : vector<4x8x8xf32>
    %cst_160 = arith.constant dense<0.000000e+00> : vector<4x8xf32>
    %175 = vector.multi_reduction <add>, %174, %cst_160 [2] : vector<4x8x8xf32> to vector<4x8xf32>
    %176 = vector.shape_cast %175 : vector<4x8xf32> to vector<4x8x1xf32>
    %177 = tpu.reciprocal %176 {approx = true} : vector<4x8x1xf32> -> vector<4x8x1xf32>
    %178 = vector.broadcast %177 : vector<4x8x1xf32> to vector<4x8x8xf32>
    %179 = arith.mulf %174, %178 : vector<4x8x8xf32>
    "tpu.trace_start"() <{level = 10 : i32, message = "hqk,hke->hqe"}> : () -> ()
    %cst_161 = arith.constant dense<0.000000e+00> : vector<4x8x8xf32>
    %180 = tpu.matmul %179, %165, %cst_161 {dimension_numbers = #tpu.dot_dimension_numbers<[2], [1], [1], [2], [0, 0, 0, 1, 1, 2], [0], [0]>} : vector<4x8x8xf32>, vector<4x8x8xf32>, vector<4x8x8xf32> -> vector<4x8x8xf32>
    "tpu.trace_stop"() : () -> ()
    %181 = vector.extract_strided_slice %180 {offsets = [0, 0, 0], sizes = [1, 8, 8], strides = [1, 1, 1]} : vector<4x8x8xf32> to vector<1x8x8xf32>
    %182 = vector.shape_cast %181 : vector<1x8x8xf32> to vector<8x8xf32>
    %183 = vector.extract_strided_slice %180 {offsets = [1, 0, 0], sizes = [1, 8, 8], strides = [1, 1, 1]} : vector<4x8x8xf32> to vector<1x8x8xf32>
    %184 = vector.shape_cast %183 : vector<1x8x8xf32> to vector<8x8xf32>
    %185 = vector.extract_strided_slice %180 {offsets = [2, 0, 0], sizes = [1, 8, 8], strides = [1, 1, 1]} : vector<4x8x8xf32> to vector<1x8x8xf32>
    %186 = vector.shape_cast %185 : vector<1x8x8xf32> to vector<8x8xf32>
    %187 = vector.extract_strided_slice %180 {offsets = [3, 0, 0], sizes = [1, 8, 8], strides = [1, 1, 1]} : vector<4x8x8xf32> to vector<1x8x8xf32>
    %188 = vector.shape_cast %187 : vector<1x8x8xf32> to vector<8x8xf32>
    %189 = tpu.concatenate %182, %184, %186, %188 in 1 : vector<8x8xf32>, vector<8x8xf32>, vector<8x8xf32>, vector<8x8xf32> -> vector<8x32xf32>
    %190 = tpu.concatenate %162, %189 in 0 : vector<8x32xf32>, vector<8x32xf32> -> vector<16x32xf32>
    %c0_162 = arith.constant 0 : index
    %c0_163 = arith.constant 0 : index
    %c0_164 = arith.constant 0 : index
    %191 = vector.load %arg6[%c0_162, %c0_163, %c0_164] : memref<2x32x32xf32, #tpu.memory_space<vmem>>, vector<1x32x32xf32>
    %192 = vector.shape_cast %191 : vector<1x32x32xf32> to vector<32x32xf32>
    %cst_165 = arith.constant dense<0.000000e+00> : vector<16x32xf32>
    %193 = tpu.matmul %190, %192, %cst_165 {dimension_numbers = #tpu.dot_dimension_numbers<[1], [0], [0], [1], [0, 0, 1, 1], [], []>} : vector<16x32xf32>, vector<32x32xf32>, vector<16x32xf32> -> vector<16x32xf32>
    %194 = arith.addf %4, %193 : vector<16x32xf32>
    %c0_166 = arith.constant 0 : index
    %c0_167 = arith.constant 0 : index
    %c0_168 = arith.constant 0 : index
    %c0_169 = arith.constant 0 : index
    %195 = vector.load %arg7[%c0_166, %c0_167, %c0_168, %c0_169] : memref<2x2x1x32xf32, #tpu.memory_space<vmem>>, vector<1x1x1x32xf32>
    %196 = vector.shape_cast %195 : vector<1x1x1x32xf32> to vector<1x32xf32>
    %197 = vector.broadcast %196 : vector<1x32xf32> to vector<16x32xf32>
    %198 = arith.addf %194, %197 : vector<16x32xf32>
    %c0_170 = arith.constant 0 : index
    %c2_171 = arith.constant 2 : index
    %c0_172 = arith.constant 0 : index
    %c0_173 = arith.constant 0 : index
    %199 = vector.load %arg5[%c0_170, %c2_171, %c0_172, %c0_173] : memref<2x4x1x32xf32, #tpu.memory_space<vmem>>, vector<1x1x1x32xf32>
    %200 = vector.shape_cast %199 : vector<1x1x1x32xf32> to vector<1x32xf32>
    %c0_174 = arith.constant 0 : index
    %c3_175 = arith.constant 3 : index
    %c0_176 = arith.constant 0 : index
    %c0_177 = arith.constant 0 : index
    %201 = vector.load %arg5[%c0_174, %c3_175, %c0_176, %c0_177] : memref<2x4x1x32xf32, #tpu.memory_space<vmem>>, vector<1x1x1x32xf32>
    %202 = vector.shape_cast %201 : vector<1x1x1x32xf32> to vector<1x32xf32>
    %cst_178 = arith.constant dense<0.000000e+00> : vector<16xf32>
    %203 = vector.multi_reduction <add>, %198, %cst_178 [1] : vector<16x32xf32> to vector<16xf32>
    %204 = vector.shape_cast %203 : vector<16xf32> to vector<16x1xf32>
    %cst_179 = arith.constant 3.200000e+01 : f32
    %205 = vector.broadcast %cst_179 : f32 to vector<16x1xf32>
    %206 = arith.divf %204, %205 : vector<16x1xf32>
    %207 = vector.broadcast %206 : vector<16x1xf32> to vector<16x32xf32>
    %208 = arith.subf %198, %207 : vector<16x32xf32>
    %209 = arith.mulf %208, %208 : vector<16x32xf32>
    %cst_180 = arith.constant dense<0.000000e+00> : vector<16xf32>
    %210 = vector.multi_reduction <add>, %209, %cst_180 [1] : vector<16x32xf32> to vector<16xf32>
    %211 = vector.shape_cast %210 : vector<16xf32> to vector<16x1xf32>
    %cst_181 = arith.constant 0.0322580636 : f32
    %212 = vector.broadcast %cst_181 : f32 to vector<16x1xf32>
    %213 = arith.mulf %211, %212 : vector<16x1xf32>
    %214 = vector.broadcast %200 : vector<1x32xf32> to vector<16x32xf32>
    %215 = arith.mulf %214, %208 : vector<16x32xf32>
    %216 = math.sqrt %213 : vector<16x1xf32>
    %cst_182 = arith.constant 9.99999997E-7 : f32
    %217 = vector.broadcast %cst_182 : f32 to vector<16x1xf32>
    %218 = arith.addf %216, %217 : vector<16x1xf32>
    %219 = vector.broadcast %218 : vector<16x1xf32> to vector<16x32xf32>
    %220 = arith.divf %215, %219 : vector<16x32xf32>
    %221 = vector.broadcast %202 : vector<1x32xf32> to vector<16x32xf32>
    %222 = arith.addf %220, %221 : vector<16x32xf32>
    %c0_183 = arith.constant 0 : index
    %c0_184 = arith.constant 0 : index
    %c0_185 = arith.constant 0 : index
    %223 = vector.load %arg8[%c0_183, %c0_184, %c0_185] : memref<2x32x64xf32, #tpu.memory_space<vmem>>, vector<1x32x64xf32>
    %224 = vector.shape_cast %223 : vector<1x32x64xf32> to vector<32x64xf32>
    %cst_186 = arith.constant dense<0.000000e+00> : vector<16x64xf32>
    %225 = tpu.matmul %222, %224, %cst_186 {dimension_numbers = #tpu.dot_dimension_numbers<[1], [0], [0], [1], [0, 0, 1, 1], [], []>} : vector<16x32xf32>, vector<32x64xf32>, vector<16x64xf32> -> vector<16x64xf32>
    %c0_187 = arith.constant 0 : index
    %c0_188 = arith.constant 0 : index
    %c0_189 = arith.constant 0 : index
    %226 = vector.load %arg9[%c0_187, %c0_188, %c0_189] : memref<2x1x64xf32, #tpu.memory_space<vmem>>, vector<1x1x64xf32>
    %227 = vector.shape_cast %226 : vector<1x1x64xf32> to vector<1x64xf32>
    %228 = vector.broadcast %227 : vector<1x64xf32> to vector<16x64xf32>
    %229 = arith.addf %225, %228 : vector<16x64xf32>
    %cst_190 = arith.constant 0.000000e+00 : f32
    %230 = vector.broadcast %cst_190 : f32 to vector<16x64xf32>
    %231 = arith.maximumf %229, %230 : vector<16x64xf32>
    %c0_191 = arith.constant 0 : index
    %c0_192 = arith.constant 0 : index
    %c0_193 = arith.constant 0 : index
    %232 = vector.load %arg10[%c0_191, %c0_192, %c0_193] : memref<2x64x32xf32, #tpu.memory_space<vmem>>, vector<1x64x32xf32>
    %233 = vector.shape_cast %232 : vector<1x64x32xf32> to vector<64x32xf32>
    %cst_194 = arith.constant dense<0.000000e+00> : vector<16x32xf32>
    %234 = tpu.matmul %231, %233, %cst_194 {dimension_numbers = #tpu.dot_dimension_numbers<[1], [0], [0], [1], [0, 0, 1, 1], [], []>} : vector<16x64xf32>, vector<64x32xf32>, vector<16x32xf32> -> vector<16x32xf32>
    %235 = arith.addf %198, %234 : vector<16x32xf32>
    %c0_195 = arith.constant 0 : index
    %c1_196 = arith.constant 1 : index
    %c0_197 = arith.constant 0 : index
    %c0_198 = arith.constant 0 : index
    %236 = vector.load %arg7[%c0_195, %c1_196, %c0_197, %c0_198] : memref<2x2x1x32xf32, #tpu.memory_space<vmem>>, vector<1x1x1x32xf32>
    %237 = vector.shape_cast %236 : vector<1x1x1x32xf32> to vector<1x32xf32>
    %238 = vector.broadcast %237 : vector<1x32xf32> to vector<16x32xf32>
    %239 = arith.addf %235, %238 : vector<16x32xf32>
    %c1_199 = arith.constant 1 : index
    %c0_200 = arith.constant 0 : index
    %c0_201 = arith.constant 0 : index
    %c0_202 = arith.constant 0 : index
    %240 = vector.load %arg5[%c1_199, %c0_200, %c0_201, %c0_202] : memref<2x4x1x32xf32, #tpu.memory_space<vmem>>, vector<1x1x1x32xf32>
    %241 = vector.shape_cast %240 : vector<1x1x1x32xf32> to vector<1x32xf32>
    %c1_203 = arith.constant 1 : index
    %c1_204 = arith.constant 1 : index
    %c0_205 = arith.constant 0 : index
    %c0_206 = arith.constant 0 : index
    %242 = vector.load %arg5[%c1_203, %c1_204, %c0_205, %c0_206] : memref<2x4x1x32xf32, #tpu.memory_space<vmem>>, vector<1x1x1x32xf32>
    %243 = vector.shape_cast %242 : vector<1x1x1x32xf32> to vector<1x32xf32>
    %cst_207 = arith.constant dense<0.000000e+00> : vector<16xf32>
    %244 = vector.multi_reduction <add>, %239, %cst_207 [1] : vector<16x32xf32> to vector<16xf32>
    %245 = vector.shape_cast %244 : vector<16xf32> to vector<16x1xf32>
    %cst_208 = arith.constant 3.200000e+01 : f32
    %246 = vector.broadcast %cst_208 : f32 to vector<16x1xf32>
    %247 = arith.divf %245, %246 : vector<16x1xf32>
    %248 = vector.broadcast %247 : vector<16x1xf32> to vector<16x32xf32>
    %249 = arith.subf %239, %248 : vector<16x32xf32>
    %250 = arith.mulf %249, %249 : vector<16x32xf32>
    %cst_209 = arith.constant dense<0.000000e+00> : vector<16xf32>
    %251 = vector.multi_reduction <add>, %250, %cst_209 [1] : vector<16x32xf32> to vector<16xf32>
    %252 = vector.shape_cast %251 : vector<16xf32> to vector<16x1xf32>
    %cst_210 = arith.constant 0.0322580636 : f32
    %253 = vector.broadcast %cst_210 : f32 to vector<16x1xf32>
    %254 = arith.mulf %252, %253 : vector<16x1xf32>
    %255 = vector.broadcast %241 : vector<1x32xf32> to vector<16x32xf32>
    %256 = arith.mulf %255, %249 : vector<16x32xf32>
    %257 = math.sqrt %254 : vector<16x1xf32>
    %cst_211 = arith.constant 9.99999997E-7 : f32
    %258 = vector.broadcast %cst_211 : f32 to vector<16x1xf32>
    %259 = arith.addf %257, %258 : vector<16x1xf32>
    %260 = vector.broadcast %259 : vector<16x1xf32> to vector<16x32xf32>
    %261 = arith.divf %256, %260 : vector<16x32xf32>
    %262 = vector.broadcast %243 : vector<1x32xf32> to vector<16x32xf32>
    %263 = arith.addf %261, %262 : vector<16x32xf32>
    %c1_212 = arith.constant 1 : index
    %c0_213 = arith.constant 0 : index
    %c0_214 = arith.constant 0 : index
    %c0_215 = arith.constant 0 : index
    %c0_216 = arith.constant 0 : index
    %264 = vector.load %arg3[%c1_212, %c0_213, %c0_214, %c0_215, %c0_216] : memref<2x3x4x32x8xf32, #tpu.memory_space<vmem>>, vector<1x1x1x32x8xf32>
    %265 = vector.shape_cast %264 : vector<1x1x1x32x8xf32> to vector<32x8xf32>
    %cst_217 = arith.constant dense<0.000000e+00> : vector<16x8xf32>
    %266 = tpu.matmul %263, %265, %cst_217 {dimension_numbers = #tpu.dot_dimension_numbers<[1], [0], [0], [1], [0, 0, 1, 1], [], []>} : vector<16x32xf32>, vector<32x8xf32>, vector<16x8xf32> -> vector<16x8xf32>
    %c1_218 = arith.constant 1 : index
    %c0_219 = arith.constant 0 : index
    %c0_220 = arith.constant 0 : index
    %c0_221 = arith.constant 0 : index
    %c0_222 = arith.constant 0 : index
    %267 = vector.load %arg4[%c1_218, %c0_219, %c0_220, %c0_221, %c0_222] : memref<2x3x4x1x8xf32, #tpu.memory_space<vmem>>, vector<1x1x1x1x8xf32>
    %268 = vector.shape_cast %267 : vector<1x1x1x1x8xf32> to vector<1x8xf32>
    %269 = vector.broadcast %268 : vector<1x8xf32> to vector<16x8xf32>
    %270 = arith.addf %266, %269 : vector<16x8xf32>
    %c1_223 = arith.constant 1 : index
    %c1_224 = arith.constant 1 : index
    %c0_225 = arith.constant 0 : index
    %c0_226 = arith.constant 0 : index
    %c0_227 = arith.constant 0 : index
    %271 = vector.load %arg3[%c1_223, %c1_224, %c0_225, %c0_226, %c0_227] : memref<2x3x4x32x8xf32, #tpu.memory_space<vmem>>, vector<1x1x1x32x8xf32>
    %272 = vector.shape_cast %271 : vector<1x1x1x32x8xf32> to vector<32x8xf32>
    %cst_228 = arith.constant dense<0.000000e+00> : vector<16x8xf32>
    %273 = tpu.matmul %263, %272, %cst_228 {dimension_numbers = #tpu.dot_dimension_numbers<[1], [0], [0], [1], [0, 0, 1, 1], [], []>} : vector<16x32xf32>, vector<32x8xf32>, vector<16x8xf32> -> vector<16x8xf32>
    %c1_229 = arith.constant 1 : index
    %c1_230 = arith.constant 1 : index
    %c0_231 = arith.constant 0 : index
    %c0_232 = arith.constant 0 : index
    %c0_233 = arith.constant 0 : index
    %274 = vector.load %arg4[%c1_229, %c1_230, %c0_231, %c0_232, %c0_233] : memref<2x3x4x1x8xf32, #tpu.memory_space<vmem>>, vector<1x1x1x1x8xf32>
    %275 = vector.shape_cast %274 : vector<1x1x1x1x8xf32> to vector<1x8xf32>
    %276 = vector.broadcast %275 : vector<1x8xf32> to vector<16x8xf32>
    %277 = arith.addf %273, %276 : vector<16x8xf32>
    %c1_234 = arith.constant 1 : index
    %c2_235 = arith.constant 2 : index
    %c0_236 = arith.constant 0 : index
    %c0_237 = arith.constant 0 : index
    %c0_238 = arith.constant 0 : index
    %278 = vector.load %arg3[%c1_234, %c2_235, %c0_236, %c0_237, %c0_238] : memref<2x3x4x32x8xf32, #tpu.memory_space<vmem>>, vector<1x1x1x32x8xf32>
    %279 = vector.shape_cast %278 : vector<1x1x1x32x8xf32> to vector<32x8xf32>
    %cst_239 = arith.constant dense<0.000000e+00> : vector<16x8xf32>
    %280 = tpu.matmul %263, %279, %cst_239 {dimension_numbers = #tpu.dot_dimension_numbers<[1], [0], [0], [1], [0, 0, 1, 1], [], []>} : vector<16x32xf32>, vector<32x8xf32>, vector<16x8xf32> -> vector<16x8xf32>
    %c1_240 = arith.constant 1 : index
    %c2_241 = arith.constant 2 : index
    %c0_242 = arith.constant 0 : index
    %c0_243 = arith.constant 0 : index
    %c0_244 = arith.constant 0 : index
    %281 = vector.load %arg4[%c1_240, %c2_241, %c0_242, %c0_243, %c0_244] : memref<2x3x4x1x8xf32, #tpu.memory_space<vmem>>, vector<1x1x1x1x8xf32>
    %282 = vector.shape_cast %281 : vector<1x1x1x1x8xf32> to vector<1x8xf32>
    %283 = vector.broadcast %282 : vector<1x8xf32> to vector<16x8xf32>
    %284 = arith.addf %280, %283 : vector<16x8xf32>
    %c1_245 = arith.constant 1 : index
    %c0_246 = arith.constant 0 : index
    %c1_247 = arith.constant 1 : index
    %c0_248 = arith.constant 0 : index
    %c0_249 = arith.constant 0 : index
    %285 = vector.load %arg3[%c1_245, %c0_246, %c1_247, %c0_248, %c0_249] : memref<2x3x4x32x8xf32, #tpu.memory_space<vmem>>, vector<1x1x1x32x8xf32>
    %286 = vector.shape_cast %285 : vector<1x1x1x32x8xf32> to vector<32x8xf32>
    %cst_250 = arith.constant dense<0.000000e+00> : vector<16x8xf32>
    %287 = tpu.matmul %263, %286, %cst_250 {dimension_numbers = #tpu.dot_dimension_numbers<[1], [0], [0], [1], [0, 0, 1, 1], [], []>} : vector<16x32xf32>, vector<32x8xf32>, vector<16x8xf32> -> vector<16x8xf32>
    %c1_251 = arith.constant 1 : index
    %c0_252 = arith.constant 0 : index
    %c1_253 = arith.constant 1 : index
    %c0_254 = arith.constant 0 : index
    %c0_255 = arith.constant 0 : index
    %288 = vector.load %arg4[%c1_251, %c0_252, %c1_253, %c0_254, %c0_255] : memref<2x3x4x1x8xf32, #tpu.memory_space<vmem>>, vector<1x1x1x1x8xf32>
    %289 = vector.shape_cast %288 : vector<1x1x1x1x8xf32> to vector<1x8xf32>
    %290 = vector.broadcast %289 : vector<1x8xf32> to vector<16x8xf32>
    %291 = arith.addf %287, %290 : vector<16x8xf32>
    %c1_256 = arith.constant 1 : index
    %c1_257 = arith.constant 1 : index
    %c1_258 = arith.constant 1 : index
    %c0_259 = arith.constant 0 : index
    %c0_260 = arith.constant 0 : index
    %292 = vector.load %arg3[%c1_256, %c1_257, %c1_258, %c0_259, %c0_260] : memref<2x3x4x32x8xf32, #tpu.memory_space<vmem>>, vector<1x1x1x32x8xf32>
    %293 = vector.shape_cast %292 : vector<1x1x1x32x8xf32> to vector<32x8xf32>
    %cst_261 = arith.constant dense<0.000000e+00> : vector<16x8xf32>
    %294 = tpu.matmul %263, %293, %cst_261 {dimension_numbers = #tpu.dot_dimension_numbers<[1], [0], [0], [1], [0, 0, 1, 1], [], []>} : vector<16x32xf32>, vector<32x8xf32>, vector<16x8xf32> -> vector<16x8xf32>
    %c1_262 = arith.constant 1 : index
    %c1_263 = arith.constant 1 : index
    %c1_264 = arith.constant 1 : index
    %c0_265 = arith.constant 0 : index
    %c0_266 = arith.constant 0 : index
    %295 = vector.load %arg4[%c1_262, %c1_263, %c1_264, %c0_265, %c0_266] : memref<2x3x4x1x8xf32, #tpu.memory_space<vmem>>, vector<1x1x1x1x8xf32>
    %296 = vector.shape_cast %295 : vector<1x1x1x1x8xf32> to vector<1x8xf32>
    %297 = vector.broadcast %296 : vector<1x8xf32> to vector<16x8xf32>
    %298 = arith.addf %294, %297 : vector<16x8xf32>
    %c1_267 = arith.constant 1 : index
    %c2_268 = arith.constant 2 : index
    %c1_269 = arith.constant 1 : index
    %c0_270 = arith.constant 0 : index
    %c0_271 = arith.constant 0 : index
    %299 = vector.load %arg3[%c1_267, %c2_268, %c1_269, %c0_270, %c0_271] : memref<2x3x4x32x8xf32, #tpu.memory_space<vmem>>, vector<1x1x1x32x8xf32>
    %300 = vector.shape_cast %299 : vector<1x1x1x32x8xf32> to vector<32x8xf32>
    %cst_272 = arith.constant dense<0.000000e+00> : vector<16x8xf32>
    %301 = tpu.matmul %263, %300, %cst_272 {dimension_numbers = #tpu.dot_dimension_numbers<[1], [0], [0], [1], [0, 0, 1, 1], [], []>} : vector<16x32xf32>, vector<32x8xf32>, vector<16x8xf32> -> vector<16x8xf32>
    %c1_273 = arith.constant 1 : index
    %c2_274 = arith.constant 2 : index
    %c1_275 = arith.constant 1 : index
    %c0_276 = arith.constant 0 : index
    %c0_277 = arith.constant 0 : index
    %302 = vector.load %arg4[%c1_273, %c2_274, %c1_275, %c0_276, %c0_277] : memref<2x3x4x1x8xf32, #tpu.memory_space<vmem>>, vector<1x1x1x1x8xf32>
    %303 = vector.shape_cast %302 : vector<1x1x1x1x8xf32> to vector<1x8xf32>
    %304 = vector.broadcast %303 : vector<1x8xf32> to vector<16x8xf32>
    %305 = arith.addf %301, %304 : vector<16x8xf32>
    %c1_278 = arith.constant 1 : index
    %c0_279 = arith.constant 0 : index
    %c2_280 = arith.constant 2 : index
    %c0_281 = arith.constant 0 : index
    %c0_282 = arith.constant 0 : index
    %306 = vector.load %arg3[%c1_278, %c0_279, %c2_280, %c0_281, %c0_282] : memref<2x3x4x32x8xf32, #tpu.memory_space<vmem>>, vector<1x1x1x32x8xf32>
    %307 = vector.shape_cast %306 : vector<1x1x1x32x8xf32> to vector<32x8xf32>
    %cst_283 = arith.constant dense<0.000000e+00> : vector<16x8xf32>
    %308 = tpu.matmul %263, %307, %cst_283 {dimension_numbers = #tpu.dot_dimension_numbers<[1], [0], [0], [1], [0, 0, 1, 1], [], []>} : vector<16x32xf32>, vector<32x8xf32>, vector<16x8xf32> -> vector<16x8xf32>
    %c1_284 = arith.constant 1 : index
    %c0_285 = arith.constant 0 : index
    %c2_286 = arith.constant 2 : index
    %c0_287 = arith.constant 0 : index
    %c0_288 = arith.constant 0 : index
    %309 = vector.load %arg4[%c1_284, %c0_285, %c2_286, %c0_287, %c0_288] : memref<2x3x4x1x8xf32, #tpu.memory_space<vmem>>, vector<1x1x1x1x8xf32>
    %310 = vector.shape_cast %309 : vector<1x1x1x1x8xf32> to vector<1x8xf32>
    %311 = vector.broadcast %310 : vector<1x8xf32> to vector<16x8xf32>
    %312 = arith.addf %308, %311 : vector<16x8xf32>
    %c1_289 = arith.constant 1 : index
    %c1_290 = arith.constant 1 : index
    %c2_291 = arith.constant 2 : index
    %c0_292 = arith.constant 0 : index
    %c0_293 = arith.constant 0 : index
    %313 = vector.load %arg3[%c1_289, %c1_290, %c2_291, %c0_292, %c0_293] : memref<2x3x4x32x8xf32, #tpu.memory_space<vmem>>, vector<1x1x1x32x8xf32>
    %314 = vector.shape_cast %313 : vector<1x1x1x32x8xf32> to vector<32x8xf32>
    %cst_294 = arith.constant dense<0.000000e+00> : vector<16x8xf32>
    %315 = tpu.matmul %263, %314, %cst_294 {dimension_numbers = #tpu.dot_dimension_numbers<[1], [0], [0], [1], [0, 0, 1, 1], [], []>} : vector<16x32xf32>, vector<32x8xf32>, vector<16x8xf32> -> vector<16x8xf32>
    %c1_295 = arith.constant 1 : index
    %c1_296 = arith.constant 1 : index
    %c2_297 = arith.constant 2 : index
    %c0_298 = arith.constant 0 : index
    %c0_299 = arith.constant 0 : index
    %316 = vector.load %arg4[%c1_295, %c1_296, %c2_297, %c0_298, %c0_299] : memref<2x3x4x1x8xf32, #tpu.memory_space<vmem>>, vector<1x1x1x1x8xf32>
    %317 = vector.shape_cast %316 : vector<1x1x1x1x8xf32> to vector<1x8xf32>
    %318 = vector.broadcast %317 : vector<1x8xf32> to vector<16x8xf32>
    %319 = arith.addf %315, %318 : vector<16x8xf32>
    %c1_300 = arith.constant 1 : index
    %c2_301 = arith.constant 2 : index
    %c2_302 = arith.constant 2 : index
    %c0_303 = arith.constant 0 : index
    %c0_304 = arith.constant 0 : index
    %320 = vector.load %arg3[%c1_300, %c2_301, %c2_302, %c0_303, %c0_304] : memref<2x3x4x32x8xf32, #tpu.memory_space<vmem>>, vector<1x1x1x32x8xf32>
    %321 = vector.shape_cast %320 : vector<1x1x1x32x8xf32> to vector<32x8xf32>
    %cst_305 = arith.constant dense<0.000000e+00> : vector<16x8xf32>
    %322 = tpu.matmul %263, %321, %cst_305 {dimension_numbers = #tpu.dot_dimension_numbers<[1], [0], [0], [1], [0, 0, 1, 1], [], []>} : vector<16x32xf32>, vector<32x8xf32>, vector<16x8xf32> -> vector<16x8xf32>
    %c1_306 = arith.constant 1 : index
    %c2_307 = arith.constant 2 : index
    %c2_308 = arith.constant 2 : index
    %c0_309 = arith.constant 0 : index
    %c0_310 = arith.constant 0 : index
    %323 = vector.load %arg4[%c1_306, %c2_307, %c2_308, %c0_309, %c0_310] : memref<2x3x4x1x8xf32, #tpu.memory_space<vmem>>, vector<1x1x1x1x8xf32>
    %324 = vector.shape_cast %323 : vector<1x1x1x1x8xf32> to vector<1x8xf32>
    %325 = vector.broadcast %324 : vector<1x8xf32> to vector<16x8xf32>
    %326 = arith.addf %322, %325 : vector<16x8xf32>
    %c1_311 = arith.constant 1 : index
    %c0_312 = arith.constant 0 : index
    %c3_313 = arith.constant 3 : index
    %c0_314 = arith.constant 0 : index
    %c0_315 = arith.constant 0 : index
    %327 = vector.load %arg3[%c1_311, %c0_312, %c3_313, %c0_314, %c0_315] : memref<2x3x4x32x8xf32, #tpu.memory_space<vmem>>, vector<1x1x1x32x8xf32>
    %328 = vector.shape_cast %327 : vector<1x1x1x32x8xf32> to vector<32x8xf32>
    %cst_316 = arith.constant dense<0.000000e+00> : vector<16x8xf32>
    %329 = tpu.matmul %263, %328, %cst_316 {dimension_numbers = #tpu.dot_dimension_numbers<[1], [0], [0], [1], [0, 0, 1, 1], [], []>} : vector<16x32xf32>, vector<32x8xf32>, vector<16x8xf32> -> vector<16x8xf32>
    %c1_317 = arith.constant 1 : index
    %c0_318 = arith.constant 0 : index
    %c3_319 = arith.constant 3 : index
    %c0_320 = arith.constant 0 : index
    %c0_321 = arith.constant 0 : index
    %330 = vector.load %arg4[%c1_317, %c0_318, %c3_319, %c0_320, %c0_321] : memref<2x3x4x1x8xf32, #tpu.memory_space<vmem>>, vector<1x1x1x1x8xf32>
    %331 = vector.shape_cast %330 : vector<1x1x1x1x8xf32> to vector<1x8xf32>
    %332 = vector.broadcast %331 : vector<1x8xf32> to vector<16x8xf32>
    %333 = arith.addf %329, %332 : vector<16x8xf32>
    %c1_322 = arith.constant 1 : index
    %c1_323 = arith.constant 1 : index
    %c3_324 = arith.constant 3 : index
    %c0_325 = arith.constant 0 : index
    %c0_326 = arith.constant 0 : index
    %334 = vector.load %arg3[%c1_322, %c1_323, %c3_324, %c0_325, %c0_326] : memref<2x3x4x32x8xf32, #tpu.memory_space<vmem>>, vector<1x1x1x32x8xf32>
    %335 = vector.shape_cast %334 : vector<1x1x1x32x8xf32> to vector<32x8xf32>
    %cst_327 = arith.constant dense<0.000000e+00> : vector<16x8xf32>
    %336 = tpu.matmul %263, %335, %cst_327 {dimension_numbers = #tpu.dot_dimension_numbers<[1], [0], [0], [1], [0, 0, 1, 1], [], []>} : vector<16x32xf32>, vector<32x8xf32>, vector<16x8xf32> -> vector<16x8xf32>
    %c1_328 = arith.constant 1 : index
    %c1_329 = arith.constant 1 : index
    %c3_330 = arith.constant 3 : index
    %c0_331 = arith.constant 0 : index
    %c0_332 = arith.constant 0 : index
    %337 = vector.load %arg4[%c1_328, %c1_329, %c3_330, %c0_331, %c0_332] : memref<2x3x4x1x8xf32, #tpu.memory_space<vmem>>, vector<1x1x1x1x8xf32>
    %338 = vector.shape_cast %337 : vector<1x1x1x1x8xf32> to vector<1x8xf32>
    %339 = vector.broadcast %338 : vector<1x8xf32> to vector<16x8xf32>
    %340 = arith.addf %336, %339 : vector<16x8xf32>
    %c1_333 = arith.constant 1 : index
    %c2_334 = arith.constant 2 : index
    %c3_335 = arith.constant 3 : index
    %c0_336 = arith.constant 0 : index
    %c0_337 = arith.constant 0 : index
    %341 = vector.load %arg3[%c1_333, %c2_334, %c3_335, %c0_336, %c0_337] : memref<2x3x4x32x8xf32, #tpu.memory_space<vmem>>, vector<1x1x1x32x8xf32>
    %342 = vector.shape_cast %341 : vector<1x1x1x32x8xf32> to vector<32x8xf32>
    %cst_338 = arith.constant dense<0.000000e+00> : vector<16x8xf32>
    %343 = tpu.matmul %263, %342, %cst_338 {dimension_numbers = #tpu.dot_dimension_numbers<[1], [0], [0], [1], [0, 0, 1, 1], [], []>} : vector<16x32xf32>, vector<32x8xf32>, vector<16x8xf32> -> vector<16x8xf32>
    %c1_339 = arith.constant 1 : index
    %c2_340 = arith.constant 2 : index
    %c3_341 = arith.constant 3 : index
    %c0_342 = arith.constant 0 : index
    %c0_343 = arith.constant 0 : index
    %344 = vector.load %arg4[%c1_339, %c2_340, %c3_341, %c0_342, %c0_343] : memref<2x3x4x1x8xf32, #tpu.memory_space<vmem>>, vector<1x1x1x1x8xf32>
    %345 = vector.shape_cast %344 : vector<1x1x1x1x8xf32> to vector<1x8xf32>
    %346 = vector.broadcast %345 : vector<1x8xf32> to vector<16x8xf32>
    %347 = arith.addf %343, %346 : vector<16x8xf32>
    %348 = vector.shape_cast %270 : vector<16x8xf32> to vector<1x16x8xf32>
    %349 = vector.shape_cast %291 : vector<16x8xf32> to vector<1x16x8xf32>
    %350 = vector.shape_cast %312 : vector<16x8xf32> to vector<1x16x8xf32>
    %351 = vector.shape_cast %333 : vector<16x8xf32> to vector<1x16x8xf32>
    %352 = tpu.concatenate %348, %349, %350, %351 in 0 : vector<1x16x8xf32>, vector<1x16x8xf32>, vector<1x16x8xf32>, vector<1x16x8xf32> -> vector<4x16x8xf32>
    %353 = vector.shape_cast %277 : vector<16x8xf32> to vector<1x16x8xf32>
    %354 = vector.shape_cast %298 : vector<16x8xf32> to vector<1x16x8xf32>
    %355 = vector.shape_cast %319 : vector<16x8xf32> to vector<1x16x8xf32>
    %356 = vector.shape_cast %340 : vector<16x8xf32> to vector<1x16x8xf32>
    %357 = tpu.concatenate %353, %354, %355, %356 in 0 : vector<1x16x8xf32>, vector<1x16x8xf32>, vector<1x16x8xf32>, vector<1x16x8xf32> -> vector<4x16x8xf32>
    %358 = vector.shape_cast %284 : vector<16x8xf32> to vector<1x16x8xf32>
    %359 = vector.shape_cast %305 : vector<16x8xf32> to vector<1x16x8xf32>
    %360 = vector.shape_cast %326 : vector<16x8xf32> to vector<1x16x8xf32>
    %361 = vector.shape_cast %347 : vector<16x8xf32> to vector<1x16x8xf32>
    %362 = tpu.concatenate %358, %359, %360, %361 in 0 : vector<1x16x8xf32>, vector<1x16x8xf32>, vector<1x16x8xf32>, vector<1x16x8xf32> -> vector<4x16x8xf32>
    %363 = vector.extract_strided_slice %352 {offsets = [0, 0, 0], sizes = [4, 8, 8], strides = [1, 1, 1]} : vector<4x16x8xf32> to vector<4x8x8xf32>
    %364 = vector.extract_strided_slice %357 {offsets = [0, 0, 0], sizes = [4, 8, 8], strides = [1, 1, 1]} : vector<4x16x8xf32> to vector<4x8x8xf32>
    %365 = vector.extract_strided_slice %362 {offsets = [0, 0, 0], sizes = [4, 8, 8], strides = [1, 1, 1]} : vector<4x16x8xf32> to vector<4x8x8xf32>
    "tpu.trace_start"() <{level = 10 : i32, message = "hqe,hke->hqk"}> : () -> ()
    %cst_344 = arith.constant dense<0.000000e+00> : vector<4x8x8xf32>
    %366 = tpu.matmul %363, %364, %cst_344 {dimension_numbers = #tpu.dot_dimension_numbers<[2], [2], [1], [1], [0, 0, 0, 1, 1, 1], [0], [0]>} : vector<4x8x8xf32>, vector<4x8x8xf32>, vector<4x8x8xf32> -> vector<4x8x8xf32>
    "tpu.trace_stop"() : () -> ()
    %cst_345 = arith.constant 0.353553385 : f32
    %367 = vector.broadcast %cst_345 : f32 to vector<4x8x8xf32>
    %368 = arith.mulf %366, %367 : vector<4x8x8xf32>
    %369 = arith.addf %368, %8 : vector<4x8x8xf32>
    %cst_346 = arith.constant dense<0xFF800000> : vector<4x8xf32>
    %370 = vector.multi_reduction <maximumf>, %369, %cst_346 [2] : vector<4x8x8xf32> to vector<4x8xf32>
    %371 = vector.shape_cast %370 : vector<4x8xf32> to vector<4x8x1xf32>
    %372 = vector.broadcast %371 : vector<4x8x1xf32> to vector<4x8x8xf32>
    %373 = arith.subf %369, %372 : vector<4x8x8xf32>
    %374 = math.exp %373 : vector<4x8x8xf32>
    %cst_347 = arith.constant dense<0.000000e+00> : vector<4x8xf32>
    %375 = vector.multi_reduction <add>, %374, %cst_347 [2] : vector<4x8x8xf32> to vector<4x8xf32>
    %376 = vector.shape_cast %375 : vector<4x8xf32> to vector<4x8x1xf32>
    %377 = tpu.reciprocal %376 {approx = true} : vector<4x8x1xf32> -> vector<4x8x1xf32>
    %378 = vector.broadcast %377 : vector<4x8x1xf32> to vector<4x8x8xf32>
    %379 = arith.mulf %374, %378 : vector<4x8x8xf32>
    "tpu.trace_start"() <{level = 10 : i32, message = "hqk,hke->hqe"}> : () -> ()
    %cst_348 = arith.constant dense<0.000000e+00> : vector<4x8x8xf32>
    %380 = tpu.matmul %379, %365, %cst_348 {dimension_numbers = #tpu.dot_dimension_numbers<[2], [1], [1], [2], [0, 0, 0, 1, 1, 2], [0], [0]>} : vector<4x8x8xf32>, vector<4x8x8xf32>, vector<4x8x8xf32> -> vector<4x8x8xf32>
    "tpu.trace_stop"() : () -> ()
    %381 = vector.extract_strided_slice %380 {offsets = [0, 0, 0], sizes = [1, 8, 8], strides = [1, 1, 1]} : vector<4x8x8xf32> to vector<1x8x8xf32>
    %382 = vector.shape_cast %381 : vector<1x8x8xf32> to vector<8x8xf32>
    %383 = vector.extract_strided_slice %380 {offsets = [1, 0, 0], sizes = [1, 8, 8], strides = [1, 1, 1]} : vector<4x8x8xf32> to vector<1x8x8xf32>
    %384 = vector.shape_cast %383 : vector<1x8x8xf32> to vector<8x8xf32>
    %385 = vector.extract_strided_slice %380 {offsets = [2, 0, 0], sizes = [1, 8, 8], strides = [1, 1, 1]} : vector<4x8x8xf32> to vector<1x8x8xf32>
    %386 = vector.shape_cast %385 : vector<1x8x8xf32> to vector<8x8xf32>
    %387 = vector.extract_strided_slice %380 {offsets = [3, 0, 0], sizes = [1, 8, 8], strides = [1, 1, 1]} : vector<4x8x8xf32> to vector<1x8x8xf32>
    %388 = vector.shape_cast %387 : vector<1x8x8xf32> to vector<8x8xf32>
    %389 = tpu.concatenate %382, %384, %386, %388 in 1 : vector<8x8xf32>, vector<8x8xf32>, vector<8x8xf32>, vector<8x8xf32> -> vector<8x32xf32>
    %390 = vector.extract_strided_slice %352 {offsets = [0, 8, 0], sizes = [4, 8, 8], strides = [1, 1, 1]} : vector<4x16x8xf32> to vector<4x8x8xf32>
    %391 = vector.extract_strided_slice %357 {offsets = [0, 8, 0], sizes = [4, 8, 8], strides = [1, 1, 1]} : vector<4x16x8xf32> to vector<4x8x8xf32>
    %392 = vector.extract_strided_slice %362 {offsets = [0, 8, 0], sizes = [4, 8, 8], strides = [1, 1, 1]} : vector<4x16x8xf32> to vector<4x8x8xf32>
    "tpu.trace_start"() <{level = 10 : i32, message = "hqe,hke->hqk"}> : () -> ()
    %cst_349 = arith.constant dense<0.000000e+00> : vector<4x8x8xf32>
    %393 = tpu.matmul %390, %391, %cst_349 {dimension_numbers = #tpu.dot_dimension_numbers<[2], [2], [1], [1], [0, 0, 0, 1, 1, 1], [0], [0]>} : vector<4x8x8xf32>, vector<4x8x8xf32>, vector<4x8x8xf32> -> vector<4x8x8xf32>
    "tpu.trace_stop"() : () -> ()
    %cst_350 = arith.constant 0.353553385 : f32
    %394 = vector.broadcast %cst_350 : f32 to vector<4x8x8xf32>
    %395 = arith.mulf %393, %394 : vector<4x8x8xf32>
    %396 = arith.addf %395, %12 : vector<4x8x8xf32>
    %cst_351 = arith.constant dense<0xFF800000> : vector<4x8xf32>
    %397 = vector.multi_reduction <maximumf>, %396, %cst_351 [2] : vector<4x8x8xf32> to vector<4x8xf32>
    %398 = vector.shape_cast %397 : vector<4x8xf32> to vector<4x8x1xf32>
    %399 = vector.broadcast %398 : vector<4x8x1xf32> to vector<4x8x8xf32>
    %400 = arith.subf %396, %399 : vector<4x8x8xf32>
    %401 = math.exp %400 : vector<4x8x8xf32>
    %cst_352 = arith.constant dense<0.000000e+00> : vector<4x8xf32>
    %402 = vector.multi_reduction <add>, %401, %cst_352 [2] : vector<4x8x8xf32> to vector<4x8xf32>
    %403 = vector.shape_cast %402 : vector<4x8xf32> to vector<4x8x1xf32>
    %404 = tpu.reciprocal %403 {approx = true} : vector<4x8x1xf32> -> vector<4x8x1xf32>
    %405 = vector.broadcast %404 : vector<4x8x1xf32> to vector<4x8x8xf32>
    %406 = arith.mulf %401, %405 : vector<4x8x8xf32>
    "tpu.trace_start"() <{level = 10 : i32, message = "hqk,hke->hqe"}> : () -> ()
    %cst_353 = arith.constant dense<0.000000e+00> : vector<4x8x8xf32>
    %407 = tpu.matmul %406, %392, %cst_353 {dimension_numbers = #tpu.dot_dimension_numbers<[2], [1], [1], [2], [0, 0, 0, 1, 1, 2], [0], [0]>} : vector<4x8x8xf32>, vector<4x8x8xf32>, vector<4x8x8xf32> -> vector<4x8x8xf32>
    "tpu.trace_stop"() : () -> ()
    %408 = vector.extract_strided_slice %407 {offsets = [0, 0, 0], sizes = [1, 8, 8], strides = [1, 1, 1]} : vector<4x8x8xf32> to vector<1x8x8xf32>
    %409 = vector.shape_cast %408 : vector<1x8x8xf32> to vector<8x8xf32>
    %410 = vector.extract_strided_slice %407 {offsets = [1, 0, 0], sizes = [1, 8, 8], strides = [1, 1, 1]} : vector<4x8x8xf32> to vector<1x8x8xf32>
    %411 = vector.shape_cast %410 : vector<1x8x8xf32> to vector<8x8xf32>
    %412 = vector.extract_strided_slice %407 {offsets = [2, 0, 0], sizes = [1, 8, 8], strides = [1, 1, 1]} : vector<4x8x8xf32> to vector<1x8x8xf32>
    %413 = vector.shape_cast %412 : vector<1x8x8xf32> to vector<8x8xf32>
    %414 = vector.extract_strided_slice %407 {offsets = [3, 0, 0], sizes = [1, 8, 8], strides = [1, 1, 1]} : vector<4x8x8xf32> to vector<1x8x8xf32>
    %415 = vector.shape_cast %414 : vector<1x8x8xf32> to vector<8x8xf32>
    %416 = tpu.concatenate %409, %411, %413, %415 in 1 : vector<8x8xf32>, vector<8x8xf32>, vector<8x8xf32>, vector<8x8xf32> -> vector<8x32xf32>
    %417 = tpu.concatenate %389, %416 in 0 : vector<8x32xf32>, vector<8x32xf32> -> vector<16x32xf32>
    %c1_354 = arith.constant 1 : index
    %c0_355 = arith.constant 0 : index
    %c0_356 = arith.constant 0 : index
    %418 = vector.load %arg6[%c1_354, %c0_355, %c0_356] : memref<2x32x32xf32, #tpu.memory_space<vmem>>, vector<1x32x32xf32>
    %419 = vector.shape_cast %418 : vector<1x32x32xf32> to vector<32x32xf32>
    %cst_357 = arith.constant dense<0.000000e+00> : vector<16x32xf32>
    %420 = tpu.matmul %417, %419, %cst_357 {dimension_numbers = #tpu.dot_dimension_numbers<[1], [0], [0], [1], [0, 0, 1, 1], [], []>} : vector<16x32xf32>, vector<32x32xf32>, vector<16x32xf32> -> vector<16x32xf32>
    %421 = arith.addf %239, %420 : vector<16x32xf32>
    %c1_358 = arith.constant 1 : index
    %c0_359 = arith.constant 0 : index
    %c0_360 = arith.constant 0 : index
    %c0_361 = arith.constant 0 : index
    %422 = vector.load %arg7[%c1_358, %c0_359, %c0_360, %c0_361] : memref<2x2x1x32xf32, #tpu.memory_space<vmem>>, vector<1x1x1x32xf32>
    %423 = vector.shape_cast %422 : vector<1x1x1x32xf32> to vector<1x32xf32>
    %424 = vector.broadcast %423 : vector<1x32xf32> to vector<16x32xf32>
    %425 = arith.addf %421, %424 : vector<16x32xf32>
    %c1_362 = arith.constant 1 : index
    %c2_363 = arith.constant 2 : index
    %c0_364 = arith.constant 0 : index
    %c0_365 = arith.constant 0 : index
    %426 = vector.load %arg5[%c1_362, %c2_363, %c0_364, %c0_365] : memref<2x4x1x32xf32, #tpu.memory_space<vmem>>, vector<1x1x1x32xf32>
    %427 = vector.shape_cast %426 : vector<1x1x1x32xf32> to vector<1x32xf32>
    %c1_366 = arith.constant 1 : index
    %c3_367 = arith.constant 3 : index
    %c0_368 = arith.constant 0 : index
    %c0_369 = arith.constant 0 : index
    %428 = vector.load %arg5[%c1_366, %c3_367, %c0_368, %c0_369] : memref<2x4x1x32xf32, #tpu.memory_space<vmem>>, vector<1x1x1x32xf32>
    %429 = vector.shape_cast %428 : vector<1x1x1x32xf32> to vector<1x32xf32>
    %cst_370 = arith.constant dense<0.000000e+00> : vector<16xf32>
    %430 = vector.multi_reduction <add>, %425, %cst_370 [1] : vector<16x32xf32> to vector<16xf32>
    %431 = vector.shape_cast %430 : vector<16xf32> to vector<16x1xf32>
    %cst_371 = arith.constant 3.200000e+01 : f32
    %432 = vector.broadcast %cst_371 : f32 to vector<16x1xf32>
    %433 = arith.divf %431, %432 : vector<16x1xf32>
    %434 = vector.broadcast %433 : vector<16x1xf32> to vector<16x32xf32>
    %435 = arith.subf %425, %434 : vector<16x32xf32>
    %436 = arith.mulf %435, %435 : vector<16x32xf32>
    %cst_372 = arith.constant dense<0.000000e+00> : vector<16xf32>
    %437 = vector.multi_reduction <add>, %436, %cst_372 [1] : vector<16x32xf32> to vector<16xf32>
    %438 = vector.shape_cast %437 : vector<16xf32> to vector<16x1xf32>
    %cst_373 = arith.constant 0.0322580636 : f32
    %439 = vector.broadcast %cst_373 : f32 to vector<16x1xf32>
    %440 = arith.mulf %438, %439 : vector<16x1xf32>
    %441 = vector.broadcast %427 : vector<1x32xf32> to vector<16x32xf32>
    %442 = arith.mulf %441, %435 : vector<16x32xf32>
    %443 = math.sqrt %440 : vector<16x1xf32>
    %cst_374 = arith.constant 9.99999997E-7 : f32
    %444 = vector.broadcast %cst_374 : f32 to vector<16x1xf32>
    %445 = arith.addf %443, %444 : vector<16x1xf32>
    %446 = vector.broadcast %445 : vector<16x1xf32> to vector<16x32xf32>
    %447 = arith.divf %442, %446 : vector<16x32xf32>
    %448 = vector.broadcast %429 : vector<1x32xf32> to vector<16x32xf32>
    %449 = arith.addf %447, %448 : vector<16x32xf32>
    %c1_375 = arith.constant 1 : index
    %c0_376 = arith.constant 0 : index
    %c0_377 = arith.constant 0 : index
    %450 = vector.load %arg8[%c1_375, %c0_376, %c0_377] : memref<2x32x64xf32, #tpu.memory_space<vmem>>, vector<1x32x64xf32>
    %451 = vector.shape_cast %450 : vector<1x32x64xf32> to vector<32x64xf32>
    %cst_378 = arith.constant dense<0.000000e+00> : vector<16x64xf32>
    %452 = tpu.matmul %449, %451, %cst_378 {dimension_numbers = #tpu.dot_dimension_numbers<[1], [0], [0], [1], [0, 0, 1, 1], [], []>} : vector<16x32xf32>, vector<32x64xf32>, vector<16x64xf32> -> vector<16x64xf32>
    %c1_379 = arith.constant 1 : index
    %c0_380 = arith.constant 0 : index
    %c0_381 = arith.constant 0 : index
    %453 = vector.load %arg9[%c1_379, %c0_380, %c0_381] : memref<2x1x64xf32, #tpu.memory_space<vmem>>, vector<1x1x64xf32>
    %454 = vector.shape_cast %453 : vector<1x1x64xf32> to vector<1x64xf32>
    %455 = vector.broadcast %454 : vector<1x64xf32> to vector<16x64xf32>
    %456 = arith.addf %452, %455 : vector<16x64xf32>
    %cst_382 = arith.constant 0.000000e+00 : f32
    %457 = vector.broadcast %cst_382 : f32 to vector<16x64xf32>
    %458 = arith.maximumf %456, %457 : vector<16x64xf32>
    %c1_383 = arith.constant 1 : index
    %c0_384 = arith.constant 0 : index
    %c0_385 = arith.constant 0 : index
    %459 = vector.load %arg10[%c1_383, %c0_384, %c0_385] : memref<2x64x32xf32, #tpu.memory_space<vmem>>, vector<1x64x32xf32>
    %460 = vector.shape_cast %459 : vector<1x64x32xf32> to vector<64x32xf32>
    %cst_386 = arith.constant dense<0.000000e+00> : vector<16x32xf32>
    %461 = tpu.matmul %458, %460, %cst_386 {dimension_numbers = #tpu.dot_dimension_numbers<[1], [0], [0], [1], [0, 0, 1, 1], [], []>} : vector<16x64xf32>, vector<64x32xf32>, vector<16x32xf32> -> vector<16x32xf32>
    %462 = arith.addf %425, %461 : vector<16x32xf32>
    %c1_387 = arith.constant 1 : index
    %c1_388 = arith.constant 1 : index
    %c0_389 = arith.constant 0 : index
    %c0_390 = arith.constant 0 : index
    %463 = vector.load %arg7[%c1_387, %c1_388, %c0_389, %c0_390] : memref<2x2x1x32xf32, #tpu.memory_space<vmem>>, vector<1x1x1x32xf32>
    %464 = vector.shape_cast %463 : vector<1x1x1x32xf32> to vector<1x32xf32>
    %465 = vector.broadcast %464 : vector<1x32xf32> to vector<16x32xf32>
    %466 = arith.addf %462, %465 : vector<16x32xf32>
    %c0_391 = arith.constant 0 : index
    %c0_392 = arith.constant 0 : index
    %c0_393 = arith.constant 0 : index
    %467 = vector.load %arg11[%c0_391, %c0_392, %c0_393] : memref<2x1x32xf32, #tpu.memory_space<vmem>>, vector<1x1x32xf32>
    %468 = vector.shape_cast %467 : vector<1x1x32xf32> to vector<1x32xf32>
    %c1_394 = arith.constant 1 : index
    %c0_395 = arith.constant 0 : index
    %c0_396 = arith.constant 0 : index
    %469 = vector.load %arg11[%c1_394, %c0_395, %c0_396] : memref<2x1x32xf32, #tpu.memory_space<vmem>>, vector<1x1x32xf32>
    %470 = vector.shape_cast %469 : vector<1x1x32xf32> to vector<1x32xf32>
    %cst_397 = arith.constant dense<0.000000e+00> : vector<16xf32>
    %471 = vector.multi_reduction <add>, %466, %cst_397 [1] : vector<16x32xf32> to vector<16xf32>
    %472 = vector.shape_cast %471 : vector<16xf32> to vector<16x1xf32>
    %cst_398 = arith.constant 3.200000e+01 : f32
    %473 = vector.broadcast %cst_398 : f32 to vector<16x1xf32>
    %474 = arith.divf %472, %473 : vector<16x1xf32>
    %475 = vector.broadcast %474 : vector<16x1xf32> to vector<16x32xf32>
    %476 = arith.subf %466, %475 : vector<16x32xf32>
    %477 = arith.mulf %476, %476 : vector<16x32xf32>
    %cst_399 = arith.constant dense<0.000000e+00> : vector<16xf32>
    %478 = vector.multi_reduction <add>, %477, %cst_399 [1] : vector<16x32xf32> to vector<16xf32>
    %479 = vector.shape_cast %478 : vector<16xf32> to vector<16x1xf32>
    %cst_400 = arith.constant 0.0322580636 : f32
    %480 = vector.broadcast %cst_400 : f32 to vector<16x1xf32>
    %481 = arith.mulf %479, %480 : vector<16x1xf32>
    %482 = vector.broadcast %468 : vector<1x32xf32> to vector<16x32xf32>
    %483 = arith.mulf %482, %476 : vector<16x32xf32>
    %484 = math.sqrt %481 : vector<16x1xf32>
    %cst_401 = arith.constant 9.99999997E-7 : f32
    %485 = vector.broadcast %cst_401 : f32 to vector<16x1xf32>
    %486 = arith.addf %484, %485 : vector<16x1xf32>
    %487 = vector.broadcast %486 : vector<16x1xf32> to vector<16x32xf32>
    %488 = arith.divf %483, %487 : vector<16x32xf32>
    %489 = vector.broadcast %470 : vector<1x32xf32> to vector<16x32xf32>
    %490 = arith.addf %488, %489 : vector<16x32xf32>
    %491 = vector.extract_strided_slice %490 {offsets = [0, 0], sizes = [8, 32], strides = [1, 1]} : vector<16x32xf32> to vector<8x32xf32>
    %c0_402 = arith.constant 0 : index
    %c0_403 = arith.constant 0 : index
    %c0_404 = arith.constant 0 : index
    %492 = vector.load %arg12[%c0_402, %c0_403, %c0_404] : memref<2x8x32xf32, #tpu.memory_space<vmem>>, vector<1x8x32xf32>
    %493 = vector.shape_cast %492 : vector<1x8x32xf32> to vector<8x32xf32>
    %494 = vector.shape_cast %491 : vector<8x32xf32> to vector<1x8x32xf32>
    tpu.vector_store %arg12[%c0_402, %c0_403, %c0_404], %494 {strides = array<i32>} : memref<2x8x32xf32, #tpu.memory_space<vmem>>, vector<1x8x32xf32>,
    %495 = vector.extract_strided_slice %490 {offsets = [8, 0], sizes = [8, 32], strides = [1, 1]} : vector<16x32xf32> to vector<8x32xf32>
    %c1_405 = arith.constant 1 : index
    %c0_406 = arith.constant 0 : index
    %c0_407 = arith.constant 0 : index
    %496 = vector.load %arg12[%c1_405, %c0_406, %c0_407] : memref<2x8x32xf32, #tpu.memory_space<vmem>>, vector<1x8x32xf32>
    %497 = vector.shape_cast %496 : vector<1x8x32xf32> to vector<8x32xf32>
    %498 = vector.shape_cast %495 : vector<8x32xf32> to vector<1x8x32xf32>
    tpu.vector_store %arg12[%c1_405, %c0_406, %c0_407], %498 {strides = array<i32>} : memref<2x8x32xf32, #tpu.memory_space<vmem>>, vector<1x8x32xf32>,
    return
  }
  func.func @transform_0(%arg0: i32) -> (i32, i32, i32) {
    %c0_i32 = arith.constant 0 : i32
    %c0_i32_0 = arith.constant 0 : i32
    %c0_i32_1 = arith.constant 0 : i32
    %c0_i32_2 = arith.constant 0 : i32
    return %c0_i32, %c0_i32_0, %c0_i32_1 : i32, i32, i32
  }
  func.func @transform_1(%arg0: i32) -> (i32, i32, i32) {
    %c0_i32 = arith.constant 0 : i32
    %c0_i32_0 = arith.constant 0 : i32
    %c0_i32_1 = arith.constant 0 : i32
    %c0_i32_2 = arith.constant 0 : i32
    return %c0_i32, %c0_i32_0, %c0_i32_1 : i32, i32, i32
  }
  func.func @transform_2(%arg0: i32) -> (i32, i32, i32, i32, i32) {
    %c0_i32 = arith.constant 0 : i32
    %c0_i32_0 = arith.constant 0 : i32
    %c0_i32_1 = arith.constant 0 : i32
    %c0_i32_2 = arith.constant 0 : i32
    %c0_i32_3 = arith.constant 0 : i32
    %c0_i32_4 = arith.constant 0 : i32
    return %c0_i32, %c0_i32_0, %c0_i32_1, %c0_i32_2, %c0_i32_3 : i32, i32, i32, i32, i32
  }
  func.func @transform_3(%arg0: i32) -> (i32, i32, i32, i32, i32) {
    %c0_i32 = arith.constant 0 : i32
    %c0_i32_0 = arith.constant 0 : i32
    %c0_i32_1 = arith.constant 0 : i32
    %c0_i32_2 = arith.constant 0 : i32
    %c0_i32_3 = arith.constant 0 : i32
    %c0_i32_4 = arith.constant 0 : i32
    return %c0_i32, %c0_i32_0, %c0_i32_1, %c0_i32_2, %c0_i32_3 : i32, i32, i32, i32, i32
  }
  func.func @transform_4(%arg0: i32) -> (i32, i32, i32, i32) {
    %c0_i32 = arith.constant 0 : i32
    %c0_i32_0 = arith.constant 0 : i32
    %c0_i32_1 = arith.constant 0 : i32
    %c0_i32_2 = arith.constant 0 : i32
    %c0_i32_3 = arith.constant 0 : i32
    return %c0_i32, %c0_i32_0, %c0_i32_1, %c0_i32_2 : i32, i32, i32, i32
  }
  func.func @transform_5(%arg0: i32) -> (i32, i32, i32) {
    %c0_i32 = arith.constant 0 : i32
    %c0_i32_0 = arith.constant 0 : i32
    %c0_i32_1 = arith.constant 0 : i32
    %c0_i32_2 = arith.constant 0 : i32
    return %c0_i32, %c0_i32_0, %c0_i32_1 : i32, i32, i32
  }
  func.func @transform_6(%arg0: i32) -> (i32, i32, i32, i32) {
    %c0_i32 = arith.constant 0 : i32
    %c0_i32_0 = arith.constant 0 : i32
    %c0_i32_1 = arith.constant 0 : i32
    %c0_i32_2 = arith.constant 0 : i32
    %c0_i32_3 = arith.constant 0 : i32
    return %c0_i32, %c0_i32_0, %c0_i32_1, %c0_i32_2 : i32, i32, i32, i32
  }
  func.func @transform_7(%arg0: i32) -> (i32, i32, i32) {
    %c0_i32 = arith.constant 0 : i32
    %c0_i32_0 = arith.constant 0 : i32
    %c0_i32_1 = arith.constant 0 : i32
    %c0_i32_2 = arith.constant 0 : i32
    return %c0_i32, %c0_i32_0, %c0_i32_1 : i32, i32, i32
  }
  func.func @transform_8(%arg0: i32) -> (i32, i32, i32) {
    %c0_i32 = arith.constant 0 : i32
    %c0_i32_0 = arith.constant 0 : i32
    %c0_i32_1 = arith.constant 0 : i32
    %c0_i32_2 = arith.constant 0 : i32
    return %c0_i32, %c0_i32_0, %c0_i32_1 : i32, i32, i32
  }
  func.func @transform_9(%arg0: i32) -> (i32, i32, i32) {
    %c0_i32 = arith.constant 0 : i32
    %c0_i32_0 = arith.constant 0 : i32
    %c0_i32_1 = arith.constant 0 : i32
    %c0_i32_2 = arith.constant 0 : i32
    return %c0_i32, %c0_i32_0, %c0_i32_1 : i32, i32, i32
  }
  func.func @transform_10(%arg0: i32) -> (i32, i32, i32) {
    %c0_i32 = arith.constant 0 : i32
    %c0_i32_0 = arith.constant 0 : i32
    %c0_i32_1 = arith.constant 0 : i32
    %c0_i32_2 = arith.constant 0 : i32
    return %c0_i32, %c0_i32_0, %c0_i32_1 : i32, i32, i32
  }
  func.func @transform_11(%arg0: i32) -> (i32, i32, i32) {
    %c0_i32 = arith.constant 0 : i32
    %c0_i32_0 = arith.constant 0 : i32
    %c0_i32_1 = arith.constant 0 : i32
    %c0_i32_2 = arith.constant 0 : i32
    return %c0_i32, %c0_i32_0, %c0_i32_1 : i32, i32, i32
  }
}

</mosaic_0001>

<bundles_post_ra>
// kernel: tpu_custom_call.1
= control target key start
LH: loop header
LB: loop body
LE: loop exit
PB: predicated region body
PF: predicated region fallthrough
CT: control target
= control target key end

     0   :  { %vm48_vm0 = vcmask 261120   ;;  %s8267_s0 = inlined_call_operand.vmem [shape: f32[2,8,32], index: 0, kind: input, shape index: {}]   ;;  %s8268_s1 = inlined_call_operand.vmem [shape: f32[2,8,8], index: 1, kind: input, shape index: {}]   ;;  %s8269_s2 = inlined_call_operand.vmem [shape: f32[2,3,4,32,8], index: 2, kind: input, shape index: {}]   ;;  %s8270_s3 = inlined_call_operand.vmem [shape: f32[2,3,4,1,8], index: 3, kind: input, shape index: {}]   ;;  %s8271_s4 = inlined_call_operand.vmem [shape: f32[2,4,1,32], index: 4, kind: input, shape index: {}]   ;;  %s8272_s5 = inlined_call_operand.vmem [shape: f32[2,32,32], index: 5, kind: input, shape index: {}]   ;;  %s8273_s6 = inlined_call_operand.vmem [shape: f32[2,2,1,32], index: 6, kind: input, shape index: {}]   ;;  %s8274_s7 = inlined_call_operand.vmem [shape: f32[2,32,64], index: 7, kind: input, shape index: {}]   ;;  %s8275_s8 = inlined_call_operand.vmem [shape: f32[2,1,64], index: 8, kind: input, shape index: {}]   ;;  %s8276_s9 = inlined_call_operand.vmem [shape: f32[2,64,32], index: 9, kind: input, shape index: {}]   ;;  %s8277_s10 = inlined_call_operand.vmem [shape: f32[2,1,32], index: 10, kind: input, shape index: {}]   ;;  %s8278_s11 = inlined_call_operand.hbm [shape: f32[2,8,32], index: 11, kind: output, shape index: {}]  }
   0x1   :  { %v39_v0 = vld [vmem:[%s8267_s0] sm:$0xff]  ;;  %v5729_v1 = vld [vmem:[%s8267_s0 + $0x8] sm:$0xff] }
   0x2   :  { %v49_v2 = vsel %vm48_vm0, %v39_v0, 0.0 }
   0x3   :  { %16 = vsyncpa [#allocation3], 0  ;;  %50 = vadd.xlane.f32.xlu0 %v49_v2  ;;  %v52_v3 = vsel %vm48_vm0, %v5729_v1, 0.0  ;;  %v106_v14 = vld [vmem:[%s8269_s2] sm:$0xff]  ;;  %v107_v15 = vld [vmem:[%s8269_s2 + $0x8] sm:$0xff]  ;;  %vm7176_vm5 = vmmov 0  }
   0x4   :  { %v5745_v16 = vld [vmem:[%s8269_s2 + $0x100] sm:$0xff]  ;;  %v6780_v17 = vpack.c.bf16 %v107_v15, %v106_v14  ;;  %v5746_v18 = vld [vmem:[%s8269_s2 + $0x108] sm:$0xff]  ;;  %v108_v20 = vld [vmem:[%s8269_s2 + $0x10] sm:$0xff]  ;;  %vm1166_vm6 = vcmask 64512   ;;  %s7177_s16 = smov 16   ;;  %s7178_s17 = smov 8  }
   0x5   :  { %v6796_v19 = vpack.c.bf16 %v5746_v18, %v5745_v16  ;;  %v109_v21 = vld [vmem:[%s8269_s2 + $0x18] sm:$0xff]  ;;  %v5747_v22 = vld [vmem:[%s8269_s2 + $0x110] sm:$0xff]  ;;  %v5737_v26 = vld [vmem:[%s8269_s2 + $0x80] sm:$0xff]  ;;  %s7179_s18 = smov 24   ;;  %vm1828_vm7 = vcmask 130048   ;;  %vm1830_vm8 = vcmask 195584  }
   0x6   :  { %6781 = vmatprep.subr.bf16.mxu1 %v6780_v17  ;;  %v6784_v23 = vpack.c.bf16 %v109_v21, %v108_v20  ;;  %v5748_v24 = vld [vmem:[%s8269_s2 + $0x118] sm:$0xff]  ;;  %v5738_v27 = vld [vmem:[%s8269_s2 + $0x88] sm:$0xff]  ;;  %v5761_v28 = vld [vmem:[%s8269_s2 + $0xa0] sm:$0xff]  ;;  %vm2753_vm13 = vcmask 523264  }
   0x7   :  { %53 = vadd.xlane.f32.xlu0 %v52_v3  ;;  %6797 = vmatprep.subr.bf16.mxu0 %v6796_v19  ;;  %v6800_v25 = vpack.c.bf16 %v5748_v24, %v5747_v22  ;;  %v6788_v29 = vpack.c.bf16 %v5738_v27, %v5737_v26  ;;  %v5762_v30 = vld [vmem:[%s8269_s2 + $0xa8] sm:$0xff]  ;;  %v5732_v48 = vld [vmem:[%s8271_s4] ss:$0 sm:$0xff]  ;;  %v5733_v51 = vld [vmem:[%s8271_s4 + $0x1] ss:$0 sm:$0xff] }
   0x8   :  { %6783 = vmatpush3.bf16.msra.mxu1 %v6780_v17  ;;  %6799 = vmatpush3.bf16.msra.mxu0 %v6796_v19  ;;  %v6812_v31 = vpack.c.bf16 %v5762_v30, %v5761_v28  ;;  %v5739_v56 = vld [vmem:[%s8269_s2 + $0x90] sm:$0xff]  ;;  %v5740_v58 = vld [vmem:[%s8269_s2 + $0x98] sm:$0xff]  ;;  %v5753_v62 = vld [vmem:[%s8269_s2 + $0x20] sm:$0xff] }
   0x9   :  { %6785 = vmatprep.subr.bf16.mxu1 %v6784_v23  ;;  %6801 = vmatprep.subr.bf16.mxu0 %v6800_v25  ;;  %v5763_v59 = vld [vmem:[%s8269_s2 + $0xb0] sm:$0xff]  ;;  %v5764_v60 = vld [vmem:[%s8269_s2 + $0xb8] sm:$0xff]  ;;  %v6792_v63 = vpack.c.bf16 %v5740_v58, %v5739_v56  ;;  %v5777_v2 = vld [vmem:[%s8269_s2 + $0x40] sm:$0xff] }
   0xa   :  { %v5778_v3 = vld [vmem:[%s8269_s2 + $0x48] sm:$0xff]  ;;  %v5793_v14 = vld [vmem:[%s8269_s2 + $0x140] sm:$0xff]  ;;  %v5771_v18 = vld [vmem:[%s8269_s2 + $0x130] sm:$0xff] }
   0xb   :  { %v5794_v15 = vld [vmem:[%s8269_s2 + $0x148] sm:$0xff]  ;;  %v5772_v19 = vld [vmem:[%s8269_s2 + $0x138] sm:$0xff]  ;;  %v5795_v20 = vld [vmem:[%s8269_s2 + $0x150] sm:$0xff] }
   0xc   :  { %6787 = vmatpush3.bf16.msra.mxu1 %v6784_v23  ;;  %6803 = vmatpush3.bf16.msra.mxu0 %v6800_v25  ;;  %v6844_v17 = vpack.c.bf16 %v5794_v15, %v5793_v14  ;;  %v5796_v21 = vld [vmem:[%s8269_s2 + $0x158] sm:$0xff]  ;;  %v6824_v22 = vpack.c.bf16 %v5772_v19, %v5771_v18  ;;  %v5785_v23 = vld [vmem:[%s8269_s2 + $0xc0] sm:$0xff]  ;;  %v5786_v24 = vld [vmem:[%s8269_s2 + $0xc8] sm:$0xff] }
   0xd   :  { %6789 = vmatprep.subr.bf16.mxu1 %v6788_v29  ;;  %6813 = vmatprep.subr.bf16.mxu0 %v6812_v31  ;;  %v6848_v25 = vpack.c.bf16 %v5796_v21, %v5795_v20  ;;  %v5809_v26 = vld [vmem:[%s8269_s2 + $0xe0] sm:$0xff]  ;;  %v5810_v27 = vld [vmem:[%s8269_s2 + $0xe8] sm:$0xff]  ;;  %v6836_v28 = vpack.c.bf16 %v5786_v24, %v5785_v23  ;;  %v5787_v30 = vld [vmem:[%s8269_s2 + $0xd0] sm:$0xff] }
   0xe   :  { %v5766_v58 = vld [vmem:[%s8270_s3 + $0x5] ss:$0 sm:$0xff]  ;;  %v7516_v14 = vld [vmem:[%s8270_s3 + $0xa] ss:$0 sm:$0xff]  ;;  %v5790_v21 = vld [vmem:[%s8270_s3 + $0x6] ss:$0 sm:$0xff] }
  0x90   :  { %v51_v4 = vpop.xlane.xlu0 %50 }
  0x91   :  { %v56_v5 = vmul.f32 0.03125, %v51_v4 }
  0x93   :  { %v7250_v6 = vsub.f32 %v39_v0, %v56_v5  ;;  %v6816_v0 = vpack.c.bf16 %v5764_v60, %v5763_v59  ;;  %v6828_v5 = vpack.c.bf16 %v5778_v3, %v5777_v2 }
  0x94   :  { %v54_v7 = vpop.xlane.xlu0 %53 }
  0x95   :  { %v57_v8 = vmul.f32 0.03125, %v54_v7  ;;  %v60_v9 = vmul.f32 %v7250_v6, %v7250_v6  ;;  %v76_v49 = vmul.f32 %v5732_v48, %v7250_v6  ;;  %v5755_v6 = vld [vmem:[%s8269_s2 + $0x30] sm:$0xff]  ;;  %v5756_v7 = vld [vmem:[%s8269_s2 + $0x38] sm:$0xff] }
  0x97   :  { %v7254_v10 = vsub.f32 %v5729_v1, %v57_v8  ;;  %v62_v11 = vsel %vm48_vm0, %v60_v9, 0.0  ;;  %v5754_v1 = vld [vmem:[%s8269_s2 + $0x28] sm:$0xff]  ;;  %v5779_v8 = vld [vmem:[%s8269_s2 + $0x50] sm:$0xff]  ;;  %v5780_v9 = vld [vmem:[%s8269_s2 + $0x58] sm:$0xff] }
  0x98   :  { %63 = vadd.xlane.f32.xlu1 %v62_v11  ;;  %v6804_v4 = vpack.c.bf16 %v5754_v1, %v5753_v62  ;;  %v6832_v11 = vpack.c.bf16 %v5780_v9, %v5779_v8 }
  0x99   :  { %v61_v12 = vmul.f32 %v7254_v10, %v7254_v10  ;;  %v77_v53 = vmul.f32 %v5732_v48, %v7254_v10  ;;  %v6808_v10 = vpack.c.bf16 %v5756_v7, %v5755_v6  ;;  %v7175_v48 = vmov 0.0  }
  0x9b   :  { %v65_v13 = vsel %vm48_vm0, %v61_v12, 0.0  ;;  %v5769_v12 = vld [vmem:[%s8269_s2 + $0x120] sm:$0xff] }
  0x9c   :  { %66 = vadd.xlane.f32.xlu1 %v65_v13  ;;  %v5770_v13 = vld [vmem:[%s8269_s2 + $0x128] sm:$0xff] }
  0x9d   :  { %v6820_v16 = vpack.c.bf16 %v5770_v13, %v5769_v12  ;;  %v5774_v13 = vld [vmem:[%s8270_s3 + $0x9] ss:$0 sm:$0xff] }
 0x125   :  { %v64_v32 = vpop.xlane.xlu1 %63 }
 0x126   :  { %v68_v33 = vmul.f32 0.032258064, %v64_v32  ;;  %v5811_v32 = vld [vmem:[%s8269_s2 + $0xf0] sm:$0xff] }
 0x128   :  { %7043 = vrsqrt.f32 %v68_v33  ;;  %vm80_vm1 = vcmp.eq.f32.partialorder %v68_v33, inf  ;;  %v83_v38 = vand.u32 2147483648, %v68_v33  ;;  %vm82_vm2 = vcmp.eq.f32.partialorder %v68_v33, 0.0 }
 0x129   :  { %v67_v34 = vpop.xlane.xlu1 %66 }
 0x12a   :  { %v69_v35 = vmul.f32 0.032258064, %v67_v34 }
 0x12c   :  { %7045 = vrsqrt.f32 %v69_v35  ;;  %vm87_vm3 = vcmp.eq.f32.partialorder %v69_v35, inf  ;;  %v90_v44 = vand.u32 2147483648, %v69_v35  ;;  %vm89_vm4 = vcmp.eq.f32.partialorder %v69_v35, 0.0 }
 0x132   :  { %v7044_v36 = vpop.eup %7043 }
 0x133   :  { %v79_v37 = vmul.f32 %v7044_v36, %v68_v33  ;;  %v5802_v36 = vld [vmem:[%s8269_s2 + $0x68] sm:$0xff] }
 0x135   :  { %v81_v39 = vsel %vm80_vm1, %v68_v33, %v79_v37  ;;  %v5812_v33 = vld [vmem:[%s8269_s2 + $0xf8] sm:$0xff] }
 0x136   :  { %v7046_v40 = vpop.eup %7045  ;;  %v84_v41 = vsel %vm82_vm2, %v83_v38, %v81_v39  ;;  %v6864_v37 = vpack.c.bf16 %v5812_v33, %v5811_v32  ;;  %v5803_v39 = vld [vmem:[%s8269_s2 + $0x70] sm:$0xff]  ;;  %v5806_v33 = vld [vmem:[%s8270_s3 + $0x3] ss:$0 sm:$0xff] }
 0x137   :  { %v92_v42 = vadd.f32 1e-06, %v84_v41  ;;  %v86_v43 = vmul.f32 %v7046_v40, %v69_v35  ;;  %v5804_v40 = vld [vmem:[%s8269_s2 + $0x78] sm:$0xff] }
 0x138   :  { %v6856_v41 = vpack.c.bf16 %v5804_v40, %v5803_v39  ;;  %v7554_v39 = vld [vmem:[%s8270_s3 + $0xb] ss:$0 sm:$0xff] }
 0x139   :  { %7047 = vrcp.f32 %v92_v42  ;;  %v88_v45 = vsel %vm87_vm3, %v69_v35, %v86_v43  ;;  %v5801_v35 = vld [vmem:[%s8269_s2 + $0x60] sm:$0xff]  ;;  %v5818_v43 = vld [vmem:[%s8269_s2 + $0x168] sm:$0xff] }
 0x13a   :  { %v91_v46 = vsel %vm89_vm4, %v90_v44, %v88_v45  ;;  %v6852_v38 = vpack.c.bf16 %v5802_v36, %v5801_v35  ;;  %v5817_v42 = vld [vmem:[%s8269_s2 + $0x160] sm:$0xff]  ;;  %v5819_v45 = vld [vmem:[%s8269_s2 + $0x170] sm:$0xff] }
 0x13b   :  { %v93_v47 = vadd.f32 1e-06, %v91_v46  ;;  %v6868_v44 = vpack.c.bf16 %v5818_v43, %v5817_v42  ;;  %v5820_v46 = vld [vmem:[%s8269_s2 + $0x178] sm:$0xff] }
 0x13d   :  { %7049 = vrcp.f32 %v93_v47  ;;  %v6872_v47 = vpack.c.bf16 %v5820_v46, %v5819_v45 }
 0x143   :  { %v7048_v50 = vpop.eup %7047 }
 0x144   :  { %v95_v52 = vmul.f32 %v7048_v50, %v76_v49  ;;  %v5734_v49 = vld [vmem:[%s8270_s3] ss:$0 sm:$0xff]  ;;  %v5750_v50 = vld [vmem:[%s8270_s3 + $0x8] ss:$0 sm:$0xff] }
 0x146   :  { %v7304_v54 = vadd.f32 %v5733_v51, %v95_v52 }
 0x147   :  { %v7050_v55 = vpop.eup %7049 }
 0x148   :  { %v97_v57 = vmul.f32 %v7050_v55, %v77_v53  ;;  %6282 = vmatprep.mubr.msk.f32.mxu1 %vm48_vm0, %v7304_v54  ;;  %6304 = vmatprep.mubr.msk.f32.mxu0 %vm48_vm0, %v7304_v54 }
 0x14a   :  { %v7322_v61 = vadd.f32 %v5733_v51, %v97_v57  ;;  %v5742_v57 = vld [vmem:[%s8270_s3 + $0x4] ss:$0 sm:$0xff] }
 0x14c   :  { %6283 = vmatmul.mubr.msk.f32.vlgmr.msra.gmra.mrb[0].mxu1 %vm48_vm0, %v7322_v61  ;;  %6305 = vmatmul.mubr.msk.f32.vlgmr.msra.gmra.mrb[0].mxu0 %vm48_vm0, %v7322_v61 }
 0x14d   :  { %6791 = vmatpush3.bf16.msra.mxu1 %v6788_v29  ;;  %6815 = vmatpush3.bf16.msra.mxu0 %v6812_v31  ;;  %v6860_v29 = vpack.c.bf16 %v5810_v27, %v5809_v26  ;;  %v5788_v31 = vld [vmem:[%s8269_s2 + $0xd8] sm:$0xff] }
 0x14e   :  { %6293 = vmatprep.mubr.msk.f32.mxu1 %vm48_vm0, %v7304_v54  ;;  %6326 = vmatprep.mubr.msk.f32.mxu0 %vm48_vm0, %v7304_v54  ;;  %v6840_v34 = vpack.c.bf16 %v5788_v31, %v5787_v30 }
 0x14f   :  { %6793 = vmatprep.subr.bf16.mxu1 %v6792_v63  ;;  %6817 = vmatprep.subr.bf16.mxu0 %v6816_v0 }
 0x151   :  { %6795 = vmatpush3.bf16.msra.mxu1 %v6792_v63  ;;  %6819 = vmatpush3.bf16.msra.mxu0 %v6816_v0 }
 0x152   :  { %6805 = vmatprep.subr.bf16.mxu1 %v6804_v4  ;;  %6829 = vmatprep.subr.bf16.mxu0 %v6828_v5 }
 0x154   :  { %6294 = vmatmul.mubr.msk.f32.vlgmr.msra.gmra.mrb[2].mxu1 %vm48_vm0, %v7322_v61  ;;  %6327 = vmatmul.mubr.msk.f32.vlgmr.msra.gmra.mrb[2].mxu0 %vm48_vm0, %v7322_v61 }
 0x155   :  { %6807 = vmatpush3.bf16.msra.mxu1 %v6804_v4  ;;  %6315 = vmatprep.mubr.msk.f32.mxu1 %vm48_vm0, %v7304_v54  ;;  %v5758_v4 = vld [vmem:[%s8270_s3 + $0x1] ss:$0 sm:$0xff] }
 0x156   :  { %6831 = vmatpush3.bf16.msra.mxu0 %v6828_v5  ;;  %6348 = vmatprep.mubr.msk.f32.mxu0 %vm48_vm0, %v7304_v54  ;;  %v5782_v5 = vld [vmem:[%s8270_s3 + $0x2] ss:$0 sm:$0xff] }
 0x157   :  { %6809 = vmatprep.subr.bf16.mxu1 %v6808_v10  ;;  %6833 = vmatprep.subr.bf16.mxu0 %v6832_v11 }
 0x159   :  { %6811 = vmatpush3.bf16.msra.mxu1 %v6808_v10 }
 0x15a   :  { %6835 = vmatpush3.bf16.msra.mxu0 %v6832_v11  ;;  %6821 = vmatprep.subr.bf16.mxu1 %v6820_v16 }
 0x15b   :  { %6845 = vmatprep.subr.bf16.mxu0 %v6844_v17 }
 0x15c   :  { %6316 = vmatmul.mubr.msk.f32.vlgmr.msra.gmra.mrb[4].mxu1 %vm48_vm0, %v7322_v61 }
 0x15d   :  { %6349 = vmatmul.mubr.msk.f32.vlgmr.msra.gmra.mrb[4].mxu0 %vm48_vm0, %v7322_v61  ;;  %6823 = vmatpush3.bf16.msra.mxu1 %v6820_v16 }
 0x15e   :  { %6337 = vmatprep.mubr.msk.f32.mxu1 %vm48_vm0, %v7304_v54  ;;  %6847 = vmatpush3.bf16.msra.mxu0 %v6844_v17 }
 0x15f   :  { %6370 = vmatprep.mubr.msk.f32.mxu0 %vm48_vm0, %v7304_v54  ;;  %6825 = vmatprep.subr.bf16.mxu1 %v6824_v22 }
 0x160   :  { %6849 = vmatprep.subr.bf16.mxu0 %v6848_v25 }
 0x161   :  { %6827 = vmatpush3.bf16.msra.mxu1 %v6824_v22  ;;  %v5814_v22 = vld [vmem:[%s8270_s3 + $0x7] ss:$0 sm:$0xff] }
 0x162   :  { %6851 = vmatpush3.bf16.msra.mxu0 %v6848_v25  ;;  %6837 = vmatprep.subr.bf16.mxu1 %v6836_v28 }
 0x163   :  { %6861 = vmatprep.subr.bf16.mxu0 %v6860_v29 }
 0x164   :  { %6338 = vmatmul.mubr.msk.f32.vlgmr.msra.gmra.mrb[6].mxu1 %vm48_vm0, %v7322_v61 }
 0x165   :  { %6371 = vmatmul.mubr.msk.f32.vlgmr.msra.gmra.mrb[6].mxu0 %vm48_vm0, %v7322_v61  ;;  %6839 = vmatpush3.bf16.msra.mxu1 %v6836_v28 }
 0x166   :  { %6359 = vmatprep.mubr.msk.f32.mxu1 %vm48_vm0, %v7304_v54  ;;  %6863 = vmatpush3.bf16.msra.mxu0 %v6860_v29 }
 0x167   :  { %6392 = vmatprep.mubr.msk.f32.mxu0 %vm48_vm0, %v7304_v54  ;;  %6841 = vmatprep.subr.bf16.mxu1 %v6840_v34 }
 0x168   :  { %6865 = vmatprep.subr.bf16.mxu0 %v6864_v37 }
 0x169   :  { %6843 = vmatpush3.bf16.msra.mxu1 %v6840_v34 }
 0x16a   :  { %6867 = vmatpush3.bf16.msra.mxu0 %v6864_v37  ;;  %6853 = vmatprep.subr.bf16.mxu1 %v6852_v38 }
 0x16b   :  { %6406 = vmatprep.subr.mxu0 %v7175_v48 }
 0x16c   :  { %6360 = vmatmul.mubr.msk.f32.vlgmr.msra.gmra.mrb[8].mxu1 %vm48_vm0, %v7322_v61 }
 0x16d   :  { %6393 = vmatmul.mubr.msk.f32.vlgmr.msra.gmra.mrb[8].mxu0 %vm48_vm0, %v7322_v61  ;;  %6855 = vmatpush3.bf16.msra.mxu1 %v6852_v38 }
 0x16e   :  { %6381 = vmatprep.mubr.msk.f32.mxu1 %vm48_vm0, %v7304_v54  ;;  %6857 = vmatprep.subr.bf16.mxu1 %v6856_v41 }
 0x16f   :  { %6408 = vmatprep.mubr.msk.f32.mxu0 %vm7176_vm5, %v7175_v48 }
 0x171   :  { %6859 = vmatpush3.bf16.msra.mxu1 %v6856_v41 }
 0x172   :  { %6869 = vmatprep.subr.bf16.mxu1 %v6868_v44 }
 0x174   :  { %6382 = vmatmul.mubr.msk.f32.vlgmr.msra.gmra.mrb[10].mxu1 %vm48_vm0, %v7322_v61 }
 0x175   :  { %6871 = vmatpush3.bf16.msra.mxu1 %v6868_v44  ;;  %6403 = vmatprep.mubr.msk.f32.mxu1 %vm48_vm0, %v7304_v54  ;;  %v42_v44 = vld [vmem:[%s8268_s1] sm:$0xff] }
 0x176   :  { %6873 = vmatprep.subr.bf16.mxu1 %v6872_v47 }
 0x179   :  { %6875 = vmatpush3.bf16.msra.mxu1 %v6872_v47 }
 0x17a   :  { %6411 = vmatprep.subr.mxu1 %v7175_v48 }
 0x17c   :  { %6404 = vmatmul.mubr.msk.f32.vlgmr.msra.gmra.mrb[12].mxu1 %vm48_vm0, %v7322_v61 }
 0x17d   :  { %6413 = vmatprep.mubr.msk.f32.mxu1 %vm7176_vm5, %v7175_v48 }
 0x21f   :  { %v6284_v51 = vpop.f32.mrb[0].mxu1  ;;  %v6306_v52 = vpop.f32.mrb[0].mxu0 }
 0x220   :  { %v7476_v53 = vadd.f32 %v6284_v51, %v5734_v49  ;;  %v7478_v54 = vadd.f32 %v6306_v52, %v5750_v50  ;;  %v189_v55 = vpop.f32.mrb[1].mxu1  ;;  %v365_v56 = vpop.f32.mrb[1].mxu0 }
 0x221   :  { %v190_v3 = vadd.f32 %v5734_v49, %v189_v55  ;;  %v366_v32 = vadd.f32 %v5750_v50, %v365_v56 }
 0x227   :  { %v6295_v59 = vpop.f32.mrb[2].mxu1  ;;  %v6328_v60 = vpop.f32.mrb[2].mxu0 }
 0x228   :  { %v7486_v61 = vadd.f32 %v6295_v59, %v5742_v57  ;;  %v7488_v62 = vadd.f32 %v6328_v60, %v5766_v58  ;;  %v277_v63 = vpop.f32.mrb[3].mxu1  ;;  %v541_v0 = vpop.f32.mrb[3].mxu0 }
 0x229   :  { %v278_v1 = vadd.f32 %v5742_v57, %v277_v63  ;;  %v542_v2 = vadd.f32 %v5766_v58, %v541_v0 }
 0x22b   :  { %6407 = vmatpush3.xpose.msk.msra.mxu0 %vm1166_vm6, %v278_v1  ;;  %6412 = vmatpush3.xpose.msk.msra.mxu1 %vm1166_vm6, %v542_v2 }
 0x22c   :  { %6416 = vmatprep.subr.mxu0 %v7175_v48  ;;  %6421 = vmatprep.subr.mxu1 %v7175_v48 }
 0x22e   :  { %6409 = vmatmul.mubr.msk.f32.vlgmr.msra.gmra.mrb[10].mxu0 %vm1166_vm6, %v190_v3 }
 0x22f   :  { %v6317_v6 = vpop.f32.mrb[4].mxu1  ;;  %6418 = vmatprep.mubr.msk.f32.mxu0 %vm7176_vm5, %v7175_v48 }
 0x230   :  { %v7503_v7 = vadd.f32 %v6317_v6, %v5758_v4  ;;  %v6350_v8 = vpop.f32.mrb[4].mxu0  ;;  %v453_v9 = vpop.f32.mrb[5].mxu1 }
 0x231   :  { %v7505_v10 = vadd.f32 %v6350_v8, %v5782_v5  ;;  %v454_v11 = vadd.f32 %v5758_v4, %v453_v9  ;;  %v717_v12 = vpop.f32.mrb[5].mxu0 }
 0x232   :  { %v718_v31 = vadd.f32 %v5782_v5, %v717_v12 }
 0x233   :  { %6414 = vmatmul.mubr.msk.f32.vlgmr.msra.gmra.mrb[14].mxu1 %vm1166_vm6, %v454_v11 }
 0x234   :  { %6423 = vmatprep.mubr.msk.f32.mxu1 %vm7176_vm5, %v7175_v48 }
 0x237   :  { %v6339_v15 = vpop.f32.mrb[6].mxu1 }
 0x238   :  { %v7518_v16 = vadd.f32 %v6339_v15, %v5774_v13  ;;  %v6372_v17 = vpop.f32.mrb[6].mxu0  ;;  %v629_v18 = vpop.f32.mrb[7].mxu1 }
 0x239   :  { %v7521_v19 = vadd.f32 %v6372_v17, %v7516_v14  ;;  %v7523_v20 = vpop.f32.mrb[7].mxu0  ;;  %v630_v38 = vadd.f32 %v5774_v13, %v629_v18 }
 0x23f   :  { %v6361_v23 = vpop.f32.mrb[8].mxu1 }
 0x240   :  { %v7531_v24 = vadd.f32 %v6361_v23, %v5790_v21  ;;  %v6394_v25 = vpop.f32.mrb[8].mxu0  ;;  %v805_v26 = vpop.f32.mrb[9].mxu1 }
 0x241   :  { %v7533_v27 = vadd.f32 %v6394_v25, %v5814_v22  ;;  %v806_v28 = vadd.f32 %v5790_v21, %v805_v26  ;;  %v1069_v29 = vpop.f32.mrb[9].mxu0 }
 0x242   :  { %v1070_v30 = vadd.f32 %v5814_v22, %v1069_v29 }
 0x243   :  { %6417 = vmatpush3.xpose.msk.msra.mxu0 %vm1166_vm6, %v806_v28 }
 0x244   :  { %6422 = vmatpush3.xpose.msk.msra.mxu1 %vm1166_vm6, %v1070_v30  ;;  %6426 = vmatprep.subr.mxu0 %v7175_v48 }
 0x245   :  { %6431 = vmatprep.subr.mxu1 %v7175_v48 }
 0x246   :  { %6419 = vmatmul.mubr.msk.f32.vlgmr.msra.gmra.mrb[12].mxu0 %vm1166_vm6, %v718_v31 }
 0x247   :  { %v6383_v34 = vpop.f32.mrb[10].mxu1  ;;  %6427 = vmatpush3.msra.mxu0 %v366_v32  ;;  %6428 = vmatprep.mubr.msk.f32.mxu0 %vm7176_vm5, %v7175_v48 }
 0x248   :  { %v7545_v35 = vadd.f32 %v6383_v34, %v5806_v33  ;;  %v981_v36 = vpop.f32.mrb[11].mxu1  ;;  %6436 = vmatprep.subr.mxu0 %v7175_v48 }
 0x249   :  { %v982_v37 = vadd.f32 %v5806_v33, %v981_v36 }
 0x24b   :  { %6424 = vmatmul.mubr.msk.f32.vlgmr.msra.gmra.mrb[16].mxu1 %vm1166_vm6, %v982_v37 }
 0x24c   :  { %6432 = vmatpush3.msra.mxu1 %v630_v38  ;;  %6433 = vmatprep.mubr.msk.f32.mxu1 %vm7176_vm5, %v7175_v48  ;;  %v894_v38 = vadd.f32 %v7516_v14, %v7523_v20 }
 0x24d   :  { %6441 = vmatprep.subr.mxu1 %v7175_v48 }
 0x24f   :  { %v6405_v40 = vpop.f32.mrb[12].mxu1 }
 0x250   :  { %v7558_v41 = vadd.f32 %v6405_v40, %v7554_v39  ;;  %v7560_v42 = vpop.f32.mrb[13].mxu1 }
 0x301   :  { %v1239_v43 = vpop.f32.mrb[10].mxu0 }
 0x302   :  { %v1471_v45 = vmul.f32 0.35355338, %v1239_v43  ;;  %v6410_v46 = vpop.f32.mrb[11].mxu0 }
 0x304   :  { %v1475_v47 = vadd.f32 %v1471_v45, %v42_v44 }
 0x306   :  { %v1315_v49 = vpop.f32.mrb[14].mxu1  ;;  %v1479_v50 = vsel %vm1166_vm6, %v1475_v47, -inf }
 0x307   :  { %v1472_v51 = vmul.f32 0.35355338, %v1315_v49  ;;  %v6415_v52 = vpop.f32.mrb[15].mxu1  ;;  %1480 = vmax.xlane.f32.xlu0 %v1479_v50 }
 0x309   :  { %v1476_v55 = vadd.f32 %v1472_v51, %v42_v44 }
 0x30b   :  { %v1482_v56 = vsel %vm1166_vm6, %v1476_v55, -inf }
 0x30c   :  { %1483 = vmax.xlane.f32.xlu1 %v1482_v56 }
 0x319   :  { %v1391_v57 = vpop.f32.mrb[12].mxu0 }
 0x31a   :  { %v1473_v58 = vmul.f32 0.35355338, %v1391_v57  ;;  %v6420_v59 = vpop.f32.mrb[13].mxu0 }
 0x31c   :  { %v1477_v60 = vadd.f32 %v1473_v58, %v42_v44 }
 0x31e   :  { %v1467_v63 = vpop.f32.mrb[16].mxu1  ;;  %v1485_v0 = vsel %vm1166_vm6, %v1477_v60, -inf }
 0x31f   :  { %v1474_v1 = vmul.f32 0.35355338, %v1467_v63  ;;  %v6425_v2 = vpop.f32.mrb[17].mxu1  ;;  %1486 = vmax.xlane.f32.xlu0 %v1485_v0 }
 0x321   :  { %v1478_v3 = vadd.f32 %v1474_v1, %v42_v44  ;;  %v1158_v44 = vadd.f32 %v7554_v39, %v7560_v42 }
 0x323   :  { %v1488_v4 = vsel %vm1166_vm6, %v1478_v3, -inf }
 0x324   :  { %1489 = vmax.xlane.f32.xlu1 %v1488_v4 }
 0x394   :  { %v1481_v5 = vpop.xlane.xlu0 %1480 }
 0x395   :  { %v1491_v6 = vsub.f32 %v1475_v47, %v1481_v5 }
 0x397   :  { %v1495_v8 = vmul.f32 1.442695, %v1491_v6 }
 0x399   :  { %7051 = vpow2.f32 %v1495_v8  ;;  %v1484_v9 = vpop.xlane.xlu1 %1483 }
 0x39a   :  { %v1492_v11 = vsub.f32 %v1476_v55, %v1484_v9 }
 0x39c   :  { %v1497_v12 = vmul.f32 1.442695, %v1492_v11 }
 0x39e   :  { %7053 = vpow2.f32 %v1497_v12 }
 0x3a3   :  { %v7052_v13 = vpop.eup %7051 }
 0x3a4   :  { %v1503_v15 = vsel %vm1166_vm6, %v7052_v13, 0.0 }
 0x3a5   :  { %1504 = vadd.xlane.f32.xlu0 %v1503_v15 }
 0x3a8   :  { %v7054_v17 = vpop.eup %7053 }
 0x3a9   :  { %v1506_v18 = vsel %vm1166_vm6, %v7054_v17, 0.0 }
 0x3aa   :  { %1507 = vadd.xlane.f32.xlu1 %v1506_v18 }
 0x3ac   :  { %v1487_v21 = vpop.xlane.xlu0 %1486 }
 0x3ad   :  { %v1493_v22 = vsub.f32 %v1477_v60, %v1487_v21 }
 0x3af   :  { %v1499_v23 = vmul.f32 1.442695, %v1493_v22 }
 0x3b1   :  { %7055 = vpow2.f32 %v1499_v23  ;;  %v1490_v25 = vpop.xlane.xlu1 %1489 }
 0x3b2   :  { %v1494_v26 = vsub.f32 %v1478_v3, %v1490_v25 }
 0x3b4   :  { %v1501_v28 = vmul.f32 1.442695, %v1494_v26 }
 0x3b6   :  { %7057 = vpow2.f32 %v1501_v28 }
 0x3bb   :  { %v7056_v29 = vpop.eup %7055 }
 0x3bc   :  { %v1509_v30 = vsel %vm1166_vm6, %v7056_v29, 0.0 }
 0x3bd   :  { %1510 = vadd.xlane.f32.xlu0 %v1509_v30 }
 0x3c0   :  { %v7058_v31 = vpop.eup %7057 }
 0x3c1   :  { %v1512_v32 = vsel %vm1166_vm6, %v7058_v31, 0.0 }
 0x3c2   :  { %1513 = vadd.xlane.f32.xlu1 %v1512_v32 }
 0x432   :  { %v1505_v33 = vpop.xlane.xlu0 %1504 }
 0x433   :  { %7059 = vrcp.f32 %v1505_v33 }
 0x437   :  { %v1508_v34 = vpop.xlane.xlu1 %1507 }
 0x438   :  { %7061 = vrcp.f32 %v1508_v34 }
 0x43d   :  { %v7060_v36 = vpop.eup %7059 }
 0x43e   :  { %v1519_v37 = vmul.f32 %v7060_v36, %v7052_v13 }
 0x440   :  { %6429 = vmatmul.mubr.msk.f32.vlgmr.msra.gmra.mrb[14].mxu0 %vm1166_vm6, %v1519_v37 }
 0x441   :  { %6437 = vmatpush3.msra.mxu0 %v894_v38  ;;  %6438 = vmatprep.mubr.msk.f32.mxu0 %vm7176_vm5, %v7175_v48 }
 0x442   :  { %v7062_v40 = vpop.eup %7061  ;;  %6446 = vmatprep.subr.mxu0 %v7175_v48 }
 0x443   :  { %v1520_v43 = vmul.f32 %v7062_v40, %v7054_v17 }
 0x445   :  { %6434 = vmatmul.mubr.msk.f32.vlgmr.msra.gmra.mrb[18].mxu1 %vm1166_vm6, %v1520_v43 }
 0x446   :  { %6442 = vmatpush3.msra.mxu1 %v1158_v44  ;;  %6443 = vmatprep.mubr.msk.f32.mxu1 %vm7176_vm5, %v7175_v48 }
 0x447   :  { %6451 = vmatprep.subr.mxu1 %v7175_v48 }
 0x44a   :  { %v1511_v14 = vpop.xlane.xlu0 %1510 }
 0x44b   :  { %7063 = vrcp.f32 %v1511_v14 }
 0x44f   :  { %v1514_v20 = vpop.xlane.xlu1 %1513 }
 0x450   :  { %7065 = vrcp.f32 %v1514_v20 }
 0x455   :  { %v7064_v45 = vpop.eup %7063 }
 0x456   :  { %v1521_v46 = vmul.f32 %v7064_v45, %v7056_v29 }
 0x458   :  { %6439 = vmatmul.mubr.msk.f32.vlgmr.msra.gmra.mrb[16].mxu0 %vm1166_vm6, %v1521_v46 }
 0x459   :  { %6447 = vmatpush3.xpose.msk.msra.mxu0 %vm1166_vm6, %v7486_v61  ;;  %6448 = vmatprep.mubr.msk.f32.mxu0 %vm7176_vm5, %v7175_v48 }
 0x45a   :  { %v7066_v39 = vpop.eup %7065  ;;  %6456 = vmatprep.subr.mxu0 %v7175_v48 }
 0x45b   :  { %v1522_v42 = vmul.f32 %v7066_v39, %v7058_v31 }
 0x45c   :  { %6449 = vmatmul.mubr.msk.f32.vlgmr.msra.gmra.mrb[18].mxu0 %vm1166_vm6, %v7476_v53 }
 0x45d   :  { %6457 = vmatpush3.xpose.msk.msra.mxu0 %vm1166_vm6, %v7531_v24  ;;  %6444 = vmatmul.mubr.msk.f32.vlgmr.msra.gmra.mrb[20].mxu1 %vm1166_vm6, %v1522_v42 }
 0x45e   :  { %6452 = vmatpush3.xpose.msk.msra.mxu1 %vm1166_vm6, %v7488_v62  ;;  %6458 = vmatprep.mubr.msk.f32.mxu0 %vm7176_vm5, %v7175_v48 }
 0x45f   :  { %6466 = vmatprep.subr.mxu0 %v7175_v48  ;;  %6453 = vmatprep.mubr.msk.f32.mxu1 %vm7176_vm5, %v7175_v48 }
 0x460   :  { %6459 = vmatmul.mubr.msk.f32.vlgmr.msra.gmra.mrb[20].mxu0 %vm1166_vm6, %v7505_v10  ;;  %6461 = vmatprep.subr.mxu1 %v7175_v48 }
 0x461   :  { %6467 = vmatpush3.msra.mxu0 %v7478_v54  ;;  %6454 = vmatmul.mubr.msk.f32.vlgmr.msra.gmra.mrb[22].mxu1 %vm1166_vm6, %v7503_v7 }
 0x462   :  { %6462 = vmatpush3.xpose.msk.msra.mxu1 %vm1166_vm6, %v7533_v27  ;;  %6463 = vmatprep.mubr.msk.f32.mxu1 %vm7176_vm5, %v7175_v48  ;;  %v5730_v27 = vld [vmem:[%s8268_s1 + $0x8] sm:$0xff] }
 0x463   :  { %6471 = vmatprep.subr.mxu1 %v7175_v48  ;;  %6468 = vmatprep.mubr.msk.f32.mxu0 %vm7176_vm5, %v7175_v48 }
 0x464   :  { %6476 = vmatprep.subr.mxu0 %v7175_v48 }
 0x465   :  { %6464 = vmatmul.mubr.msk.f32.vlgmr.msra.gmra.mrb[24].mxu1 %vm1166_vm6, %v7545_v35 }
 0x466   :  { %6472 = vmatpush3.msra.mxu1 %v7518_v16  ;;  %6473 = vmatprep.mubr.msk.f32.mxu1 %vm7176_vm5, %v7175_v48 }
 0x467   :  { %6481 = vmatprep.subr.mxu1 %v7175_v48 }
 0x513   :  { %v7623_v53 = vpop.f32.mrb[14].mxu0 }
 0x514   :  { %v6430_v54 = vpop.f32.mrb[15].mxu0 }
 0x518   :  { %v1665_v61 = vpop.f32.mrb[18].mxu1 }
 0x519   :  { %v6435_v62 = vpop.f32.mrb[19].mxu1 }
 0x52b   :  { %v1738_v7 = vpop.f32.mrb[16].mxu0 }
 0x52c   :  { %v6440_v10 = vpop.f32.mrb[17].mxu0 }
 0x52f   :  { %v1904_v24 = vpop.f32.mrb[18].mxu0 }
 0x530   :  { %v2136_v35 = vmul.f32 0.35355338, %v1904_v24  ;;  %v1811_v47 = vpop.f32.mrb[20].mxu1  ;;  %v6450_v16 = vpop.f32.mrb[19].mxu0  ;;  %v2496_v24 = vld [vmem:[%s8272_s5 + $0x8] sm:$0xff] }
 0x531   :  { %v6445_v49 = vpop.f32.mrb[21].mxu1 }
 0x532   :  { %v2140_v50 = vadd.f32 %v5730_v27, %v2136_v35  ;;  %v2498_v35 = vld [vmem:[%s8272_s5 + $0x18] sm:$0xff] }
 0x533   :  { %v2056_v51 = vpop.f32.mrb[20].mxu0 }
 0x534   :  { %v2138_v52 = vmul.f32 0.35355338, %v2056_v51  ;;  %v1980_v55 = vpop.f32.mrb[22].mxu1  ;;  %v6460_v56 = vpop.f32.mrb[21].mxu0  ;;  %v2144_v57 = vsel %vm1166_vm6, %v2140_v50, -inf }
 0x535   :  { %v2137_v58 = vmul.f32 0.35355338, %v1980_v55  ;;  %v6455_v59 = vpop.f32.mrb[23].mxu1  ;;  %2145 = vmax.xlane.f32.xlu0 %v2144_v57 }
 0x536   :  { %v2142_v60 = vadd.f32 %v5730_v27, %v2138_v52 }
 0x537   :  { %v2141_v63 = vadd.f32 %v5730_v27, %v2137_v58 }
 0x538   :  { %v2132_v0 = vpop.f32.mrb[24].mxu1  ;;  %v2150_v1 = vsel %vm1166_vm6, %v2142_v60, -inf }
 0x539   :  { %v2139_v2 = vmul.f32 0.35355338, %v2132_v0  ;;  %v6465_v3 = vpop.f32.mrb[25].mxu1  ;;  %2151 = vmax.xlane.f32.xlu0 %v2150_v1  ;;  %v2147_v4 = vsel %vm1166_vm6, %v2141_v63, -inf }
 0x53a   :  { %2148 = vmax.xlane.f32.xlu1 %v2147_v4  ;;  %v5851_v3 = vld [vmem:[%s8273_s6] ss:$0 sm:$0xff]  ;;  %v7147_v4 = vld [vmem:[%s8267_s0 + $0x8] sm:$0xff] }
 0x53b   :  { %v2143_v5 = vadd.f32 %v5730_v27, %v2139_v2 }
 0x53d   :  { %v2153_v6 = vsel %vm1166_vm6, %v2143_v5, -inf }
 0x53e   :  { %2154 = vmax.xlane.f32.xlu1 %v2153_v6 }
 0x5c2   :  { %v2146_v8 = vpop.xlane.xlu0 %2145 }
 0x5c3   :  { %v2156_v9 = vsub.f32 %v2140_v50, %v2146_v8  ;;  %v7148_v8 = vld [vmem:[%s8267_s0] sm:$0xff]  ;;  %s7180_s0 = smov [#allocation2]  }
 0x5c4   :  { %s5718_s14 = sshll.u32 %s7180_s0, 4  ;;  %s5719_s14 = int_to_ptr.vmem [resolvable:$true] %s5718_s14 }
 0x5c5   :  { %v2160_v11 = vmul.f32 1.442695, %v2156_v9  ;;  %s7151_s15 = scalar_lea.vmem %s5719_s14, 256  ;;  %p7156_p1 = scmp.lt.s32.totalorder %s5719_s14, %s5719_s14 }
 0x5c6   :  { %v2152_v12 = vpop.xlane.xlu0 %2151  ;;  %p7152_p0 = scmp.ne.s32.totalorder %s5719_s14, %s7151_s15  ;;  %p7157_p2 = scmp.lt.s32.totalorder %s7151_s15, %s7151_s15 }
 0x5c7   :  { %7067 = vpow2.f32 %v2160_v11  ;;  %v2158_v13 = vsub.f32 %v2142_v60, %v2152_v12  ;;  %v2149_v15 = vpop.xlane.xlu1 %2148 }
 0x5c8   :  { %v2157_v17 = vsub.f32 %v2141_v63, %v2149_v15  ;;  %p7158_p3 = por %p7157_p2, %p7156_p1 }
 0x5c9   :  { %v2164_v18 = vmul.f32 1.442695, %v2158_v13 }
 0x5ca   :  { %v2162_v21 = vmul.f32 1.442695, %v2157_v17  ;;  %p7159_p4 = pnand %p7158_p3, %p7152_p0 }
 0x5cb   :  { %7069 = vpow2.f32 %v2164_v18  ;;  %v2155_v22 = vpop.xlane.xlu1 %2154 }
 0x5cc   :  { %7071 = vpow2.f32 %v2162_v21  ;;  %v2159_v23 = vsub.f32 %v2143_v5, %v2155_v22 }
 0x5ce   :  { %v2166_v25 = vmul.f32 1.442695, %v2159_v23 }
 0x5d0   :  { %7073 = vpow2.f32 %v2166_v25 }
 0x5d1   :  { %v7068_v26 = vpop.eup %7067 }
 0x5d2   :  { %v2168_v28 = vsel %vm1166_vm6, %v7068_v26, 0.0 }
 0x5d3   :  { %2169 = vadd.xlane.f32.xlu0 %v2168_v28 }
 0x5d5   :  { %v7070_v29 = vpop.eup %7069 }
 0x5d6   :  { %v7072_v30 = vpop.eup %7071  ;;  %v2174_v31 = vsel %vm1166_vm6, %v7070_v29, 0.0 }
 0x5d7   :  { %2175 = vadd.xlane.f32.xlu0 %v2174_v31  ;;  %v2171_v32 = vsel %vm1166_vm6, %v7072_v30, 0.0  ;;  %v2651_v31 = vld [vmem:[%s8274_s7] sm:$0xff] }
 0x5d8   :  { %2172 = vadd.xlane.f32.xlu1 %v2171_v32  ;;  %v2652_v32 = vld [vmem:[%s8274_s7 + $0x8] sm:$0xff] }
 0x5da   :  { %v7074_v33 = vpop.eup %7073 }
 0x5db   :  { %v2177_v34 = vsel %vm1166_vm6, %v7074_v33, 0.0 }
 0x5dc   :  { %2178 = vadd.xlane.f32.xlu1 %v2177_v34  ;;  %v6884_v34 = vpack.c.bf16 %v2652_v32, %v2651_v31 }
 0x5ed   :  { %1820 = vrot.lane.b32.xlu1 %v1738_v7, %s7177_s16  ;;  %1816 = vrot.lane.b32.xlu0 %v1665_v61, %s7178_s17 }
 0x5f1   :  { %1824 = vrot.lane.b32.xlu1 %v1811_v47, %s7179_s18 }
 0x660   :  { %v2170_v36 = vpop.xlane.xlu0 %2169 }
 0x661   :  { %7075 = vrcp.f32 %v2170_v36  ;;  %v2654_v36 = vld [vmem:[%s8274_s7 + $0x18] sm:$0xff] }
 0x664   :  { %v2176_v37 = vpop.xlane.xlu0 %2175 }
 0x665   :  { %7077 = vrcp.f32 %v2176_v37  ;;  %v2173_v38 = vpop.xlane.xlu1 %2172 }
 0x666   :  { %7079 = vrcp.f32 %v2173_v38  ;;  %v2745_v38 = vld [vmem:[%s8276_s9] sm:$0xff] }
 0x668   :  { %v1817_v14 = vpop.permute.xlu0 %1816 }
 0x669   :  { %v2179_v40 = vpop.xlane.xlu1 %2178  ;;  %v1827_v42 = vsel %vm1166_vm6, %v7623_v53, %v1817_v14  ;;  %v2495_v53 = vld [vmem:[%s8272_s5] sm:$0xff]  ;;  %v2748_v14 = vld [vmem:[%s8276_s9 + $0x18] sm:$0xff] }
 0x66a   :  { %7081 = vrcp.f32 %v2179_v40  ;;  %v6876_v27 = vpack.c.bf16 %v2496_v24, %v2495_v53  ;;  %v2746_v40 = vld [vmem:[%s8276_s9 + $0x8] sm:$0xff] }
 0x66b   :  { %v7076_v43 = vpop.eup %7075 }
 0x66c   :  { %v2184_v44 = vmul.f32 %v7076_v43, %v7068_v26  ;;  %v2747_v43 = vld [vmem:[%s8276_s9 + $0x10] sm:$0xff] }
 0x66d   :  { %v1821_v20 = vpop.permute.xlu1 %1820 }
 0x66e   :  { %6469 = vmatmul.mubr.msk.f32.vlgmr.msra.gmra.mrb[22].mxu0 %vm1166_vm6, %v2184_v44  ;;  %v1829_v61 = vsel %vm1828_vm7, %v1827_v42, %v1821_v20  ;;  %v6892_v44 = vpack.c.bf16 %v2746_v40, %v2745_v38  ;;  %v6896_v20 = vpack.c.bf16 %v2748_v14, %v2747_v43  ;;  %v5867_v40 = vld [vmem:[%s8269_s2 + $0x180] sm:$0xff]  ;;  %v5868_v43 = vld [vmem:[%s8269_s2 + $0x188] sm:$0xff] }
 0x66f   :  { %v7078_v45 = vpop.eup %7077  ;;  %6477 = vmatpush3.msra.mxu0 %v7521_v19  ;;  %6478 = vmatprep.mubr.msk.f32.mxu0 %vm7176_vm5, %v7175_v48  ;;  %v6908_v14 = vpack.c.bf16 %v5868_v43, %v5867_v40  ;;  %v5907_v43 = vld [vmem:[%s8269_s2 + $0x2a0] sm:$0xff] }
 0x670   :  { %v7080_v46 = vpop.eup %7079  ;;  %v2186_v39 = vmul.f32 %v7078_v45, %v7070_v29  ;;  %6877 = vmatprep.subr.bf16.mxu0 %v6876_v27  ;;  %v2749_v45 = vld [vmem:[%s8276_s9 + $0x20] sm:$0xff] }
 0x671   :  { %v2185_v54 = vmul.f32 %v7080_v46, %v7072_v30  ;;  %v1825_v62 = vpop.permute.xlu1 %1824  ;;  %v2750_v46 = vld [vmem:[%s8276_s9 + $0x28] sm:$0xff] }
 0x672   :  { %v1831_v7 = vsel %vm1830_vm8, %v1829_v61, %v1825_v62  ;;  %6479 = vmatmul.mubr.msk.f32.vlgmr.msra.gmra.mrb[24].mxu0 %vm1166_vm6, %v2186_v39  ;;  %v6900_v39 = vpack.c.bf16 %v2750_v46, %v2749_v45  ;;  %v5869_v46 = vld [vmem:[%s8269_s2 + $0x190] sm:$0xff] }
 0x673   :  { %6474 = vmatmul.mubr.msk.f32.vlgmr.msra.gmra.mrb[26].mxu1 %vm1166_vm6, %v2185_v54  ;;  %6494 = vmatprep.mubr.msk.f32.mxu0 %vm48_vm0, %v1831_v7 }
 0x674   :  { %v7082_v19 = vpop.eup %7081  ;;  %6482 = vmatpush3.msra.mxu1 %v7558_v41  ;;  %6483 = vmatprep.mubr.msk.f32.mxu1 %vm7176_vm5, %v7175_v48  ;;  %v2497_v41 = vld [vmem:[%s8272_s5 + $0x10] sm:$0xff] }
 0x675   :  { %v2187_v10 = vmul.f32 %v7082_v19, %v7074_v33  ;;  %6879 = vmatpush3.bf16.msra.mxu0 %v6876_v27  ;;  %v6880_v47 = vpack.c.bf16 %v2498_v35, %v2497_v41  ;;  %v2653_v33 = vld [vmem:[%s8274_s7 + $0x10] sm:$0xff]  ;;  %6885 = vmatprep.subr.bf16.mxu1 %v6884_v34 }
 0x676   :  { %v6888_v37 = vpack.c.bf16 %v2654_v36, %v2653_v33 }
 0x677   :  { %6484 = vmatmul.mubr.msk.f32.vlgmr.msra.gmra.mrb[28].mxu1 %vm1166_vm6, %v2187_v10  ;;  %6881 = vmatprep.subr.bf16.mxu0 %v6880_v47 }
 0x678   :  { %6887 = vmatpush3.bf16.msra.mxu1 %v6884_v34 }
 0x679   :  { %6883 = vmatpush3.bf16.msra.mxu0 %v6880_v47  ;;  %6889 = vmatprep.subr.bf16.mxu1 %v6888_v37 }
 0x67a   :  { %6893 = vmatprep.subr.bf16.mxu0 %v6892_v44 }
 0x67c   :  { %6891 = vmatpush3.bf16.msra.mxu1 %v6888_v37 }
 0x67d   :  { %6909 = vmatprep.subr.bf16.mxu1 %v6908_v14 }
 0x741   :  { %v2257_v16 = vpop.f32.mrb[22].mxu0 }
 0x742   :  { %v6470_v49 = vpop.f32.mrb[23].mxu0 }
 0x745   :  { %v2403_v50 = vpop.f32.mrb[24].mxu0 }
 0x746   :  { %v2330_v51 = vpop.f32.mrb[26].mxu1  ;;  %2485 = vrot.lane.b32.xlu0 %v2403_v50, %s7177_s16  ;;  %v6480_v52 = vpop.f32.mrb[25].mxu0 }
 0x747   :  { %v6475_v55 = vpop.f32.mrb[27].mxu1  ;;  %2481 = vrot.lane.b32.xlu1 %v2330_v51, %s7178_s17  ;;  %v5854_v51 = vld [vmem:[%s8271_s4 + $0x2] ss:$0 sm:$0xff] }
 0x74a   :  { %v2476_v56 = vpop.f32.mrb[28].mxu1 }
 0x74b   :  { %v6485_v57 = vpop.f32.mrb[29].mxu1  ;;  %2489 = vrot.lane.b32.xlu1 %v2476_v56, %s7179_s18  ;;  %v5855_v56 = vld [vmem:[%s8271_s4 + $0x3] ss:$0 sm:$0xff] }
 0x7b8   :  { %v2486_v60 = vpop.permute.xlu0 %2485 }
 0x7b9   :  { %v2482_v58 = vpop.permute.xlu1 %2481 }
 0x7ba   :  { %v2492_v59 = vsel %vm1166_vm6, %v2257_v16, %v2482_v58 }
 0x7bb   :  { %v2493_v0 = vsel %vm1828_vm7, %v2492_v59, %v2486_v60 }
 0x7bd   :  { %v2490_v63 = vpop.permute.xlu1 %2489 }
 0x7be   :  { %v2494_v1 = vsel %vm1830_vm8, %v2493_v0, %v2490_v63 }
 0x7bf   :  { %6495 = vmatmul.mubr.msk.f32.vlgmr.msra.gmra.mrb[26].mxu0 %vm48_vm0, %v2494_v1  ;;  %v2751_v1 = vld [vmem:[%s8276_s9 + $0x30] sm:$0xff] }
 0x7c0   :  { %6895 = vmatpush3.bf16.msra.mxu0 %v6892_v44  ;;  %v5883_v44 = vld [vmem:[%s8269_s2 + $0x280] sm:$0xff] }
 0x7c1   :  { %6897 = vmatprep.subr.bf16.mxu0 %v6896_v20 }
 0x7c4   :  { %6899 = vmatpush3.bf16.msra.mxu0 %v6896_v20  ;;  %v5884_v20 = vld [vmem:[%s8269_s2 + $0x288] sm:$0xff] }
 0x7c5   :  { %6901 = vmatprep.subr.bf16.mxu0 %v6900_v39  ;;  %v6924_v45 = vpack.c.bf16 %v5884_v20, %v5883_v44  ;;  %v5908_v44 = vld [vmem:[%s8269_s2 + $0x2a8] sm:$0xff] }
 0x7c6   :  { %v5932_v20 = vld [vmem:[%s8269_s2 + $0x2c8] sm:$0xff] }
 0x7c8   :  { %6903 = vmatpush3.bf16.msra.mxu0 %v6900_v39  ;;  %v5870_v39 = vld [vmem:[%s8269_s2 + $0x198] sm:$0xff] }
 0x892   :  { %v6496_v2 = vpop.f32.mrb[26].mxu0 }
 0x893   :  { %v2581_v5 = vadd.f32 %v7147_v4, %v6496_v2  ;;  %v2571_v6 = vpop.f32.mrb[27].mxu0  ;;  %v2752_v2 = vld [vmem:[%s8276_s9 + $0x38] sm:$0xff]  ;;  %v5856_v4 = vld [vmem:[%s8275_s8] ss:$0 sm:$0xff] }
 0x894   :  { %v2580_v9 = vadd.f32 %v7148_v8, %v2571_v6 }
 0x895   :  { %v7682_v11 = vadd.f32 %v5851_v3, %v2581_v5 }
 0x896   :  { %v7684_v12 = vadd.f32 %v5851_v3, %v2580_v9  ;;  %v6904_v3 = vpack.c.bf16 %v2752_v2, %v2751_v1  ;;  %v5865_v1 = vld [vmem:[%s8271_s4 + $0x4] ss:$0 sm:$0xff] }
 0x897   :  { %v2598_v13 = vsel %vm48_vm0, %v7682_v11, 0.0 }
 0x898   :  { %2599 = vadd.xlane.f32.xlu1 %v2598_v13  ;;  %v2595_v15 = vsel %vm48_vm0, %v7684_v12, 0.0  ;;  %6905 = vmatprep.subr.bf16.mxu0 %v6904_v3 }
 0x899   :  { %2596 = vadd.xlane.f32.xlu0 %v2595_v15  ;;  %6907 = vmatpush3.bf16.msra.mxu0 %v6904_v3 }
 0x89a   :  { %6925 = vmatprep.subr.bf16.mxu0 %v6924_v45 }
 0x925   :  { %v2600_v17 = vpop.xlane.xlu1 %2599 }
 0x926   :  { %v2602_v18 = vmul.f32 0.03125, %v2600_v17  ;;  %v2597_v21 = vpop.xlane.xlu0 %2596 }
 0x927   :  { %v2601_v22 = vmul.f32 0.03125, %v2597_v21 }
 0x928   :  { %v2604_v23 = vsub.f32 %v7682_v11, %v2602_v18  ;;  %v5862_v18 = vld [vmem:[%s8273_s6 + $0x1] ss:$0 sm:$0xff] }
 0x929   :  { %v2603_v25 = vsub.f32 %v7684_v12, %v2601_v22 }
 0x92a   :  { %v2606_v29 = vmul.f32 %v2604_v23, %v2604_v23  ;;  %v2622_v58 = vmul.f32 %v5854_v51, %v2604_v23 }
 0x92b   :  { %v2605_v26 = vmul.f32 %v2603_v25, %v2603_v25  ;;  %v2621_v52 = vmul.f32 %v5854_v51, %v2603_v25 }
 0x92c   :  { %v2610_v30 = vsel %vm48_vm0, %v2606_v29, 0.0 }
 0x92d   :  { %v2607_v28 = vsel %vm48_vm0, %v2605_v26, 0.0 }
 0x92e   :  { %2608 = vadd.xlane.f32.xlu0 %v2607_v28 }
 0x932   :  { %2611 = vadd.xlane.f32.xlu0 %v2610_v30 }
 0x9bb   :  { %v2609_v42 = vpop.xlane.xlu0 %2608 }
 0x9bc   :  { %v2613_v54 = vmul.f32 0.032258064, %v2609_v42  ;;  %v5885_v42 = vld [vmem:[%s8269_s2 + $0x290] sm:$0xff] }
 0x9be   :  { %7083 = vrsqrt.f32 %v2613_v54  ;;  %vm2625_vm9 = vcmp.eq.f32.partialorder %v2613_v54, inf  ;;  %v2628_v10 = vand.u32 2147483648, %v2613_v54  ;;  %vm2627_vm10 = vcmp.eq.f32.partialorder %v2613_v54, 0.0 }
 0x9bf   :  { %v2612_v61 = vpop.xlane.xlu0 %2611 }
 0x9c0   :  { %v2614_v62 = vmul.f32 0.032258064, %v2612_v61  ;;  %v5886_v61 = vld [vmem:[%s8269_s2 + $0x298] sm:$0xff] }
 0x9c2   :  { %7085 = vrsqrt.f32 %v2614_v62  ;;  %vm2632_vm11 = vcmp.eq.f32.partialorder %v2614_v62, inf  ;;  %v2635_v47 = vand.u32 2147483648, %v2614_v62  ;;  %vm2634_vm12 = vcmp.eq.f32.partialorder %v2614_v62, 0.0 }
 0x9c8   :  { %v7084_v7 = vpop.eup %7083 }
 0x9c9   :  { %v2624_v19 = vmul.f32 %v7084_v7, %v2613_v54  ;;  %v5875_v7 = vld [vmem:[%s8269_s2 + $0x200] sm:$0xff] }
 0x9cb   :  { %v2626_v53 = vsel %vm2625_vm9, %v2613_v54, %v2624_v19  ;;  %v6912_v54 = vpack.c.bf16 %v5870_v39, %v5869_v46  ;;  %v5876_v19 = vld [vmem:[%s8269_s2 + $0x208] sm:$0xff]  ;;  %v5909_v39 = vld [vmem:[%s8269_s2 + $0x2b0] sm:$0xff] }
 0x9cc   :  { %v7086_v24 = vpop.eup %7085  ;;  %v2629_v27 = vsel %vm2627_vm10, %v2628_v10, %v2626_v53  ;;  %v5899_v10 = vld [vmem:[%s8269_s2 + $0x220] sm:$0xff]  ;;  %v6916_v53 = vpack.c.bf16 %v5876_v19, %v5875_v7  ;;  %v5924_v19 = vld [vmem:[%s8269_s2 + $0x248] sm:$0xff] }
 0x9cd   :  { %v2631_v41 = vmul.f32 %v7086_v24, %v2614_v62  ;;  %v2637_v35 = vadd.f32 1e-06, %v2629_v27  ;;  %v5900_v24 = vld [vmem:[%s8269_s2 + $0x228] sm:$0xff]  ;;  %v5923_v7 = vld [vmem:[%s8269_s2 + $0x240] sm:$0xff] }
 0x9ce   :  { %v6940_v27 = vpack.c.bf16 %v5900_v24, %v5899_v10  ;;  %v5948_v24 = vld [vmem:[%s8269_s2 + $0x268] sm:$0xff] }
 0x9cf   :  { %v2633_v16 = vsel %vm2632_vm11, %v2614_v62, %v2631_v41  ;;  %7087 = vrcp.f32 %v2637_v35  ;;  %v6928_v62 = vpack.c.bf16 %v5886_v61, %v5885_v42  ;;  %v5910_v42 = vld [vmem:[%s8269_s2 + $0x2b8] sm:$0xff] }
 0x9d0   :  { %v2636_v49 = vsel %vm2634_vm12, %v2635_v47, %v2633_v16  ;;  %v5934_v61 = vld [vmem:[%s8269_s2 + $0x2d8] sm:$0xff] }
 0x9d1   :  { %v2638_v50 = vadd.f32 1e-06, %v2636_v49 }
 0x9d3   :  { %7089 = vrcp.f32 %v2638_v50 }
 0x9d9   :  { %v7088_v55 = vpop.eup %7087 }
 0x9da   :  { %v2640_v57 = vmul.f32 %v7088_v55, %v2621_v52 }
 0x9dc   :  { %v2649_v59 = vadd.f32 %v5855_v56, %v2640_v57 }
 0x9dd   :  { %v7090_v60 = vpop.eup %7089 }
 0x9de   :  { %v2642_v63 = vmul.f32 %v7090_v60, %v2622_v58  ;;  %6505 = vmatprep.mubr.msk.f32.mxu1 %vm48_vm0, %v2649_v59 }
 0x9e0   :  { %v2650_v0 = vadd.f32 %v5855_v56, %v2642_v63 }
 0x9e2   :  { %6506 = vmatmul.mubr.msk.f32.vlgmr.msra.gmra.mrb[30].mxu1 %vm48_vm0, %v2650_v0 }
 0x9e3   :  { %6911 = vmatpush3.bf16.msra.mxu1 %v6908_v14  ;;  %v5931_v14 = vld [vmem:[%s8269_s2 + $0x2c0] sm:$0xff] }
 0x9e4   :  { %6913 = vmatprep.subr.bf16.mxu1 %v6912_v54  ;;  %v6972_v46 = vpack.c.bf16 %v5932_v20, %v5931_v14  ;;  %v5912_v20 = vld [vmem:[%s8270_s3 + $0x15] ss:$0 sm:$0xff] }
 0x9e7   :  { %6915 = vmatpush3.bf16.msra.mxu1 %v6912_v54  ;;  %v5933_v54 = vld [vmem:[%s8269_s2 + $0x2d0] sm:$0xff] }
 0x9e8   :  { %6917 = vmatprep.subr.bf16.mxu1 %v6916_v53  ;;  %v6976_v10 = vpack.c.bf16 %v5934_v61, %v5933_v54 }
 0xab5   :  { %v6507_v5 = vpop.f32.mrb[30].mxu1 }
 0xab6   :  { %v2740_v6 = vadd.f32 %v6507_v5, %v5856_v4  ;;  %v2734_v8 = vpop.f32.mrb[31].mxu1 }
 0xab7   :  { %v2735_v9 = vadd.f32 %v5856_v4, %v2734_v8 }
 0xab8   :  { %v2744_v15 = vmax.f32 %v2740_v6, 0.0  ;;  %v5866_v6 = vld [vmem:[%s8271_s4 + $0x5] ss:$0 sm:$0xff] }
 0xab9   :  { %v2743_v13 = vmax.f32 %v2735_v9, 0.0 }
 0xabb   :  { %6524 = vmatprep.mubr.msk.f32.mxu0 %vm2753_vm13, %v2743_v13  ;;  %v5877_v13 = vld [vmem:[%s8269_s2 + $0x210] sm:$0xff] }
 0xabc   :  { %6525 = vmatmul.mubr.msk.f32.vlgmr.msra.gmra.mrb[28].mxu0 %vm2753_vm13, %v2744_v15  ;;  %v5878_v15 = vld [vmem:[%s8269_s2 + $0x218] sm:$0xff] }
 0xabd   :  { %6927 = vmatpush3.bf16.msra.mxu0 %v6924_v45  ;;  %v6948_v45 = vpack.c.bf16 %v5908_v44, %v5907_v43 }
 0xabe   :  { %6929 = vmatprep.subr.bf16.mxu0 %v6928_v62 }
 0xac1   :  { %6931 = vmatpush3.bf16.msra.mxu0 %v6928_v62  ;;  %v6952_v62 = vpack.c.bf16 %v5910_v42, %v5909_v39 }
 0xac2   :  { %6941 = vmatprep.subr.bf16.mxu0 %v6940_v27 }
 0xb8f   :  { %v6526_v17 = vpop.f32.mrb[28].mxu0 }
 0xb90   :  { %v2836_v21 = vadd.f32 %v6526_v17, %v7682_v11  ;;  %v2826_v22 = vpop.f32.mrb[29].mxu0  ;;  %v5901_v17 = vld [vmem:[%s8269_s2 + $0x230] sm:$0xff] }
 0xb91   :  { %v2835_v23 = vadd.f32 %v2826_v22, %v7684_v12 }
 0xb92   :  { %v7748_v25 = vadd.f32 %v5862_v18, %v2836_v21 }
 0xb93   :  { %v7750_v26 = vadd.f32 %v5862_v18, %v2835_v23  ;;  %v5902_v18 = vld [vmem:[%s8269_s2 + $0x238] sm:$0xff]  ;;  %v5891_v23 = vld [vmem:[%s8269_s2 + $0x1a0] sm:$0xff] }
 0xb94   :  { %v2854_v28 = vsel %vm48_vm0, %v7748_v25, 0.0 }
 0xb95   :  { %2855 = vadd.xlane.f32.xlu1 %v2854_v28  ;;  %v2851_v29 = vsel %vm48_vm0, %v7750_v26, 0.0  ;;  %v6920_v28 = vpack.c.bf16 %v5878_v15, %v5877_v13 }
 0xb96   :  { %2852 = vadd.xlane.f32.xlu0 %v2851_v29  ;;  %v6944_v29 = vpack.c.bf16 %v5902_v18, %v5901_v17  ;;  %v5880_v18 = vld [vmem:[%s8270_s3 + $0x10] ss:$0 sm:$0xff] }
 0xc22   :  { %v2856_v30 = vpop.xlane.xlu1 %2855 }
 0xc23   :  { %v2858_v31 = vmul.f32 0.03125, %v2856_v30  ;;  %v2853_v32 = vpop.xlane.xlu0 %2852  ;;  %v5892_v30 = vld [vmem:[%s8269_s2 + $0x1a8] sm:$0xff] }
 0xc24   :  { %v2857_v33 = vmul.f32 0.03125, %v2853_v32  ;;  %v5916_v32 = vld [vmem:[%s8269_s2 + $0x1c8] sm:$0xff] }
 0xc25   :  { %v2860_v11 = vsub.f32 %v7748_v25, %v2858_v31  ;;  %v5915_v31 = vld [vmem:[%s8269_s2 + $0x1c0] sm:$0xff] }
 0xc26   :  { %v2859_v12 = vsub.f32 %v7750_v26, %v2857_v33  ;;  %v6932_v33 = vpack.c.bf16 %v5892_v30, %v5891_v23 }
 0xc27   :  { %v2862_v34 = vmul.f32 %v2860_v11, %v2860_v11  ;;  %v2878_v2 = vmul.f32 %v5865_v1, %v2860_v11  ;;  %v6956_v11 = vpack.c.bf16 %v5916_v32, %v5915_v31 }
 0xc28   :  { %v2861_v36 = vmul.f32 %v2859_v12, %v2859_v12  ;;  %v2877_v4 = vmul.f32 %v5865_v1, %v2859_v12  ;;  %v5893_v12 = vld [vmem:[%s8269_s2 + $0x1b0] sm:$0xff] }
 0xc29   :  { %v2866_v37 = vsel %vm48_vm0, %v2862_v34, 0.0  ;;  %v5894_v34 = vld [vmem:[%s8269_s2 + $0x1b8] sm:$0xff]  ;;  %v5957_v1 = vld [vmem:[%s8269_s2 + $0x2f0] sm:$0xff] }
 0xc2a   :  { %2867 = vadd.xlane.f32.xlu1 %v2866_v37  ;;  %v2863_v38 = vsel %vm48_vm0, %v2861_v36, 0.0  ;;  %v5917_v36 = vld [vmem:[%s8269_s2 + $0x1d0] sm:$0xff]  ;;  %v5918_v37 = vld [vmem:[%s8269_s2 + $0x1d8] sm:$0xff] }
 0xc2b   :  { %2864 = vadd.xlane.f32.xlu0 %v2863_v38  ;;  %v6936_v38 = vpack.c.bf16 %v5894_v34, %v5893_v12  ;;  %v6960_v40 = vpack.c.bf16 %v5918_v37, %v5917_v36  ;;  %v5896_v12 = vld [vmem:[%s8270_s3 + $0xd] ss:$0 sm:$0xff]  ;;  %v5920_v34 = vld [vmem:[%s8270_s3 + $0xe] ss:$0 sm:$0xff] }
 0xcb7   :  { %v2868_v41 = vpop.xlane.xlu1 %2867 }
 0xcb8   :  { %v2870_v35 = vmul.f32 0.032258064, %v2868_v41  ;;  %v2865_v47 = vpop.xlane.xlu0 %2864 }
 0xcb9   :  { %v2869_v16 = vmul.f32 0.032258064, %v2865_v47  ;;  %v5926_v47 = vld [vmem:[%s8269_s2 + $0x258] sm:$0xff] }
 0xcba   :  { %7091 = vrsqrt.f32 %v2870_v35  ;;  %vm2888_vm14 = vcmp.eq.f32.partialorder %v2870_v35, inf  ;;  %v2891_v52 = vand.u32 2147483648, %v2870_v35  ;;  %vm2890_vm15 = vcmp.eq.f32.partialorder %v2870_v35, 0.0 }
 0xcbb   :  { %7093 = vrsqrt.f32 %v2869_v16  ;;  %vm2881_vm1 = vcmp.eq.f32.partialorder %v2869_v16, inf  ;;  %v2884_v57 = vand.u32 2147483648, %v2869_v16  ;;  %vm2883_vm2 = vcmp.eq.f32.partialorder %v2869_v16, 0.0 }
 0xcc4   :  { %v7092_v49 = vpop.eup %7091 }
 0xcc5   :  { %v7094_v50 = vpop.eup %7093  ;;  %v2887_v51 = vmul.f32 %v7092_v49, %v2870_v35  ;;  %v5950_v49 = vld [vmem:[%s8269_s2 + $0x278] sm:$0xff] }
 0xcc6   :  { %v2880_v55 = vmul.f32 %v7094_v50, %v2869_v16 }
 0xcc7   :  { %v2889_v56 = vsel %vm2888_vm14, %v2870_v35, %v2887_v51  ;;  %v5925_v35 = vld [vmem:[%s8269_s2 + $0x250] sm:$0xff]  ;;  %v5939_v51 = vld [vmem:[%s8269_s2 + $0x1e0] sm:$0xff] }
 0xcc8   :  { %v2892_v58 = vsel %vm2890_vm15, %v2891_v52, %v2889_v56  ;;  %v2882_v59 = vsel %vm2881_vm1, %v2869_v16, %v2880_v55  ;;  %v5949_v16 = vld [vmem:[%s8269_s2 + $0x270] sm:$0xff]  ;;  %v6968_v50 = vpack.c.bf16 %v5926_v47, %v5925_v35  ;;  %v5940_v52 = vld [vmem:[%s8269_s2 + $0x1e8] sm:$0xff] }
 0xcc9   :  { %v2894_v60 = vadd.f32 1e-06, %v2892_v58  ;;  %v2885_v63 = vsel %vm2883_vm2, %v2884_v57, %v2882_v59  ;;  %v6992_v55 = vpack.c.bf16 %v5950_v49, %v5949_v16  ;;  %v6980_v56 = vpack.c.bf16 %v5940_v52, %v5939_v51  ;;  %v5941_v57 = vld [vmem:[%s8269_s2 + $0x1f0] sm:$0xff]  ;;  %v5942_v58 = vld [vmem:[%s8269_s2 + $0x1f8] sm:$0xff]  ;;  %v5944_v51 = vld [vmem:[%s8270_s3 + $0xf] ss:$0 sm:$0xff] }
 0xcca   :  { %v2893_v0 = vadd.f32 1e-06, %v2885_v63  ;;  %v6984_v59 = vpack.c.bf16 %v5942_v58, %v5941_v57  ;;  %v5956_v63 = vld [vmem:[%s8269_s2 + $0x2e8] sm:$0xff] }
 0xccb   :  { %7095 = vrcp.f32 %v2894_v60  ;;  %v5955_v60 = vld [vmem:[%s8269_s2 + $0x2e0] sm:$0xff] }
 0xccc   :  { %7097 = vrcp.f32 %v2893_v0  ;;  %v6996_v0 = vpack.c.bf16 %v5956_v63, %v5955_v60 }
 0xcd5   :  { %v7096_v3 = vpop.eup %7095 }
 0xcd6   :  { %v7098_v5 = vpop.eup %7097  ;;  %v2898_v8 = vmul.f32 %v7096_v3, %v2878_v2  ;;  %v5958_v2 = vld [vmem:[%s8269_s2 + $0x2f8] sm:$0xff] }
 0xcd7   :  { %v2896_v9 = vmul.f32 %v7098_v5, %v2877_v4  ;;  %v7000_v3 = vpack.c.bf16 %v5958_v2, %v5957_v1  ;;  %v5872_v4 = vld [vmem:[%s8270_s3 + $0xc] ss:$0 sm:$0xff]  ;;  %v5888_v5 = vld [vmem:[%s8270_s3 + $0x14] ss:$0 sm:$0xff] }
 0xcd8   :  { %v7816_v22 = vadd.f32 %v5866_v6, %v2898_v8 }
 0xcd9   :  { %v7814_v21 = vadd.f32 %v5866_v6, %v2896_v9 }
 0xcdb   :  { %6535 = vmatprep.mubr.msk.f32.mxu1 %vm48_vm0, %v7814_v21  ;;  %6557 = vmatprep.mubr.msk.f32.mxu0 %vm48_vm0, %v7814_v21 }
 0xcdc   :  { %6536 = vmatmul.mubr.msk.f32.vlgmr.msra.gmra.mrb[32].mxu1 %vm48_vm0, %v7816_v22  ;;  %6558 = vmatmul.mubr.msk.f32.vlgmr.msra.gmra.mrb[30].mxu0 %vm48_vm0, %v7816_v22 }
 0xcdd   :  { %6919 = vmatpush3.bf16.msra.mxu1 %v6916_v53  ;;  %6943 = vmatpush3.bf16.msra.mxu0 %v6940_v27  ;;  %v5947_v53 = vld [vmem:[%s8269_s2 + $0x260] sm:$0xff]  ;;  %v6964_v27 = vpack.c.bf16 %v5924_v19, %v5923_v7  ;;  %v5928_v7 = vld [vmem:[%s8270_s3 + $0x12] ss:$0 sm:$0xff]  ;;  %v5952_v19 = vld [vmem:[%s8270_s3 + $0x13] ss:$0 sm:$0xff] }
 0xcde   :  { %6546 = vmatprep.mubr.msk.f32.mxu1 %vm48_vm0, %v7814_v21  ;;  %6579 = vmatprep.mubr.msk.f32.mxu0 %vm48_vm0, %v7814_v21  ;;  %v6988_v41 = vpack.c.bf16 %v5948_v24, %v5947_v53 }
 0xcdf   :  { %6921 = vmatprep.subr.bf16.mxu1 %v6920_v28  ;;  %6945 = vmatprep.subr.bf16.mxu0 %v6944_v29 }
 0xce1   :  { %6923 = vmatpush3.bf16.msra.mxu1 %v6920_v28  ;;  %6947 = vmatpush3.bf16.msra.mxu0 %v6944_v29 }
 0xce2   :  { %6933 = vmatprep.subr.bf16.mxu1 %v6932_v33  ;;  %6957 = vmatprep.subr.bf16.mxu0 %v6956_v11 }
 0xce4   :  { %6547 = vmatmul.mubr.msk.f32.vlgmr.msra.gmra.mrb[34].mxu1 %vm48_vm0, %v7816_v22  ;;  %6580 = vmatmul.mubr.msk.f32.vlgmr.msra.gmra.mrb[32].mxu0 %vm48_vm0, %v7816_v22 }
 0xce5   :  { %6935 = vmatpush3.bf16.msra.mxu1 %v6932_v33  ;;  %6568 = vmatprep.mubr.msk.f32.mxu1 %vm48_vm0, %v7814_v21 }
 0xce6   :  { %6959 = vmatpush3.bf16.msra.mxu0 %v6956_v11  ;;  %6601 = vmatprep.mubr.msk.f32.mxu0 %vm48_vm0, %v7814_v21 }
 0xce7   :  { %6937 = vmatprep.subr.bf16.mxu1 %v6936_v38  ;;  %6961 = vmatprep.subr.bf16.mxu0 %v6960_v40 }
 0xce9   :  { %6939 = vmatpush3.bf16.msra.mxu1 %v6936_v38 }
 0xcea   :  { %6963 = vmatpush3.bf16.msra.mxu0 %v6960_v40  ;;  %6949 = vmatprep.subr.bf16.mxu1 %v6948_v45 }
 0xceb   :  { %6973 = vmatprep.subr.bf16.mxu0 %v6972_v46 }
 0xcec   :  { %6569 = vmatmul.mubr.msk.f32.vlgmr.msra.gmra.mrb[36].mxu1 %vm48_vm0, %v7816_v22 }
 0xced   :  { %6602 = vmatmul.mubr.msk.f32.vlgmr.msra.gmra.mrb[34].mxu0 %vm48_vm0, %v7816_v22  ;;  %6951 = vmatpush3.bf16.msra.mxu1 %v6948_v45  ;;  %v8014_v45 = vld [vmem:[%s8270_s3 + $0x16] ss:$0 sm:$0xff] }
 0xcee   :  { %6590 = vmatprep.mubr.msk.f32.mxu1 %vm48_vm0, %v7814_v21  ;;  %6975 = vmatpush3.bf16.msra.mxu0 %v6972_v46 }
 0xcef   :  { %6623 = vmatprep.mubr.msk.f32.mxu0 %vm48_vm0, %v7814_v21  ;;  %6953 = vmatprep.subr.bf16.mxu1 %v6952_v62 }
 0xcf0   :  { %6977 = vmatprep.subr.bf16.mxu0 %v6976_v10 }
 0xcf1   :  { %6955 = vmatpush3.bf16.msra.mxu1 %v6952_v62 }
 0xcf2   :  { %6979 = vmatpush3.bf16.msra.mxu0 %v6976_v10  ;;  %6965 = vmatprep.subr.bf16.mxu1 %v6964_v27 }
 0xcf3   :  { %6989 = vmatprep.subr.bf16.mxu0 %v6988_v41 }
 0xcf4   :  { %6591 = vmatmul.mubr.msk.f32.vlgmr.msra.gmra.mrb[38].mxu1 %vm48_vm0, %v7816_v22 }
 0xcf5   :  { %6624 = vmatmul.mubr.msk.f32.vlgmr.msra.gmra.mrb[36].mxu0 %vm48_vm0, %v7816_v22  ;;  %6967 = vmatpush3.bf16.msra.mxu1 %v6964_v27 }
 0xcf6   :  { %6612 = vmatprep.mubr.msk.f32.mxu1 %vm48_vm0, %v7814_v21  ;;  %6991 = vmatpush3.bf16.msra.mxu0 %v6988_v41 }
 0xcf7   :  { %6645 = vmatprep.mubr.msk.f32.mxu0 %vm48_vm0, %v7814_v21  ;;  %6969 = vmatprep.subr.bf16.mxu1 %v6968_v50 }
 0xcf8   :  { %6993 = vmatprep.subr.bf16.mxu0 %v6992_v55 }
 0xcf9   :  { %6971 = vmatpush3.bf16.msra.mxu1 %v6968_v50 }
 0xcfa   :  { %6995 = vmatpush3.bf16.msra.mxu0 %v6992_v55  ;;  %6981 = vmatprep.subr.bf16.mxu1 %v6980_v56 }
 0xcfb   :  { %6659 = vmatprep.subr.mxu0 %v7175_v48 }
 0xcfc   :  { %6613 = vmatmul.mubr.msk.f32.vlgmr.msra.gmra.mrb[40].mxu1 %vm48_vm0, %v7816_v22 }
 0xcfd   :  { %6646 = vmatmul.mubr.msk.f32.vlgmr.msra.gmra.mrb[38].mxu0 %vm48_vm0, %v7816_v22  ;;  %6983 = vmatpush3.bf16.msra.mxu1 %v6980_v56 }
 0xcfe   :  { %6634 = vmatprep.mubr.msk.f32.mxu1 %vm48_vm0, %v7814_v21  ;;  %6985 = vmatprep.subr.bf16.mxu1 %v6984_v59 }
 0xcff   :  { %6661 = vmatprep.mubr.msk.f32.mxu0 %vm7176_vm5, %v7175_v48 }
 0xd01   :  { %6987 = vmatpush3.bf16.msra.mxu1 %v6984_v59  ;;  %v8052_v59 = vld [vmem:[%s8270_s3 + $0x17] ss:$0 sm:$0xff] }
 0xd02   :  { %6997 = vmatprep.subr.bf16.mxu1 %v6996_v0 }
 0xd04   :  { %6635 = vmatmul.mubr.msk.f32.vlgmr.msra.gmra.mrb[42].mxu1 %vm48_vm0, %v7816_v22 }
 0xd05   :  { %6999 = vmatpush3.bf16.msra.mxu1 %v6996_v0  ;;  %6656 = vmatprep.mubr.msk.f32.mxu1 %vm48_vm0, %v7814_v21  ;;  %v5904_v21 = vld [vmem:[%s8270_s3 + $0x11] ss:$0 sm:$0xff] }
 0xd06   :  { %7001 = vmatprep.subr.bf16.mxu1 %v7000_v3 }
 0xd09   :  { %7003 = vmatpush3.bf16.msra.mxu1 %v7000_v3 }
 0xd0a   :  { %6664 = vmatprep.subr.mxu1 %v7175_v48 }
 0xd0c   :  { %6657 = vmatmul.mubr.msk.f32.vlgmr.msra.gmra.mrb[44].mxu1 %vm48_vm0, %v7816_v22 }
 0xd0d   :  { %6666 = vmatprep.mubr.msk.f32.mxu1 %vm7176_vm5, %v7175_v48 }
 0xdaf   :  { %v6537_v6 = vpop.f32.mrb[32].mxu1  ;;  %v6559_v8 = vpop.f32.mrb[30].mxu0 }
 0xdb0   :  { %v7974_v9 = vadd.f32 %v6537_v6, %v5872_v4  ;;  %v7976_v13 = vadd.f32 %v6559_v8, %v5888_v5  ;;  %v2992_v15 = vpop.f32.mrb[33].mxu1  ;;  %v3168_v17 = vpop.f32.mrb[31].mxu0 }
 0xdb1   :  { %v2993_v11 = vadd.f32 %v5872_v4, %v2992_v15  ;;  %v3169_v50 = vadd.f32 %v5888_v5, %v3168_v17  ;;  %v7149_v4 = vld [vmem:[%s8268_s1] sm:$0xff] }
 0xdb7   :  { %v6548_v22 = vpop.f32.mrb[34].mxu1  ;;  %v6581_v23 = vpop.f32.mrb[32].mxu0 }
 0xdb8   :  { %v7984_v28 = vadd.f32 %v6548_v22, %v5880_v18  ;;  %v7986_v29 = vadd.f32 %v6581_v23, %v5904_v21  ;;  %v3080_v30 = vpop.f32.mrb[35].mxu1  ;;  %v3344_v31 = vpop.f32.mrb[33].mxu0 }
 0xdb9   :  { %v3081_v32 = vadd.f32 %v5880_v18, %v3080_v30  ;;  %v3345_v33 = vadd.f32 %v5904_v21, %v3344_v31 }
 0xdbb   :  { %6660 = vmatpush3.xpose.msk.msra.mxu0 %vm1166_vm6, %v3081_v32  ;;  %6665 = vmatpush3.xpose.msk.msra.mxu1 %vm1166_vm6, %v3345_v33 }
 0xdbc   :  { %6669 = vmatprep.subr.mxu0 %v7175_v48  ;;  %6674 = vmatprep.subr.mxu1 %v7175_v48 }
 0xdbe   :  { %6662 = vmatmul.mubr.msk.f32.vlgmr.msra.gmra.mrb[40].mxu0 %vm1166_vm6, %v2993_v11 }
 0xdbf   :  { %v6570_v36 = vpop.f32.mrb[36].mxu1  ;;  %6671 = vmatprep.mubr.msk.f32.mxu0 %vm7176_vm5, %v7175_v48 }
 0xdc0   :  { %v8001_v37 = vadd.f32 %v6570_v36, %v5896_v12  ;;  %v6603_v38 = vpop.f32.mrb[34].mxu0  ;;  %v3256_v40 = vpop.f32.mrb[37].mxu1 }
 0xdc1   :  { %v8003_v43 = vadd.f32 %v6603_v38, %v5920_v34  ;;  %v3257_v44 = vadd.f32 %v5896_v12, %v3256_v40  ;;  %v3520_v14 = vpop.f32.mrb[35].mxu0 }
 0xdc2   :  { %v3521_v49 = vadd.f32 %v5920_v34, %v3520_v14 }
 0xdc3   :  { %6667 = vmatmul.mubr.msk.f32.vlgmr.msra.gmra.mrb[46].mxu1 %vm1166_vm6, %v3257_v44 }
 0xdc4   :  { %6676 = vmatprep.mubr.msk.f32.mxu1 %vm7176_vm5, %v7175_v48 }
 0xdc7   :  { %v6592_v46 = vpop.f32.mrb[38].mxu1 }
 0xdc8   :  { %v8016_v39 = vadd.f32 %v6592_v46, %v5912_v20  ;;  %v6625_v42 = vpop.f32.mrb[36].mxu0  ;;  %v3432_v54 = vpop.f32.mrb[39].mxu1 }
 0xdc9   :  { %v8019_v61 = vadd.f32 %v6625_v42, %v8014_v45  ;;  %v8021_v62 = vpop.f32.mrb[37].mxu0  ;;  %v3433_v58 = vadd.f32 %v5912_v20, %v3432_v54 }
 0xdcf   :  { %v6614_v10 = vpop.f32.mrb[40].mxu1 }
 0xdd0   :  { %v8029_v53 = vadd.f32 %v6614_v10, %v5928_v7  ;;  %v6647_v24 = vpop.f32.mrb[38].mxu0  ;;  %v3608_v27 = vpop.f32.mrb[41].mxu1 }
 0xdd1   :  { %v8031_v41 = vadd.f32 %v6647_v24, %v5952_v19  ;;  %v3609_v35 = vadd.f32 %v5928_v7, %v3608_v27  ;;  %v3872_v47 = vpop.f32.mrb[39].mxu0 }
 0xdd2   :  { %v3873_v16 = vadd.f32 %v5952_v19, %v3872_v47 }
 0xdd3   :  { %6670 = vmatpush3.xpose.msk.msra.mxu0 %vm1166_vm6, %v3609_v35 }
 0xdd4   :  { %6675 = vmatpush3.xpose.msk.msra.mxu1 %vm1166_vm6, %v3873_v16  ;;  %6679 = vmatprep.subr.mxu0 %v7175_v48 }
 0xdd5   :  { %6684 = vmatprep.subr.mxu1 %v7175_v48 }
 0xdd6   :  { %6672 = vmatmul.mubr.msk.f32.vlgmr.msra.gmra.mrb[42].mxu0 %vm1166_vm6, %v3521_v49 }
 0xdd7   :  { %v6636_v52 = vpop.f32.mrb[42].mxu1  ;;  %6680 = vmatpush3.msra.mxu0 %v3169_v50  ;;  %6681 = vmatprep.mubr.msk.f32.mxu0 %vm7176_vm5, %v7175_v48 }
 0xdd8   :  { %v8043_v55 = vadd.f32 %v6636_v52, %v5944_v51  ;;  %v3784_v56 = vpop.f32.mrb[43].mxu1  ;;  %6689 = vmatprep.subr.mxu0 %v7175_v48 }
 0xdd9   :  { %v3785_v57 = vadd.f32 %v5944_v51, %v3784_v56 }
 0xddb   :  { %6677 = vmatmul.mubr.msk.f32.vlgmr.msra.gmra.mrb[48].mxu1 %vm1166_vm6, %v3785_v57 }
 0xddc   :  { %6685 = vmatpush3.msra.mxu1 %v3433_v58  ;;  %6686 = vmatprep.mubr.msk.f32.mxu1 %vm7176_vm5, %v7175_v48 }
 0xddd   :  { %6694 = vmatprep.subr.mxu1 %v7175_v48 }
 0xddf   :  { %v6658_v60 = vpop.f32.mrb[44].mxu1 }
 0xde0   :  { %v8056_v63 = vadd.f32 %v6658_v60, %v8052_v59  ;;  %v8058_v0 = vpop.f32.mrb[45].mxu1 }
 0xe91   :  { %v4041_v1 = vpop.f32.mrb[40].mxu0 }
 0xe92   :  { %v4273_v2 = vmul.f32 0.35355338, %v4041_v1  ;;  %v6663_v3 = vpop.f32.mrb[41].mxu0  ;;  %v3697_v1 = vadd.f32 %v8014_v45, %v8021_v62 }
 0xe94   :  { %v4277_v5 = vadd.f32 %v7149_v4, %v4273_v2 }
 0xe96   :  { %v4117_v6 = vpop.f32.mrb[46].mxu1  ;;  %v4281_v8 = vsel %vm1166_vm6, %v4277_v5, -inf }
 0xe97   :  { %v4274_v15 = vmul.f32 0.35355338, %v4117_v6  ;;  %v6668_v17 = vpop.f32.mrb[47].mxu1  ;;  %4282 = vmax.xlane.f32.xlu0 %v4281_v8 }
 0xe99   :  { %v4278_v18 = vadd.f32 %v7149_v4, %v4274_v15 }
 0xe9b   :  { %v4284_v21 = vsel %vm1166_vm6, %v4278_v18, -inf }
 0xe9c   :  { %4285 = vmax.xlane.f32.xlu1 %v4284_v21 }
 0xea9   :  { %v4193_v22 = vpop.f32.mrb[42].mxu0 }
 0xeaa   :  { %v4275_v23 = vmul.f32 0.35355338, %v4193_v22  ;;  %v6673_v30 = vpop.f32.mrb[43].mxu0 }
 0xeac   :  { %v4279_v31 = vadd.f32 %v7149_v4, %v4275_v23 }
 0xeae   :  { %v4269_v32 = vpop.f32.mrb[48].mxu1  ;;  %v4287_v33 = vsel %vm1166_vm6, %v4279_v31, -inf }
 0xeaf   :  { %v4276_v11 = vmul.f32 0.35355338, %v4269_v32  ;;  %v6678_v12 = vpop.f32.mrb[49].mxu1  ;;  %4288 = vmax.xlane.f32.xlu0 %v4287_v33 }
 0xeb1   :  { %v4280_v34 = vadd.f32 %v7149_v4, %v4276_v11  ;;  %v3961_v4 = vadd.f32 %v8052_v59, %v8058_v0 }
 0xeb3   :  { %v4290_v36 = vsel %vm1166_vm6, %v4280_v34, -inf }
 0xeb4   :  { %4291 = vmax.xlane.f32.xlu1 %v4290_v36 }
 0xf24   :  { %v4283_v38 = vpop.xlane.xlu0 %4282 }
 0xf25   :  { %v4293_v40 = vsub.f32 %v4277_v5, %v4283_v38 }
 0xf27   :  { %v4297_v44 = vmul.f32 1.442695, %v4293_v40 }
 0xf29   :  { %7099 = vpow2.f32 %v4297_v44  ;;  %v4286_v14 = vpop.xlane.xlu1 %4285 }
 0xf2a   :  { %v4294_v20 = vsub.f32 %v4278_v18, %v4286_v14 }
 0xf2c   :  { %v4299_v46 = vmul.f32 1.442695, %v4294_v20 }
 0xf2e   :  { %7101 = vpow2.f32 %v4299_v46 }
 0xf33   :  { %v7100_v42 = vpop.eup %7099 }
 0xf34   :  { %v4305_v54 = vsel %vm1166_vm6, %v7100_v42, 0.0 }
 0xf35   :  { %4306 = vadd.xlane.f32.xlu0 %v4305_v54 }
 0xf38   :  { %v7102_v7 = vpop.eup %7101 }
 0xf39   :  { %v4308_v19 = vsel %vm1166_vm6, %v7102_v7, 0.0 }
 0xf3a   :  { %4309 = vadd.xlane.f32.xlu1 %v4308_v19 }
 0xf3c   :  { %v4289_v10 = vpop.xlane.xlu0 %4288 }
 0xf3d   :  { %v4295_v24 = vsub.f32 %v4279_v31, %v4289_v10 }
 0xf3f   :  { %v4301_v27 = vmul.f32 1.442695, %v4295_v24 }
 0xf41   :  { %7103 = vpow2.f32 %v4301_v27  ;;  %v4292_v35 = vpop.xlane.xlu1 %4291 }
 0xf42   :  { %v4296_v47 = vsub.f32 %v4280_v34, %v4292_v35 }
 0xf44   :  { %v4303_v16 = vmul.f32 1.442695, %v4296_v47 }
 0xf46   :  { %7105 = vpow2.f32 %v4303_v16 }
 0xf4b   :  { %v7104_v49 = vpop.eup %7103 }
 0xf4c   :  { %v4311_v50 = vsel %vm1166_vm6, %v7104_v49, 0.0 }
 0xf4d   :  { %4312 = vadd.xlane.f32.xlu0 %v4311_v50 }
 0xf50   :  { %v7106_v51 = vpop.eup %7105 }
 0xf51   :  { %v4314_v52 = vsel %vm1166_vm6, %v7106_v51, 0.0 }
 0xf52   :  { %4315 = vadd.xlane.f32.xlu1 %v4314_v52 }
 0xfc2   :  { %v4307_v56 = vpop.xlane.xlu0 %4306 }
 0xfc3   :  { %7107 = vrcp.f32 %v4307_v56 }
 0xfc7   :  { %v4310_v57 = vpop.xlane.xlu1 %4309 }
 0xfc8   :  { %7109 = vrcp.f32 %v4310_v57 }
 0xfcd   :  { %v7108_v58 = vpop.eup %7107 }
 0xfce   :  { %v4321_v60 = vmul.f32 %v7108_v58, %v7100_v42 }
 0xfd0   :  { %6682 = vmatmul.mubr.msk.f32.vlgmr.msra.gmra.mrb[44].mxu0 %vm1166_vm6, %v4321_v60 }
 0xfd1   :  { %6690 = vmatpush3.msra.mxu0 %v3697_v1  ;;  %6691 = vmatprep.mubr.msk.f32.mxu0 %vm7176_vm5, %v7175_v48 }
 0xfd2   :  { %v7110_v2 = vpop.eup %7109  ;;  %6699 = vmatprep.subr.mxu0 %v7175_v48 }
 0xfd3   :  { %v4322_v3 = vmul.f32 %v7110_v2, %v7102_v7 }
 0xfd5   :  { %6687 = vmatmul.mubr.msk.f32.vlgmr.msra.gmra.mrb[50].mxu1 %vm1166_vm6, %v4322_v3 }
 0xfd6   :  { %6695 = vmatpush3.msra.mxu1 %v3961_v4  ;;  %6696 = vmatprep.mubr.msk.f32.mxu1 %vm7176_vm5, %v7175_v48 }
 0xfd7   :  { %6704 = vmatprep.subr.mxu1 %v7175_v48 }
 0xfda   :  { %v4313_v45 = vpop.xlane.xlu0 %4312 }
 0xfdb   :  { %7111 = vrcp.f32 %v4313_v45 }
 0xfdf   :  { %v4316_v62 = vpop.xlane.xlu1 %4315 }
 0xfe0   :  { %7113 = vrcp.f32 %v4316_v62 }
 0xfe5   :  { %v7112_v5 = vpop.eup %7111 }
 0xfe6   :  { %v4323_v6 = vmul.f32 %v7112_v5, %v7104_v49 }
 0xfe8   :  { %6692 = vmatmul.mubr.msk.f32.vlgmr.msra.gmra.mrb[46].mxu0 %vm1166_vm6, %v4323_v6 }
 0xfe9   :  { %6700 = vmatpush3.xpose.msk.msra.mxu0 %vm1166_vm6, %v7984_v28  ;;  %6701 = vmatprep.mubr.msk.f32.mxu0 %vm7176_vm5, %v7175_v48 }
 0xfea   :  { %v7114_v59 = vpop.eup %7113  ;;  %6709 = vmatprep.subr.mxu0 %v7175_v48 }
 0xfeb   :  { %v4324_v0 = vmul.f32 %v7114_v59, %v7106_v51 }
 0xfec   :  { %6702 = vmatmul.mubr.msk.f32.vlgmr.msra.gmra.mrb[48].mxu0 %vm1166_vm6, %v7974_v9 }
 0xfed   :  { %6710 = vmatpush3.xpose.msk.msra.mxu0 %vm1166_vm6, %v8029_v53  ;;  %6697 = vmatmul.mubr.msk.f32.vlgmr.msra.gmra.mrb[52].mxu1 %vm1166_vm6, %v4324_v0 }
 0xfee   :  { %6705 = vmatpush3.xpose.msk.msra.mxu1 %vm1166_vm6, %v7986_v29  ;;  %6711 = vmatprep.mubr.msk.f32.mxu0 %vm7176_vm5, %v7175_v48 }
 0xfef   :  { %6719 = vmatprep.subr.mxu0 %v7175_v48  ;;  %6706 = vmatprep.mubr.msk.f32.mxu1 %vm7176_vm5, %v7175_v48 }
 0xff0   :  { %6712 = vmatmul.mubr.msk.f32.vlgmr.msra.gmra.mrb[50].mxu0 %vm1166_vm6, %v8003_v43  ;;  %6714 = vmatprep.subr.mxu1 %v7175_v48 }
 0xff1   :  { %6720 = vmatpush3.msra.mxu0 %v7976_v13  ;;  %6707 = vmatmul.mubr.msk.f32.vlgmr.msra.gmra.mrb[54].mxu1 %vm1166_vm6, %v8001_v37 }
 0xff2   :  { %6715 = vmatpush3.xpose.msk.msra.mxu1 %vm1166_vm6, %v8031_v41  ;;  %6716 = vmatprep.mubr.msk.f32.mxu1 %vm7176_vm5, %v7175_v48 }
 0xff3   :  { %6724 = vmatprep.subr.mxu1 %v7175_v48  ;;  %6721 = vmatprep.mubr.msk.f32.mxu0 %vm7176_vm5, %v7175_v48 }
 0xff4   :  { %6729 = vmatprep.subr.mxu0 %v7175_v48 }
 0xff5   :  { %6717 = vmatmul.mubr.msk.f32.vlgmr.msra.gmra.mrb[56].mxu1 %vm1166_vm6, %v8043_v55 }
 0xff6   :  { %6725 = vmatpush3.msra.mxu1 %v8016_v39  ;;  %6726 = vmatprep.mubr.msk.f32.mxu1 %vm7176_vm5, %v7175_v48  ;;  %v7150_v39 = vld [vmem:[%s8268_s1 + $0x8] sm:$0xff] }
 0xff7   :  { %6734 = vmatprep.subr.mxu1 %v7175_v48 }
0x10a3   :  { %v8121_v9 = vpop.f32.mrb[44].mxu0 }
0x10a4   :  { %v6683_v13 = vpop.f32.mrb[45].mxu0 }
0x10a8   :  { %v4467_v28 = vpop.f32.mrb[50].mxu1 }
0x10a9   :  { %v6688_v29 = vpop.f32.mrb[51].mxu1 }
0x10bb   :  { %v4540_v37 = vpop.f32.mrb[46].mxu0 }
0x10bc   :  { %v6693_v43 = vpop.f32.mrb[47].mxu0 }
0x10bf   :  { %v4704_v53 = vpop.f32.mrb[48].mxu0 }
0x10c0   :  { %v4936_v41 = vmul.f32 0.35355338, %v4704_v53  ;;  %v4613_v8 = vpop.f32.mrb[52].mxu1  ;;  %v6703_v15 = vpop.f32.mrb[49].mxu0 }
0x10c1   :  { %v6698_v17 = vpop.f32.mrb[53].mxu1 }
0x10c2   :  { %v4940_v55 = vadd.f32 %v7150_v39, %v4936_v41 }
0x10c3   :  { %v4856_v18 = vpop.f32.mrb[50].mxu0 }
0x10c4   :  { %v4938_v21 = vmul.f32 0.35355338, %v4856_v18  ;;  %v4780_v22 = vpop.f32.mrb[54].mxu1  ;;  %v6713_v23 = vpop.f32.mrb[51].mxu0  ;;  %v4944_v30 = vsel %vm1166_vm6, %v4940_v55, -inf }
0x10c5   :  { %v4937_v31 = vmul.f32 0.35355338, %v4780_v22  ;;  %v6708_v32 = vpop.f32.mrb[55].mxu1  ;;  %4945 = vmax.xlane.f32.xlu0 %v4944_v30 }
0x10c6   :  { %v4942_v33 = vadd.f32 %v7150_v39, %v4938_v21 }
0x10c7   :  { %v4941_v11 = vadd.f32 %v7150_v39, %v4937_v31 }
0x10c8   :  { %v4932_v12 = vpop.f32.mrb[56].mxu1  ;;  %v4950_v34 = vsel %vm1166_vm6, %v4942_v33, -inf }
0x10c9   :  { %v4939_v36 = vmul.f32 0.35355338, %v4932_v12  ;;  %v6718_v38 = vpop.f32.mrb[57].mxu1  ;;  %4951 = vmax.xlane.f32.xlu0 %v4950_v34  ;;  %v4947_v40 = vsel %vm1166_vm6, %v4941_v11, -inf }
0x10ca   :  { %4948 = vmax.xlane.f32.xlu1 %v4947_v40  ;;  %v5994_v40 = vld [vmem:[%s8273_s6 + $0x2] ss:$0 sm:$0xff] }
0x10cb   :  { %v4943_v44 = vadd.f32 %v7150_v39, %v4939_v36 }
0x10cd   :  { %v4953_v14 = vsel %vm1166_vm6, %v4943_v44, -inf }
0x10ce   :  { %4954 = vmax.xlane.f32.xlu1 %v4953_v14 }
0x1152   :  { %v4946_v20 = vpop.xlane.xlu0 %4945 }
0x1153   :  { %v4956_v46 = vsub.f32 %v4940_v55, %v4946_v20 }
0x1155   :  { %v4960_v42 = vmul.f32 1.442695, %v4956_v46 }
0x1156   :  { %v4952_v54 = vpop.xlane.xlu0 %4951 }
0x1157   :  { %7115 = vpow2.f32 %v4960_v42  ;;  %v4958_v7 = vsub.f32 %v4942_v33, %v4952_v54  ;;  %v4949_v19 = vpop.xlane.xlu1 %4948 }
0x1158   :  { %v4957_v10 = vsub.f32 %v4941_v11, %v4949_v19 }
0x1159   :  { %v4964_v24 = vmul.f32 1.442695, %v4958_v7 }
0x115a   :  { %v4962_v27 = vmul.f32 1.442695, %v4957_v10 }
0x115b   :  { %7117 = vpow2.f32 %v4964_v24  ;;  %v4955_v35 = vpop.xlane.xlu1 %4954 }
0x115c   :  { %7119 = vpow2.f32 %v4962_v27  ;;  %v4959_v47 = vsub.f32 %v4943_v44, %v4955_v35 }
0x115e   :  { %v4966_v16 = vmul.f32 1.442695, %v4959_v47 }
0x1160   :  { %7121 = vpow2.f32 %v4966_v16 }
0x1161   :  { %v7116_v49 = vpop.eup %7115 }
0x1162   :  { %v4968_v50 = vsel %vm1166_vm6, %v7116_v49, 0.0 }
0x1163   :  { %4969 = vadd.xlane.f32.xlu0 %v4968_v50  ;;  %v5999_v50 = vld [vmem:[%s8274_s7 + $0x20] sm:$0xff] }
0x1165   :  { %v7118_v51 = vpop.eup %7117 }
0x1166   :  { %v7120_v52 = vpop.eup %7119  ;;  %v4974_v56 = vsel %vm1166_vm6, %v7118_v51, 0.0 }
0x1167   :  { %4975 = vadd.xlane.f32.xlu0 %v4974_v56  ;;  %v4971_v57 = vsel %vm1166_vm6, %v7120_v52, 0.0 }
0x1168   :  { %4972 = vadd.xlane.f32.xlu1 %v4971_v57  ;;  %v6002_v57 = vld [vmem:[%s8274_s7 + $0x38] sm:$0xff] }
0x116a   :  { %v7122_v58 = vpop.eup %7121 }
0x116b   :  { %v4977_v60 = vsel %vm1166_vm6, %v7122_v58, 0.0 }
0x116c   :  { %4978 = vadd.xlane.f32.xlu1 %v4977_v60  ;;  %v6007_v60 = vld [vmem:[%s8276_s9 + $0x40] sm:$0xff] }
0x117d   :  { %4622 = vrot.lane.b32.xlu1 %v4540_v37, %s7177_s16  ;;  %4618 = vrot.lane.b32.xlu0 %v4467_v28, %s7178_s17 }
0x1181   :  { %4626 = vrot.lane.b32.xlu1 %v4613_v8, %s7179_s18  ;;  %v5988_v8 = vld [vmem:[%s8272_s5 + $0x28] sm:$0xff] }
0x11f0   :  { %v4970_v1 = vpop.xlane.xlu0 %4969 }
0x11f1   :  { %7123 = vrcp.f32 %v4970_v1  ;;  %v6008_v1 = vld [vmem:[%s8276_s9 + $0x48] sm:$0xff] }
0x11f4   :  { %v4976_v2 = vpop.xlane.xlu0 %4975 }
0x11f5   :  { %7125 = vrcp.f32 %v4976_v2  ;;  %v4973_v3 = vpop.xlane.xlu1 %4972  ;;  %v6009_v2 = vld [vmem:[%s8276_s9 + $0x50] sm:$0xff] }
0x11f6   :  { %7127 = vrcp.f32 %v4973_v3  ;;  %v7020_v3 = vpack.c.bf16 %v6008_v1, %v6007_v60 }
0x11f8   :  { %v4619_v5 = vpop.permute.xlu0 %4618 }
0x11f9   :  { %v4979_v4 = vpop.xlane.xlu1 %4978  ;;  %v4629_v28 = vsel %vm1166_vm6, %v8121_v9, %v4619_v5  ;;  %v5987_v9 = vld [vmem:[%s8272_s5 + $0x20] sm:$0xff]  ;;  %v6012_v5 = vld [vmem:[%s8276_s9 + $0x68] sm:$0xff] }
0x11fa   :  { %7129 = vrcp.f32 %v4979_v4  ;;  %v7004_v15 = vpack.c.bf16 %v5988_v8, %v5987_v9  ;;  %v6010_v4 = vld [vmem:[%s8276_s9 + $0x58] sm:$0xff] }
0x11fb   :  { %v7124_v45 = vpop.eup %7123 }
0x11fc   :  { %v4984_v62 = vmul.f32 %v7124_v45, %v7116_v49  ;;  %v7024_v45 = vpack.c.bf16 %v6010_v4, %v6009_v2 }
0x11fd   :  { %v4623_v6 = vpop.permute.xlu1 %4622 }
0x11fe   :  { %6722 = vmatmul.mubr.msk.f32.vlgmr.msra.gmra.mrb[52].mxu0 %vm1166_vm6, %v4984_v62  ;;  %v4630_v37 = vsel %vm1828_vm7, %v4629_v28, %v4623_v6  ;;  %v6011_v62 = vld [vmem:[%s8276_s9 + $0x60] sm:$0xff] }
0x11ff   :  { %v7126_v59 = vpop.eup %7125  ;;  %6730 = vmatpush3.msra.mxu0 %v8019_v61  ;;  %6731 = vmatprep.mubr.msk.f32.mxu0 %vm7176_vm5, %v7175_v48  ;;  %v7028_v6 = vpack.c.bf16 %v6012_v5, %v6011_v62 }
0x1200   :  { %v7128_v0 = vpop.eup %7127  ;;  %v4986_v13 = vmul.f32 %v7126_v59, %v7118_v51  ;;  %7005 = vmatprep.subr.bf16.mxu0 %v7004_v15  ;;  %v6000_v51 = vld [vmem:[%s8274_s7 + $0x28] sm:$0xff] }
0x1201   :  { %v4985_v29 = vmul.f32 %v7128_v0, %v7120_v52  ;;  %v4627_v43 = vpop.permute.xlu1 %4626  ;;  %v6001_v52 = vld [vmem:[%s8274_s7 + $0x30] sm:$0xff]  ;;  %v7012_v56 = vpack.c.bf16 %v6000_v51, %v5999_v50 }
0x1202   :  { %v4631_v53 = vsel %vm1830_vm8, %v4630_v37, %v4627_v43  ;;  %6732 = vmatmul.mubr.msk.f32.vlgmr.msra.gmra.mrb[54].mxu0 %vm1166_vm6, %v4986_v13 }
0x1203   :  { %6727 = vmatmul.mubr.msk.f32.vlgmr.msra.gmra.mrb[58].mxu1 %vm1166_vm6, %v4985_v29  ;;  %6747 = vmatprep.mubr.msk.f32.mxu0 %vm48_vm0, %v4631_v53 }
0x1204   :  { %v7130_v61 = vpop.eup %7129  ;;  %6735 = vmatpush3.msra.mxu1 %v8056_v63  ;;  %6736 = vmatprep.mubr.msk.f32.mxu1 %vm7176_vm5, %v7175_v48  ;;  %v5989_v63 = vld [vmem:[%s8272_s5 + $0x30] sm:$0xff]  ;;  %v5990_v48 = vld [vmem:[%s8272_s5 + $0x38] sm:$0xff] }
0x1205   :  { %v4987_v41 = vmul.f32 %v7130_v61, %v7122_v58  ;;  %7007 = vmatpush3.bf16.msra.mxu0 %v7004_v15  ;;  %v7008_v17 = vpack.c.bf16 %v5990_v48, %v5989_v63  ;;  %v7016_v58 = vpack.c.bf16 %v6002_v57, %v6001_v52  ;;  %7013 = vmatprep.subr.bf16.mxu1 %v7012_v56 }
0x1207   :  { %6737 = vmatmul.mubr.msk.f32.vlgmr.msra.gmra.mrb[60].mxu1 %vm1166_vm6, %v4987_v41  ;;  %7009 = vmatprep.subr.bf16.mxu0 %v7008_v17 }
0x1208   :  { %7015 = vmatpush3.bf16.msra.mxu1 %v7012_v56 }
0x1209   :  { %7011 = vmatpush3.bf16.msra.mxu0 %v7008_v17  ;;  %7017 = vmatprep.subr.bf16.mxu1 %v7016_v58 }
0x120a   :  { %7021 = vmatprep.subr.bf16.mxu0 %v7020_v3 }
0x120c   :  { %7019 = vmatpush3.bf16.msra.mxu1 %v7016_v58 }
0x12d1   :  { %v5057_v39 = vpop.f32.mrb[52].mxu0 }
0x12d2   :  { %v6723_v55 = vpop.f32.mrb[53].mxu0 }
0x12d5   :  { %v5203_v18 = vpop.f32.mrb[54].mxu0 }
0x12d6   :  { %v5130_v21 = vpop.f32.mrb[58].mxu1  ;;  %5285 = vrot.lane.b32.xlu0 %v5203_v18, %s7177_s16  ;;  %v6733_v22 = vpop.f32.mrb[55].mxu0 }
0x12d7   :  { %v6728_v23 = vpop.f32.mrb[59].mxu1  ;;  %5281 = vrot.lane.b32.xlu1 %v5130_v21, %s7178_s17  ;;  %v5998_v21 = vld [vmem:[%s8271_s4 + $0x7] ss:$0 sm:$0xff] }
0x12da   :  { %v5276_v30 = vpop.f32.mrb[60].mxu1 }
0x12db   :  { %v6738_v31 = vpop.f32.mrb[61].mxu1  ;;  %5289 = vrot.lane.b32.xlu1 %v5276_v30, %s7179_s18 }
0x1348   :  { %v5286_v11 = vpop.permute.xlu0 %5285 }
0x1349   :  { %v5282_v32 = vpop.permute.xlu1 %5281 }
0x134a   :  { %v5292_v33 = vsel %vm1166_vm6, %v5057_v39, %v5282_v32  ;;  %v5997_v39 = vld [vmem:[%s8271_s4 + $0x6] ss:$0 sm:$0xff] }
0x134b   :  { %v5293_v34 = vsel %vm1828_vm7, %v5292_v33, %v5286_v11  ;;  %v6013_v11 = vld [vmem:[%s8276_s9 + $0x70] sm:$0xff] }
0x134d   :  { %v5290_v12 = vpop.permute.xlu1 %5289 }
0x134e   :  { %v5294_v36 = vsel %vm1830_vm8, %v5293_v34, %v5290_v12  ;;  %v6014_v12 = vld [vmem:[%s8276_s9 + $0x78] sm:$0xff] }
0x134f   :  { %6748 = vmatmul.mubr.msk.f32.vlgmr.msra.gmra.mrb[56].mxu0 %vm48_vm0, %v5294_v36  ;;  %v7032_v34 = vpack.c.bf16 %v6014_v12, %v6013_v11  ;;  %v6004_v36 = vld [vmem:[%s8275_s8 + $0x1] ss:$0 sm:$0xff] }
0x1350   :  { %7023 = vmatpush3.bf16.msra.mxu0 %v7020_v3 }
0x1351   :  { %7025 = vmatprep.subr.bf16.mxu0 %v7024_v45 }
0x1354   :  { %7027 = vmatpush3.bf16.msra.mxu0 %v7024_v45 }
0x1355   :  { %7029 = vmatprep.subr.bf16.mxu0 %v7028_v6 }
0x1358   :  { %7031 = vmatpush3.bf16.msra.mxu0 %v7028_v6 }
0x1359   :  { %7033 = vmatprep.subr.bf16.mxu0 %v7032_v34 }
0x135c   :  { %7035 = vmatpush3.bf16.msra.mxu0 %v7032_v34 }
0x1422   :  { %v6749_v38 = vpop.f32.mrb[56].mxu0 }
0x1423   :  { %v5382_v44 = vadd.f32 %v6749_v38, %v7748_v25  ;;  %v5372_v14 = vpop.f32.mrb[57].mxu0 }
0x1424   :  { %v5381_v20 = vadd.f32 %v5372_v14, %v7750_v26 }
0x1425   :  { %v8176_v46 = vadd.f32 %v5994_v40, %v5382_v44 }
0x1426   :  { %v8178_v42 = vadd.f32 %v5994_v40, %v5381_v20 }
0x1427   :  { %v5400_v54 = vsel %vm48_vm0, %v8176_v46, 0.0 }
0x1428   :  { %5401 = vadd.xlane.f32.xlu1 %v5400_v54  ;;  %v5397_v7 = vsel %vm48_vm0, %v8178_v42, 0.0 }
0x1429   :  { %5398 = vadd.xlane.f32.xlu0 %v5397_v7 }
0x14b5   :  { %v5402_v19 = vpop.xlane.xlu1 %5401 }
0x14b6   :  { %v5404_v10 = vmul.f32 0.03125, %v5402_v19  ;;  %v5399_v24 = vpop.xlane.xlu0 %5398  ;;  %v6018_v19 = vld [vmem:[%s8273_s6 + $0x3] ss:$0 sm:$0xff] }
0x14b7   :  { %v5403_v27 = vmul.f32 0.03125, %v5399_v24 }
0x14b8   :  { %v5406_v25 = vsub.f32 %v8176_v46, %v5404_v10 }
0x14b9   :  { %v5405_v26 = vsub.f32 %v8178_v42, %v5403_v27 }
0x14ba   :  { %v5408_v16 = vmul.f32 %v5406_v25, %v5406_v25  ;;  %v5424_v23 = vmul.f32 %v5997_v39, %v5406_v25 }
0x14bb   :  { %v5407_v35 = vmul.f32 %v5405_v26, %v5405_v26  ;;  %v5423_v55 = vmul.f32 %v5997_v39, %v5405_v26 }
0x14bc   :  { %v5412_v49 = vsel %vm48_vm0, %v5408_v16, 0.0 }
0x14bd   :  { %v5409_v47 = vsel %vm48_vm0, %v5407_v35, 0.0 }
0x14be   :  { %5410 = vadd.xlane.f32.xlu0 %v5409_v47 }
0x14c2   :  { %5413 = vadd.xlane.f32.xlu0 %v5412_v49 }
0x154b   :  { %v5411_v59 = vpop.xlane.xlu0 %5410 }
0x154c   :  { %v5415_v0 = vmul.f32 0.032258064, %v5411_v59 }
0x154e   :  { %7131 = vrsqrt.f32 %v5415_v0  ;;  %vm5427_vm3 = vcmp.eq.f32.partialorder %v5415_v0, inf  ;;  %v5430_v43 = vand.u32 2147483648, %v5415_v0  ;;  %vm5429_vm4 = vcmp.eq.f32.partialorder %v5415_v0, 0.0 }
0x154f   :  { %v5414_v13 = vpop.xlane.xlu0 %5413 }
0x1550   :  { %v5416_v28 = vmul.f32 0.032258064, %v5414_v13 }
0x1552   :  { %7133 = vrsqrt.f32 %v5416_v28  ;;  %vm5434_vm5 = vcmp.eq.f32.partialorder %v5416_v28, inf  ;;  %v5437_v15 = vand.u32 2147483648, %v5416_v28  ;;  %vm5436_vm6 = vcmp.eq.f32.partialorder %v5416_v28, 0.0 }
0x1558   :  { %v7132_v29 = vpop.eup %7131 }
0x1559   :  { %v5426_v37 = vmul.f32 %v7132_v29, %v5415_v0 }
0x155b   :  { %v5428_v53 = vsel %vm5427_vm3, %v5415_v0, %v5426_v37 }
0x155c   :  { %v7134_v61 = vpop.eup %7133  ;;  %v5431_v41 = vsel %vm5429_vm4, %v5430_v43, %v5428_v53  ;;  %v6020_v53 = vld [vmem:[%s8277_s10] ss:$0 sm:$0xff] }
0x155d   :  { %v5433_v9 = vmul.f32 %v7134_v61, %v5416_v28  ;;  %v5439_v8 = vadd.f32 1e-06, %v5431_v41 }
0x155f   :  { %v5435_v63 = vsel %vm5434_vm5, %v5416_v28, %v5433_v9  ;;  %7135 = vrcp.f32 %v5439_v8  ;;  %v6021_v8 = vld [vmem:[%s8277_s10 + $0x1] ss:$0 sm:$0xff] }
0x1560   :  { %v5438_v48 = vsel %vm5436_vm6, %v5437_v15, %v5435_v63 }
0x1561   :  { %v5440_v17 = vadd.f32 1e-06, %v5438_v48 }
0x1563   :  { %7137 = vrcp.f32 %v5440_v17 }
0x1569   :  { %v7136_v18 = vpop.eup %7135 }
0x156a   :  { %v5442_v22 = vmul.f32 %v7136_v18, %v5423_v55 }
0x156c   :  { %v5451_v30 = vadd.f32 %v5998_v21, %v5442_v22 }
0x156d   :  { %v7138_v31 = vpop.eup %7137 }
0x156e   :  { %v5444_v32 = vmul.f32 %v7138_v31, %v5424_v23  ;;  %6758 = vmatprep.mubr.msk.f32.mxu1 %vm48_vm0, %v5451_v30 }
0x1570   :  { %v5452_v33 = vadd.f32 %v5998_v21, %v5444_v32 }
0x1572   :  { %6759 = vmatmul.mubr.msk.f32.vlgmr.msra.gmra.mrb[62].mxu1 %vm48_vm0, %v5452_v33 }
0x1645   :  { %v6760_v38 = vpop.f32.mrb[62].mxu1 }
0x1646   :  { %v5544_v40 = vadd.f32 %v6760_v38, %v6004_v36  ;;  %v5538_v44 = vpop.f32.mrb[63].mxu1 }
0x1647   :  { %v5539_v14 = vadd.f32 %v6004_v36, %v5538_v44 }
0x1648   :  { %v5548_v54 = vmax.f32 %v5544_v40, 0.0 }
0x1649   :  { %v5547_v20 = vmax.f32 %v5539_v14, 0.0 }
0x164b   :  { %6777 = vmatprep.mubr.msk.f32.mxu0 %vm2753_vm13, %v5547_v20 }
0x164c   :  { %6778 = vmatmul.mubr.msk.f32.vlgmr.msra.gmra.mrb[58].mxu0 %vm2753_vm13, %v5548_v54 }
0x171f   :  { %v6779_v7 = vpop.f32.mrb[58].mxu0 }
0x1720   :  { %v5640_v10 = vadd.f32 %v6779_v7, %v8176_v46  ;;  %v5630_v24 = vpop.f32.mrb[59].mxu0 }
0x1721   :  { %v5639_v27 = vadd.f32 %v5630_v24, %v8178_v42 }
0x1722   :  { %v5650_v25 = vadd.f32 %v6018_v19, %v5640_v10 }
0x1723   :  { %v5649_v26 = vadd.f32 %v6018_v19, %v5639_v27 }
0x1724   :  { %v5657_v35 = vsel %vm48_vm0, %v5650_v25, 0.0 }
0x1725   :  { %5658 = vadd.xlane.f32.xlu1 %v5657_v35  ;;  %v5654_v47 = vsel %vm48_vm0, %v5649_v26, 0.0 }
0x1726   :  { %5655 = vadd.xlane.f32.xlu0 %v5654_v47 }
0x17b2   :  { %v5659_v16 = vpop.xlane.xlu1 %5658 }
0x17b3   :  { %v5661_v49 = vmul.f32 0.03125, %v5659_v16  ;;  %v5656_v50 = vpop.xlane.xlu0 %5655 }
0x17b4   :  { %v5660_v51 = vmul.f32 0.03125, %v5656_v50 }
0x17b5   :  { %v5663_v52 = vsub.f32 %v5650_v25, %v5661_v49 }
0x17b6   :  { %v5662_v56 = vsub.f32 %v5649_v26, %v5660_v51 }
0x17b7   :  { %v5665_v57 = vmul.f32 %v5663_v52, %v5663_v52  ;;  %v5681_v61 = vmul.f32 %v6020_v53, %v5663_v52 }
0x17b8   :  { %v5664_v58 = vmul.f32 %v5662_v56, %v5662_v56  ;;  %v5680_v9 = vmul.f32 %v6020_v53, %v5662_v56 }
0x17b9   :  { %v5669_v46 = vsel %vm48_vm0, %v5665_v57, 0.0 }
0x17ba   :  { %5670 = vadd.xlane.f32.xlu1 %v5669_v46  ;;  %v5666_v42 = vsel %vm48_vm0, %v5664_v58, 0.0 }
0x17bb   :  { %5667 = vadd.xlane.f32.xlu0 %v5666_v42 }
0x1847   :  { %v5671_v60 = vpop.xlane.xlu1 %5670 }
0x1848   :  { %v5673_v1 = vmul.f32 0.032258064, %v5671_v60  ;;  %v5668_v2 = vpop.xlane.xlu0 %5667 }
0x1849   :  { %v5672_v3 = vmul.f32 0.032258064, %v5668_v2 }
0x184a   :  { %7139 = vrsqrt.f32 %v5673_v1  ;;  %vm5691_vm7 = vcmp.eq.f32.partialorder %v5673_v1, inf  ;;  %v5694_v5 = vand.u32 2147483648, %v5673_v1  ;;  %vm5693_vm8 = vcmp.eq.f32.partialorder %v5673_v1, 0.0 }
0x184b   :  { %7141 = vrsqrt.f32 %v5672_v3  ;;  %vm5684_vm9 = vcmp.eq.f32.partialorder %v5672_v3, inf  ;;  %v5687_v0 = vand.u32 2147483648, %v5672_v3  ;;  %vm5686_vm10 = vcmp.eq.f32.partialorder %v5672_v3, 0.0 }
0x1854   :  { %v7140_v4 = vpop.eup %7139 }
0x1855   :  { %v7142_v45 = vpop.eup %7141  ;;  %v5690_v62 = vmul.f32 %v7140_v4, %v5673_v1 }
0x1856   :  { %v5683_v6 = vmul.f32 %v7142_v45, %v5672_v3 }
0x1857   :  { %v5692_v59 = vsel %vm5691_vm7, %v5673_v1, %v5690_v62 }
0x1858   :  { %v5695_v13 = vsel %vm5693_vm8, %v5694_v5, %v5692_v59  ;;  %v5685_v28 = vsel %vm5684_vm9, %v5672_v3, %v5683_v6 }
0x1859   :  { %v5697_v29 = vadd.f32 1e-06, %v5695_v13  ;;  %v5688_v37 = vsel %vm5686_vm10, %v5687_v0, %v5685_v28 }
0x185a   :  { %v5696_v43 = vadd.f32 1e-06, %v5688_v37 }
0x185b   :  { %7143 = vrcp.f32 %v5697_v29 }
0x185c   :  { %7145 = vrcp.f32 %v5696_v43 }
0x1865   :  { %v7144_v41 = vpop.eup %7143 }
0x1866   :  { %v7146_v15 = vpop.eup %7145  ;;  %v5701_v63 = vmul.f32 %v7144_v41, %v5681_v61 }
0x1867   :  { %v5699_v48 = vmul.f32 %v7146_v15, %v5680_v9 }
0x1868   :  { %v5709_v17 = vadd.f32 %v6021_v8, %v5701_v63 }
0x1869   :  { %v5708_v39 = vadd.f32 %v6021_v8, %v5699_v48 }
0x186a   :  { %5712 = vst.msk [vmem:[#allocation2 + $0x8] sm:$0xff] %vm48_vm0, %v5709_v17 }
0x186b   :  { %5710 = vst.msk [vmem:[#allocation2] sm:$0xff] %vm48_vm0, %v5708_v39 }
0x186c   :  { %7162 = shalt.err (!%p7159_p4)
}
0x186d   :  { %s7163_s19 = scalar_lea.hbm %s8278_s11, 256 }
0x186e   :  { %p7164_p5 = scmp.ne.s32.totalorder %s8278_s11, %s7163_s19  ;;  %p7167_p6 = scmp.lt.u32.totalorder %s7163_s19, %s8278_s11 }
0x1870   :  { %p7169_p7 = pnand %p7167_p6, %p7164_p5 }
0x1872   :  { %7172 = shalt.err (!%p7169_p7)
}
0x1873   :  { %s7181_s22 = smov 128  }
0x1874   :  { %5724 = dma.vmem_to_hbm [thread:$0]  %s5719_s14, 256, %s8278_s11, [#allocation3], %s7181_s22, %s7181_s22, %s7178_s17  }
0x1875   :  { %7173 = dma.done.wait [#allocation3], 256  }
0x1876   :  { %7174 = vsyncadd [#allocation3], 4294967040 }
0x1877   :  { %5728 = vsyncpa [#allocation3], 1 }

</bundles_post_ra>
